<compile_context>
chip_gen: v7x
topology: tpu7x:2x2x1
jax: 0.10.0
libtpu: 0.0.40
codegen_flags: <defaults>
</compile_context>

<pallas_src>
import jax
import jax.numpy as jnp
from jax import lax
from jax.experimental import pallas as pl
from jax.experimental.pallas import tpu as pltpu


def _resblock_kernel(x_ref, w1_ref, w2_ref, shifts_ref, out_ref, pad_scr, slab_scr):
    # x_ref      : (NB, H, W, C) f32     input block (also the residual)
    # w1_ref     : (9*slot, C) bf16      conv1 weights, tap-major, BN1 scale folded in
    # w2_ref     : (9*slot, C) bf16      conv2 weights, BN2 scale folded in
    # shifts_ref : (2, C) f32            row0 = shift1, row1 = shift2 (BN shift + bias fold)
    # out_ref    : (NB, H, W, C) f32
    # pad_scr    : (NB*(H+2), W+2, C) bf16   zero-bordered padded activation
    # slab_scr   : (NB*H*W, 9*slot) bf16     im2col slab, reused by both convs
    NB, H, W, C = out_ref.shape
    HW = H * W
    HP, WP = H + 2, W + 2
    slot = slab_scr.shape[1] // 9
    M = NB * HW

    # ---- per-step init of regions the stores below never overwrite ----------
    # (each grid step is self-contained -> grid axis can be "parallel")
    if slot != C:  # trace-time constant; compiled out when C % 128 == 0
        slab_scr[...] = jnp.zeros_like(slab_scr)

    col_zeros = jnp.zeros((pad_scr.shape[0], 1, C), pad_scr.dtype)
    pad_scr[:, 0:1, :] = col_zeros
    pad_scr[:, W + 1:W + 2, :] = col_zeros
    row_zeros = jnp.zeros((1, WP, C), pad_scr.dtype)
    for n in range(NB):
        pad_scr[n * HP:n * HP + 1, :, :] = row_zeros
        pad_scr[n * HP + H + 1:n * HP + H + 2, :, :] = row_zeros

    def write_interior_from(vals_mc):
        # (M, C) values -> interior of the zero-bordered padded scratch.
        for n in range(NB):
            pad_scr[n * HP + 1:n * HP + 1 + H, 1:W + 1, :] = (
                vals_mc[n * HW:(n + 1) * HW, :].reshape(H, W, C).astype(pad_scr.dtype))

    def build_slab():
        # im2col: scatter the 9 shifted taps of every padded image into the slab.
        # Every store lands at a 128-aligned lane offset (t * slot).
        for n in range(NB):
            img = pad_scr[n * HP:(n + 1) * HP]              # (HP, WP, C) bf16 value
            for t in range(9):
                dy, dx = divmod(t, 3)
                piece = img[dy:dy + H, dx:dx + W, :].reshape(HW, C)
                slab_scr[n * HW:(n + 1) * HW, t * slot:t * slot + C] = piece

    # ---- conv1: stage input, im2col, ONE MXU matmul (bf16 in, f32 acc) -------
    for n in range(NB):
        pad_scr[n * HP + 1:n * HP + 1 + H, 1:W + 1, :] = x_ref[n].astype(pad_scr.dtype)
    build_slab()
    acc1 = jnp.dot(slab_scr[...], w1_ref[...], preferred_element_type=jnp.float32)
    h1 = jnp.maximum(acc1 + shifts_ref[0:1, :], 0.0)        # BN1 shift + ReLU (f32)

    # ---- conv2: overwrite interior with h1, im2col, ONE MXU matmul -----------
    write_interior_from(h1)
    build_slab()
    acc2 = jnp.dot(slab_scr[...], w2_ref[...], preferred_element_type=jnp.float32)

    # ---- BN2 shift + residual add + ReLU, single lane-dense store ------------
    resid = x_ref[...].reshape(M, C)                         # f32 residual
    y = jnp.maximum(acc2 + shifts_ref[1:2, :] + resid, 0.0)
    out_ref[...] = y.reshape(NB, H, W, C).astype(out_ref.dtype)


def residual_block_pallas(x_nchw, w1, b1, w2, b2, bn1, bn2, eps=1e-5):
    """x_nchw: (N, C, H, W) f32. Conv weights are PyTorch-shaped (Cout, Cin, 3, 3)."""
    N, C, H, W = x_nchw.shape

    # Fold as many images as reasonable into the matmul M dimension per grid step.
    nb = 1
    for d in range(1, N + 1):
        if N % d == 0 and d * H * W <= 1024:
            nb = d

    # Per-tap lane slot, 128-aligned so all slab stores are lane-aligned.
    slot = ((C + 127) // 128) * 128

    # NCHW -> NHWC (no HBM-side spatial padding; the kernel pads in VMEM).
    x = jnp.transpose(x_nchw, (0, 2, 3, 1)).astype(jnp.float32)

    # Fold conv bias + inference-mode BatchNorm into per-channel scale/shift;
    # the scale is folded into the weights, only the shift is applied in-kernel.
    def fold_scale_shift(bias, bn):
        gamma, beta, mean, var = bn
        scale = gamma * lax.rsqrt(var + eps)
        shift = beta + scale * (bias - mean)
        return scale, shift

    s1, t1 = fold_scale_shift(b1, bn1)
    s2, t2 = fold_scale_shift(b2, bn2)
    shifts = jnp.stack([t1, t2], axis=0).astype(jnp.float32)          # (2, C)

    def prep_w(w, scale):
        # (Cout, Cin, 3, 3) -> tap-major (9, Cin, Cout), BN scale folded into Cout,
        # Cin padded up to the 128-aligned slot, flattened to (9*slot, Cout), bf16.
        taps = jnp.transpose(w, (2, 3, 1, 0)).reshape(9, C, C) * scale[None, None, :]
        wp = jnp.zeros((9, slot, C), jnp.float32).at[:, :C, :].set(taps)
        return wp.reshape(9 * slot, C).astype(jnp.bfloat16)

    w1m = prep_w(w1, s1)
    w2m = prep_w(w2, s2)

    out_nhwc = pl.pallas_call(
        _resblock_kernel,
        out_shape=jax.ShapeDtypeStruct((N, H, W, C), jnp.float32),
        grid=(N // nb,),
        in_specs=[
            pl.BlockSpec((nb, H, W, C), lambda g: (g, 0, 0, 0)),
            pl.BlockSpec((9 * slot, C), lambda g: (0, 0)),
            pl.BlockSpec((9 * slot, C), lambda g: (0, 0)),
            pl.BlockSpec((2, C), lambda g: (0, 0)),
        ],
        out_specs=pl.BlockSpec((nb, H, W, C), lambda g: (g, 0, 0, 0)),
        scratch_shapes=[
            pltpu.VMEM((nb * (H + 2), W + 2, C), jnp.bfloat16),   # padded activation
            pltpu.VMEM((nb * H * W, 9 * slot), jnp.bfloat16),     # im2col slab
        ],
        # Every step is self-contained -> allow megacore sharding of the grid axis.
        compiler_params=pltpu.CompilerParams(dimension_semantics=("parallel",)),
    )(x, w1m, w2m, shifts)

    return jnp.transpose(out_nhwc, (0, 3, 1, 2))  # back to NCHW


def residual_block_ref(x_nchw, w1, b1, w2, b2, bn1, bn2, eps=1e-5):
    """Plain-JAX reference (inference-mode BN), NCHW semantics."""
    x = jnp.transpose(x_nchw, (0, 2, 3, 1))  # NHWC

    def conv(h, w, b):
        w_hwio = jnp.transpose(w, (2, 3, 1, 0))
        y = lax.conv_general_dilated(
            h, w_hwio, window_strides=(1, 1), padding="SAME",
            dimension_numbers=("NHWC", "HWIO", "NHWC"))
        return y + b

    def bn(h, p):
        gamma, beta, mean, var = p
        return gamma * (h - mean) / jnp.sqrt(var + eps) + beta

    out = jax.nn.relu(bn(conv(x, w1, b1), bn1))
    out = bn(conv(out, w2, b2), bn2)
    out = jax.nn.relu(out + x)
    return jnp.transpose(out, (0, 3, 1, 2))


if __name__ == "__main__":
    # Small config consistent with the module (planes=channels, 3x3, stride 1).
    N, C, H, W = 2, 32, 8, 8

    key = jax.random.PRNGKey(0)
    ks = jax.random.split(key, 10)

    x = jax.random.normal(ks[0], (N, C, H, W), jnp.float32)

    w1 = jax.random.normal(ks[1], (C, C, 3, 3), jnp.float32) * 0.05
    b1 = jax.random.normal(ks[2], (C,), jnp.float32) * 0.1
    w2 = jax.random.normal(ks[3], (C, C, 3, 3), jnp.float32) * 0.05
    b2 = jax.random.normal(ks[4], (C,), jnp.float32) * 0.1

    bn1 = (1.0 + 0.1 * jax.random.normal(ks[5], (C,), jnp.float32),          # gamma
           0.1 * jax.random.normal(ks[6], (C,), jnp.float32),                 # beta
           0.1 * jax.random.normal(ks[7], (C,), jnp.float32),                 # running_mean
           1.0 + 0.1 * jnp.abs(jax.random.normal(ks[8], (C,), jnp.float32)))  # running_var
    bn2 = (1.0 + 0.05 * jnp.cos(jnp.arange(C, dtype=jnp.float32)),
           0.05 * jnp.sin(jnp.arange(C, dtype=jnp.float32)),
           0.05 * jnp.ones((C,), jnp.float32),
           1.0 + 0.1 * jnp.ones((C,), jnp.float32))

    out = residual_block_pallas(x, w1, b1, w2, b2, bn1, bn2)
    out = jax.block_until_ready(out)

    ref = residual_block_ref(x, w1, b1, w2, b2, bn1, bn2)
    assert out.shape == (N, C, H, W)
    # bf16 MXU operands (f32 accumulation) -> slightly looser tolerance than pure f32.
    assert jnp.allclose(out, ref, atol=2e-2, rtol=2e-2), "mismatch vs JAX reference"

    print("KERNEL_OK")
</pallas_src>

<mosaic_0001>
module attributes {stable_mosaic.version = 11 : i64} {
  func.func @_resblock_kernel(%arg0: i32, %arg1: memref<2x8x8x32xf32, #tpu.memory_space<vmem>>, %arg2: memref<1152x32xbf16, #tpu.memory_space<vmem>>, %arg3: memref<1152x32xbf16, #tpu.memory_space<vmem>>, %arg4: memref<2x32xf32, #tpu.memory_space<vmem>>, %arg5: memref<2x8x8x32xf32, #tpu.memory_space<vmem>>, %arg6: memref<20x10x32xbf16, #tpu.memory_space<vmem>>, %arg7: memref<128x1152xbf16, #tpu.memory_space<vmem>>) attributes {dimension_semantics = [#tpu.dimension_semantics<parallel>], iteration_bounds = array<i64: 1>, scalar_prefetch = 0 : i64, scratch_operands = 2 : i64, tpu.core_type = #tpu.core_type<tc>, window_params = [{transform_indices = @transform_0, window_bounds = array<i64: 2, 8, 8, 32>}, {pipeline_mode = #tpu.pipeline_mode<synchronous>, transform_indices = @transform_1, window_bounds = array<i64: 1152, 32>}, {pipeline_mode = #tpu.pipeline_mode<synchronous>, transform_indices = @transform_2, window_bounds = array<i64: 1152, 32>}, {pipeline_mode = #tpu.pipeline_mode<synchronous>, transform_indices = @transform_3, window_bounds = array<i64: 2, 32>}, {transform_indices = @transform_4, window_bounds = array<i64: 2, 8, 8, 32>}]} {
    %cst = arith.constant 0.000000e+00 : bf16
    %0 = vector.broadcast %cst : bf16 to vector<128x1152xbf16>
    %c0 = arith.constant 0 : index
    %c0_0 = arith.constant 0 : index
    %1 = vector.load %arg7[%c0, %c0_0] : memref<128x1152xbf16, #tpu.memory_space<vmem>>, vector<128x1152xbf16>
    tpu.vector_store %arg7[%c0, %c0_0], %0 {strides = array<i32>} : memref<128x1152xbf16, #tpu.memory_space<vmem>>, vector<128x1152xbf16>,
    %cst_1 = arith.constant 0.000000e+00 : bf16
    %2 = vector.broadcast %cst_1 : bf16 to vector<20x1x32xbf16>
    %c0_2 = arith.constant 0 : index
    %c0_3 = arith.constant 0 : index
    %c0_4 = arith.constant 0 : index
    %3 = vector.load %arg6[%c0_2, %c0_3, %c0_4] : memref<20x10x32xbf16, #tpu.memory_space<vmem>>, vector<20x1x32xbf16>
    tpu.vector_store %arg6[%c0_2, %c0_3, %c0_4], %2 {strides = array<i32>} : memref<20x10x32xbf16, #tpu.memory_space<vmem>>, vector<20x1x32xbf16>,
    %c0_5 = arith.constant 0 : index
    %c9 = arith.constant 9 : index
    %c0_6 = arith.constant 0 : index
    %4 = vector.load %arg6[%c0_5, %c9, %c0_6] : memref<20x10x32xbf16, #tpu.memory_space<vmem>>, vector<20x1x32xbf16>
    tpu.vector_store %arg6[%c0_5, %c9, %c0_6], %2 {strides = array<i32>} : memref<20x10x32xbf16, #tpu.memory_space<vmem>>, vector<20x1x32xbf16>,
    %cst_7 = arith.constant 0.000000e+00 : bf16
    %5 = vector.broadcast %cst_7 : bf16 to vector<1x10x32xbf16>
    %c0_8 = arith.constant 0 : index
    %c0_9 = arith.constant 0 : index
    %c0_10 = arith.constant 0 : index
    %6 = vector.load %arg6[%c0_8, %c0_9, %c0_10] : memref<20x10x32xbf16, #tpu.memory_space<vmem>>, vector<1x10x32xbf16>
    tpu.vector_store %arg6[%c0_8, %c0_9, %c0_10], %5 {strides = array<i32>} : memref<20x10x32xbf16, #tpu.memory_space<vmem>>, vector<1x10x32xbf16>,
    %c9_11 = arith.constant 9 : index
    %c0_12 = arith.constant 0 : index
    %c0_13 = arith.constant 0 : index
    %7 = vector.load %arg6[%c9_11, %c0_12, %c0_13] : memref<20x10x32xbf16, #tpu.memory_space<vmem>>, vector<1x10x32xbf16>
    tpu.vector_store %arg6[%c9_11, %c0_12, %c0_13], %5 {strides = array<i32>} : memref<20x10x32xbf16, #tpu.memory_space<vmem>>, vector<1x10x32xbf16>,
    %c10 = arith.constant 10 : index
    %c0_14 = arith.constant 0 : index
    %c0_15 = arith.constant 0 : index
    %8 = vector.load %arg6[%c10, %c0_14, %c0_15] : memref<20x10x32xbf16, #tpu.memory_space<vmem>>, vector<1x10x32xbf16>
    tpu.vector_store %arg6[%c10, %c0_14, %c0_15], %5 {strides = array<i32>} : memref<20x10x32xbf16, #tpu.memory_space<vmem>>, vector<1x10x32xbf16>,
    %c19 = arith.constant 19 : index
    %c0_16 = arith.constant 0 : index
    %c0_17 = arith.constant 0 : index
    %9 = vector.load %arg6[%c19, %c0_16, %c0_17] : memref<20x10x32xbf16, #tpu.memory_space<vmem>>, vector<1x10x32xbf16>
    tpu.vector_store %arg6[%c19, %c0_16, %c0_17], %5 {strides = array<i32>} : memref<20x10x32xbf16, #tpu.memory_space<vmem>>, vector<1x10x32xbf16>,
    %c0_18 = arith.constant 0 : index
    %c0_19 = arith.constant 0 : index
    %c0_20 = arith.constant 0 : index
    %c0_21 = arith.constant 0 : index
    %10 = vector.load %arg1[%c0_18, %c0_19, %c0_20, %c0_21] : memref<2x8x8x32xf32, #tpu.memory_space<vmem>>, vector<1x8x8x32xf32>
    %11 = vector.shape_cast %10 : vector<1x8x8x32xf32> to vector<8x8x32xf32>
    %12 = arith.truncf %11 : vector<8x8x32xf32> to vector<8x8x32xbf16>
    %c1 = arith.constant 1 : index
    %c1_22 = arith.constant 1 : index
    %c0_23 = arith.constant 0 : index
    %13 = vector.load %arg6[%c1, %c1_22, %c0_23] : memref<20x10x32xbf16, #tpu.memory_space<vmem>>, vector<8x8x32xbf16>
    tpu.vector_store %arg6[%c1, %c1_22, %c0_23], %12 {strides = array<i32>} : memref<20x10x32xbf16, #tpu.memory_space<vmem>>, vector<8x8x32xbf16>,
    %c1_24 = arith.constant 1 : index
    %c0_25 = arith.constant 0 : index
    %c0_26 = arith.constant 0 : index
    %c0_27 = arith.constant 0 : index
    %14 = vector.load %arg1[%c1_24, %c0_25, %c0_26, %c0_27] : memref<2x8x8x32xf32, #tpu.memory_space<vmem>>, vector<1x8x8x32xf32>
    %15 = vector.shape_cast %14 : vector<1x8x8x32xf32> to vector<8x8x32xf32>
    %16 = arith.truncf %15 : vector<8x8x32xf32> to vector<8x8x32xbf16>
    %c11 = arith.constant 11 : index
    %c1_28 = arith.constant 1 : index
    %c0_29 = arith.constant 0 : index
    %17 = vector.load %arg6[%c11, %c1_28, %c0_29] : memref<20x10x32xbf16, #tpu.memory_space<vmem>>, vector<8x8x32xbf16>
    tpu.vector_store %arg6[%c11, %c1_28, %c0_29], %16 {strides = array<i32>} : memref<20x10x32xbf16, #tpu.memory_space<vmem>>, vector<8x8x32xbf16>,
    %c0_30 = arith.constant 0 : index
    %c0_31 = arith.constant 0 : index
    %c0_32 = arith.constant 0 : index
    %18 = vector.load %arg6[%c0_30, %c0_31, %c0_32] : memref<20x10x32xbf16, #tpu.memory_space<vmem>>, vector<10x10x32xbf16>
    %19 = vector.extract_strided_slice %18 {offsets = [0, 0, 0], sizes = [8, 8, 32], strides = [1, 1, 1]} : vector<10x10x32xbf16> to vector<8x8x32xbf16>
    %20 = vector.shape_cast %19 : vector<8x8x32xbf16> to vector<64x32xbf16>
    %c0_33 = arith.constant 0 : index
    %c0_34 = arith.constant 0 : index
    %21 = vector.load %arg7[%c0_33, %c0_34] : memref<128x1152xbf16, #tpu.memory_space<vmem>>, vector<64x32xbf16>
    tpu.vector_store %arg7[%c0_33, %c0_34], %20 {strides = array<i32>} : memref<128x1152xbf16, #tpu.memory_space<vmem>>, vector<64x32xbf16>,
    %22 = vector.extract_strided_slice %18 {offsets = [0, 1, 0], sizes = [8, 8, 32], strides = [1, 1, 1]} : vector<10x10x32xbf16> to vector<8x8x32xbf16>
    %23 = vector.shape_cast %22 : vector<8x8x32xbf16> to vector<64x32xbf16>
    %c0_35 = arith.constant 0 : index
    %c128 = arith.constant 128 : index
    %24 = vector.load %arg7[%c0_35, %c128] : memref<128x1152xbf16, #tpu.memory_space<vmem>>, vector<64x32xbf16>
    tpu.vector_store %arg7[%c0_35, %c128], %23 {strides = array<i32>} : memref<128x1152xbf16, #tpu.memory_space<vmem>>, vector<64x32xbf16>,
    %25 = vector.extract_strided_slice %18 {offsets = [0, 2, 0], sizes = [8, 8, 32], strides = [1, 1, 1]} : vector<10x10x32xbf16> to vector<8x8x32xbf16>
    %26 = vector.shape_cast %25 : vector<8x8x32xbf16> to vector<64x32xbf16>
    %c0_36 = arith.constant 0 : index
    %c256 = arith.constant 256 : index
    %27 = vector.load %arg7[%c0_36, %c256] : memref<128x1152xbf16, #tpu.memory_space<vmem>>, vector<64x32xbf16>
    tpu.vector_store %arg7[%c0_36, %c256], %26 {strides = array<i32>} : memref<128x1152xbf16, #tpu.memory_space<vmem>>, vector<64x32xbf16>,
    %28 = vector.extract_strided_slice %18 {offsets = [1, 0, 0], sizes = [8, 8, 32], strides = [1, 1, 1]} : vector<10x10x32xbf16> to vector<8x8x32xbf16>
    %29 = vector.shape_cast %28 : vector<8x8x32xbf16> to vector<64x32xbf16>
    %c0_37 = arith.constant 0 : index
    %c384 = arith.constant 384 : index
    %30 = vector.load %arg7[%c0_37, %c384] : memref<128x1152xbf16, #tpu.memory_space<vmem>>, vector<64x32xbf16>
    tpu.vector_store %arg7[%c0_37, %c384], %29 {strides = array<i32>} : memref<128x1152xbf16, #tpu.memory_space<vmem>>, vector<64x32xbf16>,
    %31 = vector.extract_strided_slice %18 {offsets = [1, 1, 0], sizes = [8, 8, 32], strides = [1, 1, 1]} : vector<10x10x32xbf16> to vector<8x8x32xbf16>
    %32 = vector.shape_cast %31 : vector<8x8x32xbf16> to vector<64x32xbf16>
    %c0_38 = arith.constant 0 : index
    %c512 = arith.constant 512 : index
    %33 = vector.load %arg7[%c0_38, %c512] : memref<128x1152xbf16, #tpu.memory_space<vmem>>, vector<64x32xbf16>
    tpu.vector_store %arg7[%c0_38, %c512], %32 {strides = array<i32>} : memref<128x1152xbf16, #tpu.memory_space<vmem>>, vector<64x32xbf16>,
    %34 = vector.extract_strided_slice %18 {offsets = [1, 2, 0], sizes = [8, 8, 32], strides = [1, 1, 1]} : vector<10x10x32xbf16> to vector<8x8x32xbf16>
    %35 = vector.shape_cast %34 : vector<8x8x32xbf16> to vector<64x32xbf16>
    %c0_39 = arith.constant 0 : index
    %c640 = arith.constant 640 : index
    %36 = vector.load %arg7[%c0_39, %c640] : memref<128x1152xbf16, #tpu.memory_space<vmem>>, vector<64x32xbf16>
    tpu.vector_store %arg7[%c0_39, %c640], %35 {strides = array<i32>} : memref<128x1152xbf16, #tpu.memory_space<vmem>>, vector<64x32xbf16>,
    %37 = vector.extract_strided_slice %18 {offsets = [2, 0, 0], sizes = [8, 8, 32], strides = [1, 1, 1]} : vector<10x10x32xbf16> to vector<8x8x32xbf16>
    %38 = vector.shape_cast %37 : vector<8x8x32xbf16> to vector<64x32xbf16>
    %c0_40 = arith.constant 0 : index
    %c768 = arith.constant 768 : index
    %39 = vector.load %arg7[%c0_40, %c768] : memref<128x1152xbf16, #tpu.memory_space<vmem>>, vector<64x32xbf16>
    tpu.vector_store %arg7[%c0_40, %c768], %38 {strides = array<i32>} : memref<128x1152xbf16, #tpu.memory_space<vmem>>, vector<64x32xbf16>,
    %40 = vector.extract_strided_slice %18 {offsets = [2, 1, 0], sizes = [8, 8, 32], strides = [1, 1, 1]} : vector<10x10x32xbf16> to vector<8x8x32xbf16>
    %41 = vector.shape_cast %40 : vector<8x8x32xbf16> to vector<64x32xbf16>
    %c0_41 = arith.constant 0 : index
    %c896 = arith.constant 896 : index
    %42 = vector.load %arg7[%c0_41, %c896] : memref<128x1152xbf16, #tpu.memory_space<vmem>>, vector<64x32xbf16>
    tpu.vector_store %arg7[%c0_41, %c896], %41 {strides = array<i32>} : memref<128x1152xbf16, #tpu.memory_space<vmem>>, vector<64x32xbf16>,
    %43 = vector.extract_strided_slice %18 {offsets = [2, 2, 0], sizes = [8, 8, 32], strides = [1, 1, 1]} : vector<10x10x32xbf16> to vector<8x8x32xbf16>
    %44 = vector.shape_cast %43 : vector<8x8x32xbf16> to vector<64x32xbf16>
    %c0_42 = arith.constant 0 : index
    %c1024 = arith.constant 1024 : index
    %45 = vector.load %arg7[%c0_42, %c1024] : memref<128x1152xbf16, #tpu.memory_space<vmem>>, vector<64x32xbf16>
    tpu.vector_store %arg7[%c0_42, %c1024], %44 {strides = array<i32>} : memref<128x1152xbf16, #tpu.memory_space<vmem>>, vector<64x32xbf16>,
    %c10_43 = arith.constant 10 : index
    %c0_44 = arith.constant 0 : index
    %c0_45 = arith.constant 0 : index
    %46 = vector.load %arg6[%c10_43, %c0_44, %c0_45] : memref<20x10x32xbf16, #tpu.memory_space<vmem>>, vector<10x10x32xbf16>
    %47 = vector.extract_strided_slice %46 {offsets = [0, 0, 0], sizes = [8, 8, 32], strides = [1, 1, 1]} : vector<10x10x32xbf16> to vector<8x8x32xbf16>
    %48 = vector.shape_cast %47 : vector<8x8x32xbf16> to vector<64x32xbf16>
    %c64 = arith.constant 64 : index
    %c0_46 = arith.constant 0 : index
    %49 = vector.load %arg7[%c64, %c0_46] : memref<128x1152xbf16, #tpu.memory_space<vmem>>, vector<64x32xbf16>
    tpu.vector_store %arg7[%c64, %c0_46], %48 {strides = array<i32>} : memref<128x1152xbf16, #tpu.memory_space<vmem>>, vector<64x32xbf16>,
    %50 = vector.extract_strided_slice %46 {offsets = [0, 1, 0], sizes = [8, 8, 32], strides = [1, 1, 1]} : vector<10x10x32xbf16> to vector<8x8x32xbf16>
    %51 = vector.shape_cast %50 : vector<8x8x32xbf16> to vector<64x32xbf16>
    %c64_47 = arith.constant 64 : index
    %c128_48 = arith.constant 128 : index
    %52 = vector.load %arg7[%c64_47, %c128_48] : memref<128x1152xbf16, #tpu.memory_space<vmem>>, vector<64x32xbf16>
    tpu.vector_store %arg7[%c64_47, %c128_48], %51 {strides = array<i32>} : memref<128x1152xbf16, #tpu.memory_space<vmem>>, vector<64x32xbf16>,
    %53 = vector.extract_strided_slice %46 {offsets = [0, 2, 0], sizes = [8, 8, 32], strides = [1, 1, 1]} : vector<10x10x32xbf16> to vector<8x8x32xbf16>
    %54 = vector.shape_cast %53 : vector<8x8x32xbf16> to vector<64x32xbf16>
    %c64_49 = arith.constant 64 : index
    %c256_50 = arith.constant 256 : index
    %55 = vector.load %arg7[%c64_49, %c256_50] : memref<128x1152xbf16, #tpu.memory_space<vmem>>, vector<64x32xbf16>
    tpu.vector_store %arg7[%c64_49, %c256_50], %54 {strides = array<i32>} : memref<128x1152xbf16, #tpu.memory_space<vmem>>, vector<64x32xbf16>,
    %56 = vector.extract_strided_slice %46 {offsets = [1, 0, 0], sizes = [8, 8, 32], strides = [1, 1, 1]} : vector<10x10x32xbf16> to vector<8x8x32xbf16>
    %57 = vector.shape_cast %56 : vector<8x8x32xbf16> to vector<64x32xbf16>
    %c64_51 = arith.constant 64 : index
    %c384_52 = arith.constant 384 : index
    %58 = vector.load %arg7[%c64_51, %c384_52] : memref<128x1152xbf16, #tpu.memory_space<vmem>>, vector<64x32xbf16>
    tpu.vector_store %arg7[%c64_51, %c384_52], %57 {strides = array<i32>} : memref<128x1152xbf16, #tpu.memory_space<vmem>>, vector<64x32xbf16>,
    %59 = vector.extract_strided_slice %46 {offsets = [1, 1, 0], sizes = [8, 8, 32], strides = [1, 1, 1]} : vector<10x10x32xbf16> to vector<8x8x32xbf16>
    %60 = vector.shape_cast %59 : vector<8x8x32xbf16> to vector<64x32xbf16>
    %c64_53 = arith.constant 64 : index
    %c512_54 = arith.constant 512 : index
    %61 = vector.load %arg7[%c64_53, %c512_54] : memref<128x1152xbf16, #tpu.memory_space<vmem>>, vector<64x32xbf16>
    tpu.vector_store %arg7[%c64_53, %c512_54], %60 {strides = array<i32>} : memref<128x1152xbf16, #tpu.memory_space<vmem>>, vector<64x32xbf16>,
    %62 = vector.extract_strided_slice %46 {offsets = [1, 2, 0], sizes = [8, 8, 32], strides = [1, 1, 1]} : vector<10x10x32xbf16> to vector<8x8x32xbf16>
    %63 = vector.shape_cast %62 : vector<8x8x32xbf16> to vector<64x32xbf16>
    %c64_55 = arith.constant 64 : index
    %c640_56 = arith.constant 640 : index
    %64 = vector.load %arg7[%c64_55, %c640_56] : memref<128x1152xbf16, #tpu.memory_space<vmem>>, vector<64x32xbf16>
    tpu.vector_store %arg7[%c64_55, %c640_56], %63 {strides = array<i32>} : memref<128x1152xbf16, #tpu.memory_space<vmem>>, vector<64x32xbf16>,
    %65 = vector.extract_strided_slice %46 {offsets = [2, 0, 0], sizes = [8, 8, 32], strides = [1, 1, 1]} : vector<10x10x32xbf16> to vector<8x8x32xbf16>
    %66 = vector.shape_cast %65 : vector<8x8x32xbf16> to vector<64x32xbf16>
    %c64_57 = arith.constant 64 : index
    %c768_58 = arith.constant 768 : index
    %67 = vector.load %arg7[%c64_57, %c768_58] : memref<128x1152xbf16, #tpu.memory_space<vmem>>, vector<64x32xbf16>
    tpu.vector_store %arg7[%c64_57, %c768_58], %66 {strides = array<i32>} : memref<128x1152xbf16, #tpu.memory_space<vmem>>, vector<64x32xbf16>,
    %68 = vector.extract_strided_slice %46 {offsets = [2, 1, 0], sizes = [8, 8, 32], strides = [1, 1, 1]} : vector<10x10x32xbf16> to vector<8x8x32xbf16>
    %69 = vector.shape_cast %68 : vector<8x8x32xbf16> to vector<64x32xbf16>
    %c64_59 = arith.constant 64 : index
    %c896_60 = arith.constant 896 : index
    %70 = vector.load %arg7[%c64_59, %c896_60] : memref<128x1152xbf16, #tpu.memory_space<vmem>>, vector<64x32xbf16>
    tpu.vector_store %arg7[%c64_59, %c896_60], %69 {strides = array<i32>} : memref<128x1152xbf16, #tpu.memory_space<vmem>>, vector<64x32xbf16>,
    %71 = vector.extract_strided_slice %46 {offsets = [2, 2, 0], sizes = [8, 8, 32], strides = [1, 1, 1]} : vector<10x10x32xbf16> to vector<8x8x32xbf16>
    %72 = vector.shape_cast %71 : vector<8x8x32xbf16> to vector<64x32xbf16>
    %c64_61 = arith.constant 64 : index
    %c1024_62 = arith.constant 1024 : index
    %73 = vector.load %arg7[%c64_61, %c1024_62] : memref<128x1152xbf16, #tpu.memory_space<vmem>>, vector<64x32xbf16>
    tpu.vector_store %arg7[%c64_61, %c1024_62], %72 {strides = array<i32>} : memref<128x1152xbf16, #tpu.memory_space<vmem>>, vector<64x32xbf16>,
    %c0_63 = arith.constant 0 : index
    %c0_64 = arith.constant 0 : index
    %74 = vector.load %arg7[%c0_63, %c0_64] : memref<128x1152xbf16, #tpu.memory_space<vmem>>, vector<128x1152xbf16>
    %c0_65 = arith.constant 0 : index
    %c0_66 = arith.constant 0 : index
    %75 = vector.load %arg2[%c0_65, %c0_66] : memref<1152x32xbf16, #tpu.memory_space<vmem>>, vector<1152x32xbf16>
    %cst_67 = arith.constant dense<0.000000e+00> : vector<128x32xf32>
    %76 = tpu.matmul %74, %75, %cst_67 {dimension_numbers = #tpu.dot_dimension_numbers<[1], [0], [0], [1], [0, 0, 1, 1], [], []>} : vector<128x1152xbf16>, vector<1152x32xbf16>, vector<128x32xf32> -> vector<128x32xf32>
    %c0_68 = arith.constant 0 : index
    %c0_69 = arith.constant 0 : index
    %77 = vector.load %arg4[%c0_68, %c0_69] : memref<2x32xf32, #tpu.memory_space<vmem>>, vector<1x32xf32>
    %78 = vector.broadcast %77 : vector<1x32xf32> to vector<128x32xf32>
    %79 = arith.addf %76, %78 : vector<128x32xf32>
    %cst_70 = arith.constant 0.000000e+00 : f32
    %80 = vector.broadcast %cst_70 : f32 to vector<128x32xf32>
    %81 = arith.maximumf %79, %80 : vector<128x32xf32>
    %82 = vector.extract_strided_slice %81 {offsets = [0, 0], sizes = [64, 32], strides = [1, 1]} : vector<128x32xf32> to vector<64x32xf32>
    %83 = vector.shape_cast %82 : vector<64x32xf32> to vector<8x8x32xf32>
    %84 = arith.truncf %83 : vector<8x8x32xf32> to vector<8x8x32xbf16>
    %c1_71 = arith.constant 1 : index
    %c1_72 = arith.constant 1 : index
    %c0_73 = arith.constant 0 : index
    %85 = vector.load %arg6[%c1_71, %c1_72, %c0_73] : memref<20x10x32xbf16, #tpu.memory_space<vmem>>, vector<8x8x32xbf16>
    tpu.vector_store %arg6[%c1_71, %c1_72, %c0_73], %84 {strides = array<i32>} : memref<20x10x32xbf16, #tpu.memory_space<vmem>>, vector<8x8x32xbf16>,
    %86 = vector.extract_strided_slice %81 {offsets = [64, 0], sizes = [64, 32], strides = [1, 1]} : vector<128x32xf32> to vector<64x32xf32>
    %87 = vector.shape_cast %86 : vector<64x32xf32> to vector<8x8x32xf32>
    %88 = arith.truncf %87 : vector<8x8x32xf32> to vector<8x8x32xbf16>
    %c11_74 = arith.constant 11 : index
    %c1_75 = arith.constant 1 : index
    %c0_76 = arith.constant 0 : index
    %89 = vector.load %arg6[%c11_74, %c1_75, %c0_76] : memref<20x10x32xbf16, #tpu.memory_space<vmem>>, vector<8x8x32xbf16>
    tpu.vector_store %arg6[%c11_74, %c1_75, %c0_76], %88 {strides = array<i32>} : memref<20x10x32xbf16, #tpu.memory_space<vmem>>, vector<8x8x32xbf16>,
    %c0_77 = arith.constant 0 : index
    %c0_78 = arith.constant 0 : index
    %c0_79 = arith.constant 0 : index
    %90 = vector.load %arg6[%c0_77, %c0_78, %c0_79] : memref<20x10x32xbf16, #tpu.memory_space<vmem>>, vector<10x10x32xbf16>
    %91 = vector.extract_strided_slice %90 {offsets = [0, 0, 0], sizes = [8, 8, 32], strides = [1, 1, 1]} : vector<10x10x32xbf16> to vector<8x8x32xbf16>
    %92 = vector.shape_cast %91 : vector<8x8x32xbf16> to vector<64x32xbf16>
    %c0_80 = arith.constant 0 : index
    %c0_81 = arith.constant 0 : index
    %93 = vector.load %arg7[%c0_80, %c0_81] : memref<128x1152xbf16, #tpu.memory_space<vmem>>, vector<64x32xbf16>
    tpu.vector_store %arg7[%c0_80, %c0_81], %92 {strides = array<i32>} : memref<128x1152xbf16, #tpu.memory_space<vmem>>, vector<64x32xbf16>,
    %94 = vector.extract_strided_slice %90 {offsets = [0, 1, 0], sizes = [8, 8, 32], strides = [1, 1, 1]} : vector<10x10x32xbf16> to vector<8x8x32xbf16>
    %95 = vector.shape_cast %94 : vector<8x8x32xbf16> to vector<64x32xbf16>
    %c0_82 = arith.constant 0 : index
    %c128_83 = arith.constant 128 : index
    %96 = vector.load %arg7[%c0_82, %c128_83] : memref<128x1152xbf16, #tpu.memory_space<vmem>>, vector<64x32xbf16>
    tpu.vector_store %arg7[%c0_82, %c128_83], %95 {strides = array<i32>} : memref<128x1152xbf16, #tpu.memory_space<vmem>>, vector<64x32xbf16>,
    %97 = vector.extract_strided_slice %90 {offsets = [0, 2, 0], sizes = [8, 8, 32], strides = [1, 1, 1]} : vector<10x10x32xbf16> to vector<8x8x32xbf16>
    %98 = vector.shape_cast %97 : vector<8x8x32xbf16> to vector<64x32xbf16>
    %c0_84 = arith.constant 0 : index
    %c256_85 = arith.constant 256 : index
    %99 = vector.load %arg7[%c0_84, %c256_85] : memref<128x1152xbf16, #tpu.memory_space<vmem>>, vector<64x32xbf16>
    tpu.vector_store %arg7[%c0_84, %c256_85], %98 {strides = array<i32>} : memref<128x1152xbf16, #tpu.memory_space<vmem>>, vector<64x32xbf16>,
    %100 = vector.extract_strided_slice %90 {offsets = [1, 0, 0], sizes = [8, 8, 32], strides = [1, 1, 1]} : vector<10x10x32xbf16> to vector<8x8x32xbf16>
    %101 = vector.shape_cast %100 : vector<8x8x32xbf16> to vector<64x32xbf16>
    %c0_86 = arith.constant 0 : index
    %c384_87 = arith.constant 384 : index
    %102 = vector.load %arg7[%c0_86, %c384_87] : memref<128x1152xbf16, #tpu.memory_space<vmem>>, vector<64x32xbf16>
    tpu.vector_store %arg7[%c0_86, %c384_87], %101 {strides = array<i32>} : memref<128x1152xbf16, #tpu.memory_space<vmem>>, vector<64x32xbf16>,
    %103 = vector.extract_strided_slice %90 {offsets = [1, 1, 0], sizes = [8, 8, 32], strides = [1, 1, 1]} : vector<10x10x32xbf16> to vector<8x8x32xbf16>
    %104 = vector.shape_cast %103 : vector<8x8x32xbf16> to vector<64x32xbf16>
    %c0_88 = arith.constant 0 : index
    %c512_89 = arith.constant 512 : index
    %105 = vector.load %arg7[%c0_88, %c512_89] : memref<128x1152xbf16, #tpu.memory_space<vmem>>, vector<64x32xbf16>
    tpu.vector_store %arg7[%c0_88, %c512_89], %104 {strides = array<i32>} : memref<128x1152xbf16, #tpu.memory_space<vmem>>, vector<64x32xbf16>,
    %106 = vector.extract_strided_slice %90 {offsets = [1, 2, 0], sizes = [8, 8, 32], strides = [1, 1, 1]} : vector<10x10x32xbf16> to vector<8x8x32xbf16>
    %107 = vector.shape_cast %106 : vector<8x8x32xbf16> to vector<64x32xbf16>
    %c0_90 = arith.constant 0 : index
    %c640_91 = arith.constant 640 : index
    %108 = vector.load %arg7[%c0_90, %c640_91] : memref<128x1152xbf16, #tpu.memory_space<vmem>>, vector<64x32xbf16>
    tpu.vector_store %arg7[%c0_90, %c640_91], %107 {strides = array<i32>} : memref<128x1152xbf16, #tpu.memory_space<vmem>>, vector<64x32xbf16>,
    %109 = vector.extract_strided_slice %90 {offsets = [2, 0, 0], sizes = [8, 8, 32], strides = [1, 1, 1]} : vector<10x10x32xbf16> to vector<8x8x32xbf16>
    %110 = vector.shape_cast %109 : vector<8x8x32xbf16> to vector<64x32xbf16>
    %c0_92 = arith.constant 0 : index
    %c768_93 = arith.constant 768 : index
    %111 = vector.load %arg7[%c0_92, %c768_93] : memref<128x1152xbf16, #tpu.memory_space<vmem>>, vector<64x32xbf16>
    tpu.vector_store %arg7[%c0_92, %c768_93], %110 {strides = array<i32>} : memref<128x1152xbf16, #tpu.memory_space<vmem>>, vector<64x32xbf16>,
    %112 = vector.extract_strided_slice %90 {offsets = [2, 1, 0], sizes = [8, 8, 32], strides = [1, 1, 1]} : vector<10x10x32xbf16> to vector<8x8x32xbf16>
    %113 = vector.shape_cast %112 : vector<8x8x32xbf16> to vector<64x32xbf16>
    %c0_94 = arith.constant 0 : index
    %c896_95 = arith.constant 896 : index
    %114 = vector.load %arg7[%c0_94, %c896_95] : memref<128x1152xbf16, #tpu.memory_space<vmem>>, vector<64x32xbf16>
    tpu.vector_store %arg7[%c0_94, %c896_95], %113 {strides = array<i32>} : memref<128x1152xbf16, #tpu.memory_space<vmem>>, vector<64x32xbf16>,
    %115 = vector.extract_strided_slice %90 {offsets = [2, 2, 0], sizes = [8, 8, 32], strides = [1, 1, 1]} : vector<10x10x32xbf16> to vector<8x8x32xbf16>
    %116 = vector.shape_cast %115 : vector<8x8x32xbf16> to vector<64x32xbf16>
    %c0_96 = arith.constant 0 : index
    %c1024_97 = arith.constant 1024 : index
    %117 = vector.load %arg7[%c0_96, %c1024_97] : memref<128x1152xbf16, #tpu.memory_space<vmem>>, vector<64x32xbf16>
    tpu.vector_store %arg7[%c0_96, %c1024_97], %116 {strides = array<i32>} : memref<128x1152xbf16, #tpu.memory_space<vmem>>, vector<64x32xbf16>,
    %c10_98 = arith.constant 10 : index
    %c0_99 = arith.constant 0 : index
    %c0_100 = arith.constant 0 : index
    %118 = vector.load %arg6[%c10_98, %c0_99, %c0_100] : memref<20x10x32xbf16, #tpu.memory_space<vmem>>, vector<10x10x32xbf16>
    %119 = vector.extract_strided_slice %118 {offsets = [0, 0, 0], sizes = [8, 8, 32], strides = [1, 1, 1]} : vector<10x10x32xbf16> to vector<8x8x32xbf16>
    %120 = vector.shape_cast %119 : vector<8x8x32xbf16> to vector<64x32xbf16>
    %c64_101 = arith.constant 64 : index
    %c0_102 = arith.constant 0 : index
    %121 = vector.load %arg7[%c64_101, %c0_102] : memref<128x1152xbf16, #tpu.memory_space<vmem>>, vector<64x32xbf16>
    tpu.vector_store %arg7[%c64_101, %c0_102], %120 {strides = array<i32>} : memref<128x1152xbf16, #tpu.memory_space<vmem>>, vector<64x32xbf16>,
    %122 = vector.extract_strided_slice %118 {offsets = [0, 1, 0], sizes = [8, 8, 32], strides = [1, 1, 1]} : vector<10x10x32xbf16> to vector<8x8x32xbf16>
    %123 = vector.shape_cast %122 : vector<8x8x32xbf16> to vector<64x32xbf16>
    %c64_103 = arith.constant 64 : index
    %c128_104 = arith.constant 128 : index
    %124 = vector.load %arg7[%c64_103, %c128_104] : memref<128x1152xbf16, #tpu.memory_space<vmem>>, vector<64x32xbf16>
    tpu.vector_store %arg7[%c64_103, %c128_104], %123 {strides = array<i32>} : memref<128x1152xbf16, #tpu.memory_space<vmem>>, vector<64x32xbf16>,
    %125 = vector.extract_strided_slice %118 {offsets = [0, 2, 0], sizes = [8, 8, 32], strides = [1, 1, 1]} : vector<10x10x32xbf16> to vector<8x8x32xbf16>
    %126 = vector.shape_cast %125 : vector<8x8x32xbf16> to vector<64x32xbf16>
    %c64_105 = arith.constant 64 : index
    %c256_106 = arith.constant 256 : index
    %127 = vector.load %arg7[%c64_105, %c256_106] : memref<128x1152xbf16, #tpu.memory_space<vmem>>, vector<64x32xbf16>
    tpu.vector_store %arg7[%c64_105, %c256_106], %126 {strides = array<i32>} : memref<128x1152xbf16, #tpu.memory_space<vmem>>, vector<64x32xbf16>,
    %128 = vector.extract_strided_slice %118 {offsets = [1, 0, 0], sizes = [8, 8, 32], strides = [1, 1, 1]} : vector<10x10x32xbf16> to vector<8x8x32xbf16>
    %129 = vector.shape_cast %128 : vector<8x8x32xbf16> to vector<64x32xbf16>
    %c64_107 = arith.constant 64 : index
    %c384_108 = arith.constant 384 : index
    %130 = vector.load %arg7[%c64_107, %c384_108] : memref<128x1152xbf16, #tpu.memory_space<vmem>>, vector<64x32xbf16>
    tpu.vector_store %arg7[%c64_107, %c384_108], %129 {strides = array<i32>} : memref<128x1152xbf16, #tpu.memory_space<vmem>>, vector<64x32xbf16>,
    %131 = vector.extract_strided_slice %118 {offsets = [1, 1, 0], sizes = [8, 8, 32], strides = [1, 1, 1]} : vector<10x10x32xbf16> to vector<8x8x32xbf16>
    %132 = vector.shape_cast %131 : vector<8x8x32xbf16> to vector<64x32xbf16>
    %c64_109 = arith.constant 64 : index
    %c512_110 = arith.constant 512 : index
    %133 = vector.load %arg7[%c64_109, %c512_110] : memref<128x1152xbf16, #tpu.memory_space<vmem>>, vector<64x32xbf16>
    tpu.vector_store %arg7[%c64_109, %c512_110], %132 {strides = array<i32>} : memref<128x1152xbf16, #tpu.memory_space<vmem>>, vector<64x32xbf16>,
    %134 = vector.extract_strided_slice %118 {offsets = [1, 2, 0], sizes = [8, 8, 32], strides = [1, 1, 1]} : vector<10x10x32xbf16> to vector<8x8x32xbf16>
    %135 = vector.shape_cast %134 : vector<8x8x32xbf16> to vector<64x32xbf16>
    %c64_111 = arith.constant 64 : index
    %c640_112 = arith.constant 640 : index
    %136 = vector.load %arg7[%c64_111, %c640_112] : memref<128x1152xbf16, #tpu.memory_space<vmem>>, vector<64x32xbf16>
    tpu.vector_store %arg7[%c64_111, %c640_112], %135 {strides = array<i32>} : memref<128x1152xbf16, #tpu.memory_space<vmem>>, vector<64x32xbf16>,
    %137 = vector.extract_strided_slice %118 {offsets = [2, 0, 0], sizes = [8, 8, 32], strides = [1, 1, 1]} : vector<10x10x32xbf16> to vector<8x8x32xbf16>
    %138 = vector.shape_cast %137 : vector<8x8x32xbf16> to vector<64x32xbf16>
    %c64_113 = arith.constant 64 : index
    %c768_114 = arith.constant 768 : index
    %139 = vector.load %arg7[%c64_113, %c768_114] : memref<128x1152xbf16, #tpu.memory_space<vmem>>, vector<64x32xbf16>
    tpu.vector_store %arg7[%c64_113, %c768_114], %138 {strides = array<i32>} : memref<128x1152xbf16, #tpu.memory_space<vmem>>, vector<64x32xbf16>,
    %140 = vector.extract_strided_slice %118 {offsets = [2, 1, 0], sizes = [8, 8, 32], strides = [1, 1, 1]} : vector<10x10x32xbf16> to vector<8x8x32xbf16>
    %141 = vector.shape_cast %140 : vector<8x8x32xbf16> to vector<64x32xbf16>
    %c64_115 = arith.constant 64 : index
    %c896_116 = arith.constant 896 : index
    %142 = vector.load %arg7[%c64_115, %c896_116] : memref<128x1152xbf16, #tpu.memory_space<vmem>>, vector<64x32xbf16>
    tpu.vector_store %arg7[%c64_115, %c896_116], %141 {strides = array<i32>} : memref<128x1152xbf16, #tpu.memory_space<vmem>>, vector<64x32xbf16>,
    %143 = vector.extract_strided_slice %118 {offsets = [2, 2, 0], sizes = [8, 8, 32], strides = [1, 1, 1]} : vector<10x10x32xbf16> to vector<8x8x32xbf16>
    %144 = vector.shape_cast %143 : vector<8x8x32xbf16> to vector<64x32xbf16>
    %c64_117 = arith.constant 64 : index
    %c1024_118 = arith.constant 1024 : index
    %145 = vector.load %arg7[%c64_117, %c1024_118] : memref<128x1152xbf16, #tpu.memory_space<vmem>>, vector<64x32xbf16>
    tpu.vector_store %arg7[%c64_117, %c1024_118], %144 {strides = array<i32>} : memref<128x1152xbf16, #tpu.memory_space<vmem>>, vector<64x32xbf16>,
    %c0_119 = arith.constant 0 : index
    %c0_120 = arith.constant 0 : index
    %146 = vector.load %arg7[%c0_119, %c0_120] : memref<128x1152xbf16, #tpu.memory_space<vmem>>, vector<128x1152xbf16>
    %c0_121 = arith.constant 0 : index
    %c0_122 = arith.constant 0 : index
    %147 = vector.load %arg3[%c0_121, %c0_122] : memref<1152x32xbf16, #tpu.memory_space<vmem>>, vector<1152x32xbf16>
    %cst_123 = arith.constant dense<0.000000e+00> : vector<128x32xf32>
    %148 = tpu.matmul %146, %147, %cst_123 {dimension_numbers = #tpu.dot_dimension_numbers<[1], [0], [0], [1], [0, 0, 1, 1], [], []>} : vector<128x1152xbf16>, vector<1152x32xbf16>, vector<128x32xf32> -> vector<128x32xf32>
    %c0_124 = arith.constant 0 : index
    %c0_125 = arith.constant 0 : index
    %c0_126 = arith.constant 0 : index
    %c0_127 = arith.constant 0 : index
    %149 = vector.load %arg1[%c0_124, %c0_125, %c0_126, %c0_127] : memref<2x8x8x32xf32, #tpu.memory_space<vmem>>, vector<2x8x8x32xf32>
    %150 = vector.shape_cast %149 : vector<2x8x8x32xf32> to vector<128x32xf32>
    %c1_128 = arith.constant 1 : index
    %c0_129 = arith.constant 0 : index
    %151 = vector.load %arg4[%c1_128, %c0_129] : memref<2x32xf32, #tpu.memory_space<vmem>>, vector<1x32xf32>
    %152 = vector.broadcast %151 : vector<1x32xf32> to vector<128x32xf32>
    %153 = arith.addf %148, %152 : vector<128x32xf32>
    %154 = arith.addf %153, %150 : vector<128x32xf32>
    %cst_130 = arith.constant 0.000000e+00 : f32
    %155 = vector.broadcast %cst_130 : f32 to vector<128x32xf32>
    %156 = arith.maximumf %154, %155 : vector<128x32xf32>
    %157 = vector.shape_cast %156 : vector<128x32xf32> to vector<2x8x8x32xf32>
    %c0_131 = arith.constant 0 : index
    %c0_132 = arith.constant 0 : index
    %c0_133 = arith.constant 0 : index
    %c0_134 = arith.constant 0 : index
    %158 = vector.load %arg5[%c0_131, %c0_132, %c0_133, %c0_134] : memref<2x8x8x32xf32, #tpu.memory_space<vmem>>, vector<2x8x8x32xf32>
    tpu.vector_store %arg5[%c0_131, %c0_132, %c0_133, %c0_134], %157 {strides = array<i32>} : memref<2x8x8x32xf32, #tpu.memory_space<vmem>>, vector<2x8x8x32xf32>,
    return
  }
  func.func @transform_0(%arg0: i32) -> (i32, i32, i32, i32) {
    %c0_i32 = arith.constant 0 : i32
    %c0_i32_0 = arith.constant 0 : i32
    %c0_i32_1 = arith.constant 0 : i32
    %c0_i32_2 = arith.constant 0 : i32
    return %arg0, %c0_i32, %c0_i32_0, %c0_i32_1 : i32, i32, i32, i32
  }
  func.func @transform_1(%arg0: i32) -> (i32, i32) {
    %c0_i32 = arith.constant 0 : i32
    %c0_i32_0 = arith.constant 0 : i32
    %c0_i32_1 = arith.constant 0 : i32
    return %c0_i32, %c0_i32_0 : i32, i32
  }
  func.func @transform_2(%arg0: i32) -> (i32, i32) {
    %c0_i32 = arith.constant 0 : i32
    %c0_i32_0 = arith.constant 0 : i32
    %c0_i32_1 = arith.constant 0 : i32
    return %c0_i32, %c0_i32_0 : i32, i32
  }
  func.func @transform_3(%arg0: i32) -> (i32, i32) {
    %c0_i32 = arith.constant 0 : i32
    %c0_i32_0 = arith.constant 0 : i32
    %c0_i32_1 = arith.constant 0 : i32
    return %c0_i32, %c0_i32_0 : i32, i32
  }
  func.func @transform_4(%arg0: i32) -> (i32, i32, i32, i32) {
    %c0_i32 = arith.constant 0 : i32
    %c0_i32_0 = arith.constant 0 : i32
    %c0_i32_1 = arith.constant 0 : i32
    %c0_i32_2 = arith.constant 0 : i32
    return %arg0, %c0_i32, %c0_i32_0, %c0_i32_1 : i32, i32, i32, i32
  }
}

</mosaic_0001>

<bundles_post_ra>
// kernel: tpu_custom_call.1
= control target key start
LH: loop header
LB: loop body
LE: loop exit
PB: predicated region body
PF: predicated region fallthrough
CT: control target
= control target key end

     0   :  { %v5788_v2 = vmov 0   ;;  %vm91_vm0 = vcmask 253952   ;;  %vm92_vm1 = vsmask.f32 256  ;;  %v94_v32 = vld [vmem:[#allocation2] sm:$0x1]  ;;  %s7804_s0 = inlined_call_operand.vmem [shape: f32[2,8,8,32], index: 0, kind: input, shape index: {}]   ;;  %s7805_s1 = inlined_call_operand.vmem [shape: bf16[1152,32], index: 1, kind: input, shape index: {}]   ;;  %s7806_s2 = inlined_call_operand.vmem [shape: bf16[1152,32], index: 2, kind: input, shape index: {}]   ;;  %s7807_s3 = inlined_call_operand.vmem [shape: f32[2,32], index: 3, kind: input, shape index: {}]   ;;  %s7808_s4 = inlined_call_operand.hbm [shape: f32[2,8,8,32], index: 4, kind: output, shape index: {}]  }
   0x1   :  { %v5820_v0 = vld [vmem:[%s7805_s1 + $0x40] sm:$0xff]   ;;  %20 = vst [vmem:[#allocation3 + $0x8] sm:$0xff] %v5788_v2  ;;  %19 = vst [vmem:[#allocation3] sm:$0xff] %v5788_v2  ;;  %v5610_v4 = vld [vmem:[%s7805_s1 + $0x48] sm:$0xff]   ;;  %vm154_vm3 = vsmask.f32 7938 }
   0x2   :  { %v5825_v1 = vld [vmem:[%s7805_s1] sm:$0xff]   ;;  %21 = vst [vmem:[#allocation3 + $0x10] sm:$0xff] %v5788_v2  ;;  %22 = vst [vmem:[#allocation3 + $0x18] sm:$0xff] %v5788_v2  ;;  %4995 = vmatprep.subr.bf16.mxu0 %v5820_v0  ;;  %v5612_v6 = vld [vmem:[%s7805_s1 + $0x8] sm:$0xff]   ;;  %vm216_vm5 = vcmask 257024   ;;  %vm762_vm9 = vcmask 1042432  }
   0x3   :  { %23 = vst [vmem:[#allocation3 + $0x20] sm:$0xff] %v5788_v2  ;;  %24 = vst [vmem:[#allocation3 + $0x28] sm:$0xff] %v5788_v2  ;;  %v5609_v3 = vld [vmem:[%s7805_s1 + $0xc0] sm:$0xff]   ;;  %4996 = vmatpush3.bf16.msra.mxu0 %v5825_v1  ;;  %v5613_v7 = vld [vmem:[%s7805_s1 + $0xc8] sm:$0xff]   ;;  %vm619_vm6 = vsmask.f32 3328 }
   0x4   :  { %25 = vst [vmem:[#allocation3 + $0x30] sm:$0xff] %v5788_v2  ;;  %26 = vst [vmem:[#allocation3 + $0x38] sm:$0xff] %v5788_v2  ;;  %5059 = vmatprep.subr.bf16.mxu1 %v5609_v3  ;;  %v5611_v5 = vld [vmem:[%s7805_s1 + $0x80] sm:$0xff]   ;;  %4997 = vmatprep.subr.bf16.mxu0 %v5610_v4  ;;  %v5614_v8 = vld [vmem:[%s7805_s1 + $0x50] sm:$0xff]   ;;  %vm620_vm7 = vsmask.f32 7440 }
   0x5   :  { %27 = vst [vmem:[#allocation3 + $0x40] sm:$0xff] %v5788_v2  ;;  %28 = vst [vmem:[#allocation3 + $0x48] sm:$0xff] %v5788_v2  ;;  %5060 = vmatpush3.bf16.msra.mxu1 %v5611_v5  ;;  %v5615_v9 = vld [vmem:[%s7805_s1 + $0x88] sm:$0xff]   ;;  %v5616_v10 = vld [vmem:[%s7805_s1 + $0x10] sm:$0xff]   ;;  %vm763_vm10 = vcmask 1046532   ;;  %vm614_vm12 = vcmask 261120  }
   0x6   :  { %29 = vst [vmem:[#allocation3 + $0x50] sm:$0xff] %v5788_v2  ;;  %30 = vst [vmem:[#allocation3 + $0x58] sm:$0xff] %v5788_v2  ;;  %5061 = vmatprep.subr.bf16.mxu1 %v5613_v7  ;;  %v5617_v11 = vld [vmem:[%s7805_s1 + $0xd0] sm:$0xff]   ;;  %v5618_v12 = vld [vmem:[%s7805_s1 + $0x58] sm:$0xff]  }
   0x7   :  { %31 = vst [vmem:[#allocation3 + $0x60] sm:$0xff] %v5788_v2  ;;  %32 = vst [vmem:[#allocation3 + $0x68] sm:$0xff] %v5788_v2  ;;  %4998 = vmatpush3.bf16.msra.mxu0 %v5612_v6  ;;  %v5619_v13 = vld [vmem:[%s7805_s1 + $0x90] sm:$0xff]   ;;  %v5620_v14 = vld [vmem:[%s7805_s1 + $0x18] sm:$0xff]  }
   0x8   :  { %33 = vst [vmem:[#allocation3 + $0x70] sm:$0xff] %v5788_v2  ;;  %34 = vst [vmem:[#allocation3 + $0x78] sm:$0xff] %v5788_v2  ;;  %4999 = vmatprep.subr.bf16.mxu0 %v5614_v8  ;;  %v5621_v15 = vld [vmem:[%s7805_s1 + $0xd8] sm:$0xff]   ;;  %v5622_v16 = vld [vmem:[%s7805_s1 + $0x60] sm:$0xff]  }
   0x9   :  { %35 = vst [vmem:[#allocation3 + $0x80] sm:$0xff] %v5788_v2  ;;  %36 = vst [vmem:[#allocation3 + $0x88] sm:$0xff] %v5788_v2  ;;  %5062 = vmatpush3.bf16.msra.mxu1 %v5615_v9  ;;  %v5623_v17 = vld [vmem:[%s7805_s1 + $0x98] sm:$0xff]   ;;  %v5624_v18 = vld [vmem:[%s7805_s1 + $0x20] sm:$0xff]  }
   0xa   :  { %37 = vst [vmem:[#allocation3 + $0x90] sm:$0xff] %v5788_v2  ;;  %38 = vst [vmem:[#allocation3 + $0x98] sm:$0xff] %v5788_v2  ;;  %5063 = vmatprep.subr.bf16.mxu1 %v5617_v11  ;;  %v5625_v19 = vld [vmem:[%s7805_s1 + $0xe0] sm:$0xff]   ;;  %v5626_v20 = vld [vmem:[%s7805_s1 + $0x68] sm:$0xff]  }
   0xb   :  { %39 = vst [vmem:[#allocation3 + $0xa0] sm:$0xff] %v5788_v2  ;;  %40 = vst [vmem:[#allocation3 + $0xa8] sm:$0xff] %v5788_v2  ;;  %5000 = vmatpush3.bf16.msra.mxu0 %v5616_v10  ;;  %v5627_v21 = vld [vmem:[%s7805_s1 + $0xa0] sm:$0xff]   ;;  %v5628_v22 = vld [vmem:[%s7805_s1 + $0x28] sm:$0xff]  }
   0xc   :  { %41 = vst [vmem:[#allocation3 + $0xb0] sm:$0xff] %v5788_v2  ;;  %42 = vst [vmem:[#allocation3 + $0xb8] sm:$0xff] %v5788_v2  ;;  %5001 = vmatprep.subr.bf16.mxu0 %v5618_v12  ;;  %v5629_v23 = vld [vmem:[%s7805_s1 + $0xe8] sm:$0xff]   ;;  %v5630_v24 = vld [vmem:[%s7805_s1 + $0x70] sm:$0xff]  }
   0xd   :  { %43 = vst [vmem:[#allocation3 + $0xc0] sm:$0xff] %v5788_v2  ;;  %44 = vst [vmem:[#allocation3 + $0xc8] sm:$0xff] %v5788_v2  ;;  %5064 = vmatpush3.bf16.msra.mxu1 %v5619_v13  ;;  %v5631_v25 = vld [vmem:[%s7805_s1 + $0xa8] sm:$0xff]   ;;  %v5632_v26 = vld [vmem:[%s7805_s1 + $0x30] sm:$0xff]  }
   0xe   :  { %45 = vst [vmem:[#allocation3 + $0xd0] sm:$0xff] %v5788_v2  ;;  %46 = vst [vmem:[#allocation3 + $0xd8] sm:$0xff] %v5788_v2  ;;  %5065 = vmatprep.subr.bf16.mxu1 %v5621_v15  ;;  %v5633_v27 = vld [vmem:[%s7805_s1 + $0xf0] sm:$0xff]   ;;  %v5634_v28 = vld [vmem:[%s7805_s1 + $0x78] sm:$0xff]  }
   0xf   :  { %47 = vst [vmem:[#allocation3 + $0xe0] sm:$0xff] %v5788_v2  ;;  %48 = vst [vmem:[#allocation3 + $0xe8] sm:$0xff] %v5788_v2  ;;  %5002 = vmatpush3.bf16.msra.mxu0 %v5620_v14  ;;  %v5635_v29 = vld [vmem:[%s7805_s1 + $0xb0] sm:$0xff]   ;;  %v5636_v30 = vld [vmem:[%s7805_s1 + $0x38] sm:$0xff]  }
  0x10   :  { %49 = vst [vmem:[#allocation3 + $0xf0] sm:$0xff] %v5788_v2  ;;  %50 = vst [vmem:[#allocation3 + $0xf8] sm:$0xff] %v5788_v2  ;;  %5003 = vmatprep.subr.bf16.mxu0 %v5622_v16  ;;  %v5637_v31 = vld [vmem:[%s7805_s1 + $0xf8] sm:$0xff]   ;;  %v97_v33 = vld [vmem:[#allocation2 + $0x8] sm:$0x1] }
  0x11   :  { %51 = vst [vmem:[#allocation3 + $0x100] sm:$0xff] %v5788_v2  ;;  %52 = vst [vmem:[#allocation3 + $0x108] sm:$0xff] %v5788_v2  ;;  %5066 = vmatpush3.bf16.msra.mxu1 %v5623_v17  ;;  %v100_v35 = vld [vmem:[#allocation2 + $0x10] sm:$0x1]  ;;  %v156_v36 = vld [vmem:[#allocation2 + $0x4] sm:$0x1] }
  0x12   :  { %53 = vst [vmem:[#allocation3 + $0x110] sm:$0xff] %v5788_v2  ;;  %54 = vst [vmem:[#allocation3 + $0x118] sm:$0xff] %v5788_v2  ;;  %5067 = vmatprep.subr.bf16.mxu1 %v5625_v19  ;;  %v159_v41 = vld [vmem:[#allocation2 + $0xc] sm:$0x1]  ;;  %v229_v42 = vld [vmem:[%s7804_s0] sm:$0xff] }
  0x13   :  { %55 = vst [vmem:[#allocation3 + $0x120] sm:$0xff] %v5788_v2  ;;  %56 = vst [vmem:[#allocation3 + $0x128] sm:$0xff] %v5788_v2  ;;  %5004 = vmatpush3.bf16.msra.mxu0 %v5624_v18  ;;  %v162_v45 = vld [vmem:[#allocation2 + $0x14] sm:$0x1]  ;;  %v230_v46 = vld [vmem:[%s7804_s0 + $0x8] sm:$0xff]  ;;  %v4963_v47 = vpack.c.bf16 %v229_v42, %v229_v42 }
  0x14   :  { %57 = vst [vmem:[#allocation3 + $0x130] sm:$0xff] %v5788_v2  ;;  %58 = vst [vmem:[#allocation3 + $0x138] sm:$0xff] %v5788_v2  ;;  %5005 = vmatprep.subr.bf16.mxu0 %v5626_v20  ;;  %v4964_v49 = vpack.c.bf16 %v230_v46, %v230_v46  ;;  %v5638_v50 = vld [vmem:[%s7805_s1 + $0xb8] sm:$0xff]   ;;  %v5639_v56 = vld [vmem:[%s7805_s1 + $0x140] sm:$0xff]  }
  0x15   :  { %59 = vst [vmem:[#allocation3 + $0x140] sm:$0xff] %v5788_v2  ;;  %60 = vst [vmem:[#allocation3 + $0x148] sm:$0xff] %v5788_v2  ;;  %5068 = vmatpush3.bf16.msra.mxu1 %v5627_v21  ;;  %v270_v51 = vshrl.u32 %v4963_v47, 16  ;;  %v273_v52 = vshll.u32 %v4963_v47, 16  ;;  %v103_v59 = vld [vmem:[#allocation2 + $0x18] sm:$0x1] }
  0x16   :  { %61 = vst [vmem:[#allocation3 + $0x150] sm:$0xff] %v5788_v2  ;;  %62 = vst [vmem:[#allocation3 + $0x158] sm:$0xff] %v5788_v2  ;;  %5069 = vmatprep.subr.bf16.mxu1 %v5629_v23  ;;  %v278_v53 = vshrl.u32 %v4964_v49, 16  ;;  %v281_v54 = vshll.u32 %v4964_v49, 16  ;;  %v165_v60 = vld [vmem:[#allocation2 + $0x1c] sm:$0x1] }
  0x17   :  { %63 = vst [vmem:[#allocation3 + $0x160] sm:$0xff] %v5788_v2  ;;  %64 = vst [vmem:[#allocation3 + $0x168] sm:$0xff] %v5788_v2  ;;  %5006 = vmatpush3.bf16.msra.mxu0 %v5628_v22  ;;  %v272_v55 = vrot.slane %v270_v51, 7  ;;  %v231_v1 = vld [vmem:[%s7804_s0 + $0x10] sm:$0xff]  ;;  %v5672_v40 = vld [vmem:[%s7805_s1 + $0x208] sm:$0xff]  }
  0x18   :  { %65 = vst [vmem:[#allocation3 + $0x170] sm:$0xff] %v5788_v2  ;;  %66 = vst [vmem:[#allocation3 + $0x178] sm:$0xff] %v5788_v2  ;;  %5007 = vmatprep.subr.bf16.mxu0 %v5630_v24  ;;  %v280_v57 = vrot.slane %v278_v53, 7  ;;  %v4965_v6 = vpack.c.bf16 %v231_v1, %v231_v1 }
  0x19   :  { %67 = vst [vmem:[#allocation3 + $0x180] sm:$0xff] %v5788_v2  ;;  %68 = vst [vmem:[#allocation3 + $0x188] sm:$0xff] %v5788_v2  ;;  %5070 = vmatpush3.bf16.msra.mxu1 %v5631_v25  ;;  %v275_v61 = vor.u32 %v273_v52, %v272_v55  ;;  %v276_v62 = vrot.slane %v272_v55, 4 }
  0x1a   :  { %69 = vst [vmem:[#allocation3 + $0x190] sm:$0xff] %v5788_v2  ;;  %70 = vst [vmem:[#allocation3 + $0x198] sm:$0xff] %v5788_v2  ;;  %5071 = vmatprep.subr.bf16.mxu1 %v5633_v27  ;;  %v284_v3 = vrot.slane %v280_v57, 4  ;;  %v286_v23 = vshrl.u32 %v4965_v6, 16  ;;  %v289_v24 = vshll.u32 %v4965_v6, 16  ;;  %v232_v27 = vld [vmem:[%s7804_s0 + $0x18] sm:$0xff] }
  0x1b   :  { %71 = vst [vmem:[#allocation3 + $0x1a0] sm:$0xff] %v5788_v2  ;;  %72 = vst [vmem:[#allocation3 + $0x1a8] sm:$0xff] %v5788_v2  ;;  %5008 = vmatpush3.bf16.msra.mxu0 %v5632_v26  ;;  %v106_v26 = vld [vmem:[#allocation2 + $0x20] sm:$0x1] }
  0x1c   :  { %73 = vst [vmem:[#allocation3 + $0x1b0] sm:$0xff] %v5788_v2  ;;  %74 = vst [vmem:[#allocation3 + $0x1b8] sm:$0xff] %v5788_v2  ;;  %5009 = vmatprep.subr.bf16.mxu0 %v5634_v28  ;;  %v109_v28 = vld [vmem:[#allocation2 + $0x28] sm:$0x1] }
  0x1d   :  { %75 = vst [vmem:[#allocation3 + $0x1c0] sm:$0xff] %v5788_v2  ;;  %76 = vst [vmem:[#allocation3 + $0x1c8] sm:$0xff] %v5788_v2  ;;  %5072 = vmatpush3.bf16.msra.mxu1 %v5635_v29 }
  0x1e   :  { %77 = vst [vmem:[#allocation3 + $0x1d0] sm:$0xff] %v5788_v2  ;;  %78 = vst [vmem:[#allocation3 + $0x1d8] sm:$0xff] %v5788_v2  ;;  %5073 = vmatprep.subr.bf16.mxu1 %v5637_v31 }
  0x1f   :  { %79 = vst [vmem:[#allocation3 + $0x1e0] sm:$0xff] %v5788_v2  ;;  %80 = vst [vmem:[#allocation3 + $0x1e8] sm:$0xff] %v5788_v2  ;;  %5010 = vmatpush3.bf16.msra.mxu0 %v5636_v30  ;;  %v288_v30 = vrot.slane %v286_v23, 7 }
  0x20   :  { %81 = vst [vmem:[#allocation3 + $0x1f0] sm:$0xff] %v5788_v2  ;;  %82 = vst [vmem:[#allocation3 + $0x1f8] sm:$0xff] %v5788_v2  ;;  %5123 = vmatprep.subr.bf16.mxu0 %v5639_v56 }
  0x21   :  { %83 = vst [vmem:[#allocation3 + $0x200] sm:$0xff] %v5788_v2  ;;  %84 = vst [vmem:[#allocation3 + $0x208] sm:$0xff] %v5788_v2  ;;  %5074 = vmatpush3.bf16.msra.mxu1 %v5638_v50  ;;  %v292_v42 = vrot.slane %v288_v30, 4  ;;  %v291_v46 = vor.u32 %v289_v24, %v288_v30  ;;  %v234_v24 = vld [vmem:[%s7804_s0 + $0x28] sm:$0xff]  ;;  %v115_v30 = vld [vmem:[#allocation2 + $0x38] sm:$0x1] }
  0x22   :  { %85 = vst [vmem:[#allocation3 + $0x210] sm:$0xff] %v5788_v2  ;;  %86 = vst [vmem:[#allocation3 + $0x218] sm:$0xff] %v5788_v2 }
  0x23   :  { %87 = vst [vmem:[#allocation3 + $0x220] sm:$0xff] %v5788_v2  ;;  %88 = vst [vmem:[#allocation3 + $0x228] sm:$0xff] %v5788_v2 }
  0x24   :  { %89 = vst [vmem:[#allocation3 + $0x230] sm:$0xff] %v5788_v2  ;;  %90 = vst [vmem:[#allocation3 + $0x238] sm:$0xff] %v5788_v2 }
  0x25   :  { %vm5989_vm2 = vmand %vm91_vm0, %vm92_vm1 }
  0x26   :  { %v95_v37 = vsel %vm5989_vm2, 0, %v94_v32  ;;  %v98_v38 = vsel %vm5989_vm2, 0, %v97_v33  ;;  %v101_v39 = vsel %vm5989_vm2, 0, %v100_v35  ;;  %vm6001_vm4 = vmand %vm91_vm0, %vm154_vm3  ;;  %v104_v63 = vsel %vm5989_vm2, 0, %v103_v59  ;;  %v168_v33 = vld [vmem:[#allocation2 + $0x24] sm:$0x1] }
  0x27   :  { %96 = vst [vmem:[#allocation2] sm:$0x1] %v95_v37  ;;  %99 = vst [vmem:[#allocation2 + $0x8] sm:$0x1] %v98_v38  ;;  %v157_v43 = vsel %vm6001_vm4, 0, %v156_v36  ;;  %v160_v44 = vsel %vm6001_vm4, 0, %v159_v41  ;;  %v6066_v32 = vpack.c.bf16 %v232_v27, %v232_v27 }
  0x28   :  { %102 = vst [vmem:[#allocation2 + $0x10] sm:$0x1] %v101_v39  ;;  %158 = vst [vmem:[#allocation2 + $0x4] sm:$0x1] %v157_v43  ;;  %v163_v48 = vsel %vm6001_vm4, 0, %v162_v45  ;;  %v166_v0 = vsel %vm6001_vm4, 0, %v165_v60 }
  0x29   :  { %161 = vst [vmem:[#allocation2 + $0xc] sm:$0x1] %v160_v44  ;;  %217 = vst.msk [vmem:[#allocation2] sm:$0xf] %vm216_vm5, %v5788_v2  ;;  %v107_v31 = vsel %vm5989_vm2, 0, %v106_v26  ;;  %v110_v37 = vsel %vm5989_vm2, 0, %v109_v28 }
  0x2a   :  { %164 = vst [vmem:[#allocation2 + $0x14] sm:$0x1] %v163_v48  ;;  %219 = vst.msk [vmem:[#allocation2 + $0x4] sm:$0x1] %vm91_vm0, %v5788_v2  ;;  %v283_v2 = vor.u32 %v281_v54, %v280_v57  ;;  %v171_v35 = vld [vmem:[#allocation2 + $0x2c] sm:$0x1] }
  0x2b   :  { %vm6029_vm8 = vmand %vm216_vm5, %vm154_vm3  ;;  %105 = vst [vmem:[#allocation2 + $0x18] sm:$0x1] %v104_v63  ;;  %v169_v38 = vsel %vm6001_vm4, 0, %v168_v33  ;;  %v294_v43 = vshrl.u32 %v6066_v32, 16  ;;  %v233_v44 = vld [vmem:[%s7804_s0 + $0x20] sm:$0xff]  ;;  %v297_v49 = vshll.u32 %v6066_v32, 16 }
  0x2c   :  { %167 = vst [vmem:[#allocation2 + $0x1c] sm:$0x1] %v166_v0  ;;  %vm6055_vm11 = vmor %vm762_vm9, %vm763_vm10  ;;  %v172_v50 = vsel %vm6001_vm4, 0, %v171_v35  ;;  %v6089_v51 = vpack.c.bf16 %v233_v44, %v233_v44 }
  0x2d   :  { %vm6070_vm13 = vmor %vm619_vm6, %vm620_vm7  ;;  %108 = vst [vmem:[#allocation2 + $0x20] sm:$0x1] %v107_v31  ;;  %v235_v31 = vld [vmem:[%s7804_s0 + $0x30] sm:$0xff] }
  0x2e   :  { %v352_v4 = vld [vmem:[#allocation2 + $0x8] sm:$0xf]  ;;  %111 = vst [vmem:[#allocation2 + $0x28] sm:$0x1] %v110_v37  ;;  %170 = vst [vmem:[#allocation2 + $0x24] sm:$0x1] %v169_v38 }
  0x2f   :  { %v358_v5 = vld [vmem:[#allocation2 + $0x10] sm:$0xf]  ;;  %v353_v7 = vsel %vm6029_vm8, %v275_v61, %v352_v4  ;;  %173 = vst [vmem:[#allocation2 + $0x2c] sm:$0x1] %v172_v50  ;;  %v305_v28 = vshll.u32 %v6089_v51, 16  ;;  %v4968_v50 = vpack.c.bf16 %v234_v24, %v234_v24 }
  0x30   :  { %v355_v8 = vld [vmem:[#allocation2 + $0xc] sm:$0x1]  ;;  %v6042_v9 = vld [vmem:[#allocation2] sm:$0xf]  ;;  %354 = vst [vmem:[#allocation2 + $0x8] sm:$0xf] %v353_v7  ;;  %v359_v11 = vsel %vm6029_vm8, %v283_v2, %v358_v5 }
  0x31   :  { %v356_v10 = vsel %vm5989_vm2, %v276_v62, %v355_v8  ;;  %v361_v12 = vld [vmem:[#allocation2 + $0x14] sm:$0x1]  ;;  %v571_v13 = vld [vmem:[#allocation2 + $0x4] sm:$0x1]  ;;  %v623_v14 = vshrl.u32 %v6042_v9, 16  ;;  %v626_v15 = vshll.u32 %v6042_v9, 16 }
  0x32   :  { %357 = vst [vmem:[#allocation2 + $0xc] sm:$0x1] %v356_v10  ;;  %360 = vst [vmem:[#allocation2 + $0x10] sm:$0xf] %v359_v11  ;;  %v362_v16 = vsel %vm5989_vm2, %v284_v3, %v361_v12  ;;  %v632_v17 = vshll.u32 %v571_v13, 16  ;;  %v4661_v18 = vrot.slane %v6042_v9, 9 }
  0x33   :  { %v767_v19 = vrot.slane %v571_v13, 5  ;;  %363 = vst [vmem:[#allocation2 + $0x14] sm:$0x1] %v362_v16  ;;  %v625_v20 = vrot.slane %v623_v14, 4  ;;  %v628_v21 = vrot.slane %v626_v15, 5  ;;  %v296_v14 = vrot.slane %v294_v43, 7 }
  0x34   :  { %v6059_v25 = vrot.slane %v632_v17, 5  ;;  %v364_v47 = vld [vmem:[#allocation2 + $0x18] sm:$0xf]  ;;  %v367_v48 = vld [vmem:[#allocation2 + $0x1c] sm:$0x1] }
  0x35   :  { %v629_v29 = vor.u32 %v628_v21, %v625_v20  ;;  %v768_v41 = vsel %vm6055_vm11, %v4661_v18, %v767_v19  ;;  %v365_v10 = vsel %vm6029_vm8, %v291_v46, %v364_v47  ;;  %v368_v11 = vsel %vm5989_vm2, %v292_v42, %v367_v48  ;;  %v370_v15 = vld [vmem:[#allocation2 + $0x20] sm:$0xf]  ;;  %v112_v17 = vld [vmem:[#allocation2 + $0x30] sm:$0x1]  ;;  %v373_v23 = vld [vmem:[#allocation2 + $0x24] sm:$0x1] }
  0x36   :  { %366 = vst [vmem:[#allocation2 + $0x18] sm:$0xf] %v365_v10  ;;  %369 = vst [vmem:[#allocation2 + $0x1c] sm:$0x1] %v368_v11  ;;  %v302_v21 = vshrl.u32 %v6089_v51, 16  ;;  %v299_v26 = vor.u32 %v297_v49, %v296_v14  ;;  %v300_v27 = vrot.slane %v296_v14, 4 }
  0x37   :  { %v6078_v39 = vrot.slane %v629_v29, 4  ;;  %v572_v45 = vld [vmem:[#allocation2 + $0x8] sm:$0xf]  ;;  %v113_v37 = vsel %vm5989_vm2, 0, %v112_v17  ;;  %v174_v38 = vld [vmem:[#allocation2 + $0x34] sm:$0x1] }
  0x38   :  { %v637_v55 = vshrl.u32 %v572_v45, 16  ;;  %v640_v56 = vshll.u32 %v572_v45, 16  ;;  %v4653_v57 = vcombine.low %v6042_v9, %v572_v45  ;;  %v4662_v3 = vrot.slane %v572_v45, 9  ;;  %v376_v29 = vld [vmem:[#allocation2 + $0x28] sm:$0xf]  ;;  %v5640_v14 = vld [vmem:[%s7805_s1 + $0x100] sm:$0xff]  }
  0x39   :  { %v573_v52 = vld [vmem:[#allocation2 + $0xc] sm:$0x1]  ;;  %v6091_v53 = vld [vmem:[#allocation2 + $0x10] sm:$0xf]  ;;  %v635_v54 = vsel %vm6070_vm13, %v6078_v39, %v6059_v25  ;;  %v304_v35 = vrot.slane %v302_v21, 7  ;;  %v371_v43 = vsel %vm6029_vm8, %v299_v26, %v370_v15  ;;  %v374_v44 = vsel %vm5989_vm2, %v300_v27, %v373_v23 }
  0x3a   :  { %v575_v59 = vld [vmem:[#allocation2 + $0x14] sm:$0x1]  ;;  %v646_v60 = vshll.u32 %v573_v52, 16  ;;  %v651_v61 = vshrl.u32 %v6091_v53, 16  ;;  %v654_v62 = vshll.u32 %v6091_v53, 16  ;;  %v4673_v63 = vcombine.low %v572_v45, %v6091_v53  ;;  %615 = vst.msk [vmem:[#allocation3] sm:$0xff] %vm614_vm12, %v4653_v57 }
  0x3b   :  { %v639_v0 = vrot.slane %v637_v55, 4  ;;  %v642_v1 = vrot.slane %v640_v56, 5  ;;  %v660_v2 = vshll.u32 %v575_v59, 16  ;;  %v771_v7 = vrot.slane %v573_v52, 5  ;;  %v177_v39 = vld [vmem:[#allocation2 + $0x3c] sm:$0x1] }
  0x3c   :  { %v648_v4 = vrot.slane %v646_v60, 5  ;;  %v653_v5 = vrot.slane %v651_v61, 4  ;;  %v656_v6 = vrot.slane %v654_v62, 5  ;;  %827 = vst.msk [vmem:[#allocation3 + $0x18] sm:$0xff] %vm614_vm12, %v4673_v63  ;;  %v4663_v16 = vrot.slane %v6091_v53, 9 }
  0x3d   :  { %v643_v8 = vor.u32 %v642_v1, %v639_v0  ;;  %v662_v9 = vrot.slane %v660_v2, 5  ;;  %v6109_v13 = vsel %vm6055_vm11, %v4662_v3, %v771_v7  ;;  %v775_v20 = vrot.slane %v575_v59, 5  ;;  %v379_v45 = vld [vmem:[#allocation2 + $0x2c] sm:$0x1]  ;;  %114 = vst [vmem:[#allocation2 + $0x30] sm:$0x1] %v113_v37 }
  0x3e   :  { %v657_v12 = vor.u32 %v656_v6, %v653_v5  ;;  %v4669_v19 = vcombine.low %v768_v41, %v6109_v13  ;;  %372 = vst [vmem:[#allocation2 + $0x20] sm:$0xf] %v371_v43  ;;  %v307_v48 = vor.u32 %v305_v28, %v304_v35  ;;  %v308_v49 = vrot.slane %v304_v35, 4  ;;  %375 = vst [vmem:[#allocation2 + $0x24] sm:$0x1] %v374_v44 }
  0x3f   :  { %v644_v18 = vrot.slane %v643_v8, 4  ;;  %v6126_v33 = vsel %vm6055_vm11, %v4663_v16, %v775_v20  ;;  %v116_v51 = vsel %vm5989_vm2, 0, %v115_v30  ;;  %v175_v52 = vsel %vm6001_vm4, 0, %v174_v38  ;;  %v576_v56 = vld [vmem:[#allocation2 + $0x18] sm:$0xf] }
  0x40   :  { %v658_v25 = vrot.slane %v657_v12, 4  ;;  %813 = vst.msk [vmem:[#allocation3 + $0x10] sm:$0xff] %vm614_vm12, %v4669_v19  ;;  %v6146_v55 = vpack.c.bf16 %v235_v31, %v235_v31  ;;  %v577_v57 = vld [vmem:[#allocation2 + $0x1c] sm:$0x1]  ;;  %v377_v59 = vsel %vm6029_vm8, %v307_v48, %v376_v29  ;;  %v380_v60 = vsel %vm5989_vm2, %v308_v49, %v379_v45  ;;  %117 = vst [vmem:[#allocation2 + $0x38] sm:$0x1] %v116_v51 }
  0x41   :  { %v649_v32 = vsel %vm6070_vm13, %v644_v18, %v648_v4  ;;  %v310_v61 = vshrl.u32 %v4968_v50, 16  ;;  %v313_v62 = vshll.u32 %v4968_v50, 16  ;;  %176 = vst [vmem:[#allocation2 + $0x34] sm:$0x1] %v175_v52  ;;  %v665_v63 = vshrl.u32 %v576_v56, 16  ;;  %v236_v8 = vld [vmem:[%s7804_s0 + $0x38] sm:$0xff] }
  0x42   :  { %v6132_v41 = vsel %vm6070_vm13, %v658_v25, %v662_v9  ;;  %v4657_v42 = vcombine.low %v635_v54, %v649_v32  ;;  %v178_v54 = vsel %vm6001_vm4, 0, %v177_v39  ;;  %v668_v0 = vshll.u32 %v576_v56, 16  ;;  %378 = vst [vmem:[#allocation2 + $0x28] sm:$0xf] %v377_v59  ;;  %381 = vst [vmem:[#allocation2 + $0x2c] sm:$0x1] %v380_v60 }
  0x43   :  { %v4677_v46 = vcombine.low %v649_v32, %v6132_v41  ;;  %v1260_v47 = vld [vmem:[#allocation3 + $0x18] sm:$0xff]  ;;  %179 = vst [vmem:[#allocation2 + $0x3c] sm:$0x1] %v178_v54  ;;  %v674_v1 = vshll.u32 %v577_v57, 16  ;;  %v4654_v2 = vcombine.low %v6091_v53, %v576_v56  ;;  %v118_v3 = vld [vmem:[#allocation2 + $0x40] sm:$0x1]  ;;  %v6174_v27 = vpack.c.bf16 %v236_v8, %v236_v8 }
  0x44   :  { %750 = vst.msk [vmem:[#allocation3 + $0x8] sm:$0xff] %vm614_vm12, %v4657_v42  ;;  %2039 = vmatprep.mubr.bf16.mxu1 %v1260_v47  ;;  %v4664_v4 = vrot.slane %v576_v56, 9  ;;  %v779_v5 = vrot.slane %v577_v57, 5  ;;  %v312_v6 = vrot.slane %v310_v61, 7  ;;  %v318_v7 = vshrl.u32 %v6146_v55, 16  ;;  %v1257_v20 = vld [vmem:[#allocation3] sm:$0xff] }
  0x45   :  { %854 = vst.msk [vmem:[#allocation3 + $0x20] sm:$0xff] %vm614_vm12, %v4677_v46  ;;  %v667_v10 = vrot.slane %v665_v63, 4  ;;  %v670_v11 = vrot.slane %v668_v0, 5  ;;  %v676_v12 = vrot.slane %v674_v1, 5  ;;  %616 = vst.msk [vmem:[#allocation3 + $0x48] sm:$0xff] %vm614_vm12, %v4654_v2  ;;  %v321_v53 = vshll.u32 %v6146_v55, 16 }
  0x46   :  { %880 = vst.msk [vmem:[#allocation3 + $0x30] sm:$0xff] %vm614_vm12, %v4654_v2  ;;  %v6166_v15 = vsel %vm6055_vm11, %v4664_v4, %v779_v5  ;;  %v315_v16 = vor.u32 %v313_v62, %v312_v6  ;;  %v382_v17 = vld [vmem:[#allocation2 + $0x30] sm:$0xf]  ;;  %v316_v18 = vrot.slane %v312_v6, 4  ;;  %v6168_v19 = vrot.slane %v318_v7, 7  ;;  %v5641_v29 = vld [vmem:[%s7805_s1 + $0x148] sm:$0xff]  }
  0x47   :  { %v1259_v9 = vld [vmem:[#allocation3 + $0x10] sm:$0xff]  ;;  %v671_v21 = vor.u32 %v670_v11, %v667_v10  ;;  %v578_v23 = vld [vmem:[#allocation2 + $0x20] sm:$0xf]  ;;  %v4670_v24 = vcombine.low %v6126_v33, %v6166_v15  ;;  %v579_v25 = vld [vmem:[#allocation2 + $0x24] sm:$0x1]  ;;  %v119_v26 = vsel %vm5989_vm2, 0, %v118_v3 }
  0x48   :  { %2040 = vmatmul.mubr.bf16.vlgmr.msra.gmra.mrb[0].mxu1 %v1259_v9  ;;  %v4674_v30 = vcombine.low %v576_v56, %v578_v23  ;;  %v679_v31 = vshrl.u32 %v578_v23, 16  ;;  %v682_v32 = vshll.u32 %v578_v23, 16  ;;  %v688_v35 = vshll.u32 %v579_v25, 16  ;;  %120 = vst [vmem:[#allocation2 + $0x40] sm:$0x1] %v119_v26  ;;  %v5642_v51 = vld [vmem:[%s7805_s1 + $0x108] sm:$0xff]  }
  0x49   :  { %v672_v37 = vrot.slane %v671_v21, 4  ;;  %814 = vst.msk [vmem:[#allocation3 + $0x58] sm:$0xff] %vm614_vm12, %v4670_v24  ;;  %913 = vst.msk [vmem:[#allocation3 + $0x40] sm:$0xff] %vm614_vm12, %v4670_v24  ;;  %v383_v38 = vsel %vm6029_vm8, %v315_v16, %v382_v17  ;;  %v4665_v39 = vrot.slane %v578_v23, 9  ;;  %v783_v42 = vrot.slane %v579_v25, 5  ;;  %v5643_v61 = vld [vmem:[%s7805_s1 + $0x150] sm:$0xff]  }
  0x4a   :  { %v385_v43 = vld [vmem:[#allocation2 + $0x34] sm:$0x1]  ;;  %828 = vst.msk [vmem:[#allocation3 + $0x60] sm:$0xff] %vm614_vm12, %v4674_v30  ;;  %v6184_v44 = vld [vmem:[#allocation2 + $0x28] sm:$0xf]  ;;  %v681_v46 = vrot.slane %v679_v31, 4  ;;  %v323_v48 = vor.u32 %v321_v53, %v6168_v19 }
  0x4b   :  { %v1258_v28 = vld [vmem:[#allocation3 + $0x8] sm:$0xff]  ;;  %v684_v47 = vrot.slane %v682_v32, 5  ;;  %384 = vst [vmem:[#allocation2 + $0x30] sm:$0xf] %v383_v38  ;;  %v386_v49 = vsel %vm5989_vm2, %v316_v18, %v385_v43  ;;  %v6191_v50 = vsel %vm6070_vm13, %v672_v37, %v676_v12  ;;  %v690_v52 = vrot.slane %v688_v35, 5  ;;  %v5644_v4 = vld [vmem:[%s7805_s1 + $0x110] sm:$0xff]  }
  0x4c   :  { %1942 = vmatprep.mubr.bf16.mxu0 %v1258_v28  ;;  %v581_v45 = vld [vmem:[#allocation2 + $0x2c] sm:$0x1]  ;;  %v693_v54 = vshrl.u32 %v6184_v44, 16  ;;  %v696_v55 = vshll.u32 %v6184_v44, 16  ;;  %387 = vst [vmem:[#allocation2 + $0x34] sm:$0x1] %v386_v49  ;;  %v4658_v57 = vcombine.low %v6132_v41, %v6191_v50  ;;  %v4655_v62 = vcombine.low %v578_v23, %v6184_v44 }
  0x4d   :  { %1943 = vmatmul.mubr.bf16.vlgmr.msra.gmra.mrb[0].mxu0 %v1257_v20  ;;  %v124_v56 = vld [vmem:[#allocation2 + $0x50] sm:$0x1]  ;;  %v685_v59 = vor.u32 %v684_v47, %v681_v46  ;;  %v702_v60 = vshll.u32 %v581_v45, 16  ;;  %v388_v63 = vld [vmem:[#allocation2 + $0x38] sm:$0xf]  ;;  %v6209_v41 = vsel %vm6055_vm11, %v4665_v39, %v783_v42  ;;  %v4666_v5 = vrot.slane %v6184_v44, 9 }
  0x4e   :  { %5124 = vmatpush3.bf16.msra.mxu0 %v5640_v14  ;;  %v391_v0 = vld [vmem:[#allocation2 + $0x3c] sm:$0x1]  ;;  %v127_v1 = vld [vmem:[#allocation2 + $0x58] sm:$0x1]  ;;  %v695_v2 = vrot.slane %v693_v54, 4  ;;  %v698_v3 = vrot.slane %v696_v55, 5  ;;  %v389_v53 = vsel %vm6029_vm8, %v323_v48, %v388_v63 }
  0x4f   :  { %5125 = vmatprep.subr.bf16.mxu0 %v5641_v29  ;;  %v5649_v6 = vld [vmem:[%s7805_s1 + $0x1c0] sm:$0xff]   ;;  %751 = vst.msk [vmem:[#allocation3 + $0x50] sm:$0xff] %vm614_vm12, %v4658_v57  ;;  %901 = vst.msk [vmem:[#allocation3 + $0x38] sm:$0xff] %vm614_vm12, %v4658_v57  ;;  %v686_v7 = vrot.slane %v685_v59, 4  ;;  %v704_v8 = vrot.slane %v702_v60, 5  ;;  %v787_v9 = vrot.slane %v581_v45, 5 }
  0x50   :  { %617 = vst.msk [vmem:[#allocation3 + $0x90] sm:$0xff] %vm614_vm12, %v4655_v62  ;;  %881 = vst.msk [vmem:[#allocation3 + $0x78] sm:$0xff] %vm614_vm12, %v4655_v62  ;;  %v324_v10 = vrot.slane %v6168_v19, 4  ;;  %v5645_v11 = vld [vmem:[%s7805_s1 + $0x158] sm:$0xff]   ;;  %v699_v12 = vor.u32 %v698_v3, %v695_v2  ;;  %v326_v14 = vshrl.u32 %v6174_v27, 16  ;;  %v329_v16 = vshll.u32 %v6174_v27, 16  ;;  %5187 = vmatprep.subr.bf16.mxu1 %v5649_v6 }
  0x51   :  { %v186_v17 = vld [vmem:[#allocation2 + $0x54] sm:$0x1]  ;;  %v1268_v18 = vld [vmem:[#allocation3 + $0x58] sm:$0xff]  ;;  %v6229_v20 = vsel %vm6070_vm13, %v686_v7, %v690_v52  ;;  %v6233_v19 = vsel %vm6055_vm11, %v4666_v5, %v787_v9  ;;  %390 = vst [vmem:[#allocation2 + $0x38] sm:$0xf] %v389_v53  ;;  %v125_v24 = vsel %vm5989_vm2, 0, %v124_v56 }
  0x52   :  { %5126 = vmatpush3.bf16.msra.mxu0 %v5642_v51  ;;  %v392_v21 = vsel %vm5989_vm2, %v324_v10, %v391_v0  ;;  %v394_v23 = vld [vmem:[#allocation2 + $0x40] sm:$0xf]  ;;  %v189_v25 = vld [vmem:[#allocation2 + $0x5c] sm:$0x1]  ;;  %v700_v27 = vrot.slane %v699_v12, 4  ;;  %v4671_v29 = vcombine.low %v6209_v41, %v6233_v19  ;;  %v6243_v30 = vrot.slane %v326_v14, 7 }
  0x53   :  { %5127 = vmatprep.subr.bf16.mxu0 %v5643_v61  ;;  %v1269_v26 = vld [vmem:[#allocation3 + $0x60] sm:$0xff]  ;;  %v6239_v28 = vld [vmem:[#allocation2 + $0x30] sm:$0xf]  ;;  %393 = vst [vmem:[#allocation2 + $0x3c] sm:$0x1] %v392_v21  ;;  %v128_v31 = vsel %vm5989_vm2, 0, %v127_v1  ;;  %v4682_v10 = vcombine.low %v6109_v13, %v6126_v33  ;;  %v4678_v12 = vcombine.low %v6191_v50, %v6229_v20 }
  0x54   :  { %126 = vst [vmem:[#allocation2 + $0x50] sm:$0x1] %v125_v24  ;;  %v4637_v32 = vld [vmem:[%s7804_s0 + $0x40] sm:$0xff]  ;;  %v4638_v37 = vld [vmem:[%s7804_s0 + $0x48] sm:$0xff]  ;;  %2047 = vmatprep.mubr.bf16.mxu1 %v1269_v26  ;;  %v4675_v39 = vcombine.low %v6184_v44, %v6239_v28  ;;  %v583_v42 = vld [vmem:[#allocation2 + $0x34] sm:$0x1]  ;;  %v6267_v44 = vsel %vm6070_vm13, %v700_v27, %v704_v8  ;;  %v331_v52 = vor.u32 %v329_v16, %v6243_v30 }
  0x55   :  { %v130_v35 = vld [vmem:[#allocation2 + $0x60] sm:$0x1]  ;;  %v1266_v38 = vld [vmem:[#allocation3 + $0x48] sm:$0xff]  ;;  %v707_v43 = vshrl.u32 %v6239_v28, 16  ;;  %v710_v45 = vshll.u32 %v6239_v28, 16  ;;  %v5646_v46 = vld [vmem:[%s7805_s1 + $0x118] sm:$0xff]   ;;  %2048 = vmatmul.mubr.bf16.gmra.mrb[4].mxu1 %v1268_v18  ;;  %v4659_v55 = vcombine.low %v6229_v20, %v6267_v44  ;;  %v6296_v6 = vpack.c.bf16 %v4638_v37, %v4638_v37 }
  0x56   :  { %v4667_v47 = vrot.slane %v6239_v28, 9  ;;  %129 = vst [vmem:[#allocation2 + $0x58] sm:$0x1] %v128_v31  ;;  %v5759_v48 = vld [vmem:[#allocation3 + $0x28] sm:$0xff]  ;;  %v5650_v49 = vld [vmem:[%s7805_s1 + $0x180] sm:$0xff]   ;;  %5128 = vmatpush3.bf16.msra.mxu0 %v5644_v4  ;;  %815 = vst.msk [vmem:[#allocation3 + $0xa0] sm:$0xff] %vm614_vm12, %v4671_v29  ;;  %v395_v63 = vsel %vm6029_vm8, %v331_v52, %v394_v23  ;;  %v4971_v4 = vpack.c.bf16 %v4637_v32, %v4637_v32 }
  0x57   :  { %224 = vst.msk [vmem:[#allocation2 + $0x50] sm:$0xf] %vm216_vm5, %v5759_v48  ;;  %v716_v51 = vshll.u32 %v583_v42, 16  ;;  %v791_v54 = vrot.slane %v583_v42, 5  ;;  %v709_v56 = vrot.slane %v707_v43, 4  ;;  %v712_v57 = vrot.slane %v710_v45, 5  ;;  %5129 = vmatprep.subr.bf16.mxu0 %v5645_v11  ;;  %5188 = vmatpush3.bf16.msra.mxu1 %v5650_v49 }
  0x58   :  { %914 = vst.msk [vmem:[#allocation3 + $0x88] sm:$0xff] %vm614_vm12, %v4671_v29  ;;  %829 = vst.msk [vmem:[#allocation3 + $0xa8] sm:$0xff] %vm614_vm12, %v4675_v39  ;;  %v187_v59 = vsel %vm6001_vm4, 0, %v186_v17  ;;  %v5651_v60 = vld [vmem:[%s7805_s1 + $0x1c8] sm:$0xff]   ;;  %v1267_v61 = vld [vmem:[#allocation3 + $0x50] sm:$0xff]  ;;  %v190_v1 = vsel %vm6001_vm4, 0, %v189_v25  ;;  %v4683_v11 = vcombine.low %v6166_v15, %v6209_v41 }
  0x59   :  { %v718_v62 = vrot.slane %v716_v51, 5  ;;  %v6284_v0 = vsel %vm6055_vm11, %v4667_v47, %v791_v54  ;;  %188 = vst [vmem:[#allocation2 + $0x54] sm:$0x1] %v187_v59  ;;  %v5647_v2 = vld [vmem:[%s7805_s1 + $0x160] sm:$0xff]   ;;  %1950 = vmatprep.mubr.bf16.mxu0 %v1267_v61  ;;  %752 = vst.msk [vmem:[#allocation3 + $0x98] sm:$0xff] %vm614_vm12, %v4659_v55  ;;  %v713_v3 = vor.u32 %v712_v57, %v709_v56  ;;  %v131_v5 = vsel %vm5989_vm2, 0, %v130_v35 }
  0x5a   :  { %902 = vst.msk [vmem:[#allocation3 + $0x80] sm:$0xff] %vm614_vm12, %v4659_v55  ;;  %396 = vst [vmem:[#allocation2 + $0x40] sm:$0xf] %v395_v63  ;;  %5189 = vmatprep.subr.bf16.mxu1 %v5651_v60  ;;  %v4639_v7 = vld [vmem:[%s7804_s0 + $0x50] sm:$0xff]  ;;  %1951 = vmatmul.mubr.bf16.gmra.mrb[4].mxu0 %v1266_v38  ;;  %v6301_v8 = vld [vmem:[#allocation2 + $0x38] sm:$0xf]  ;;  %v4684_v56 = vcombine.low %v6233_v19, %v6284_v0 }
  0x5b   :  { %191 = vst [vmem:[#allocation2 + $0x5c] sm:$0x1] %v190_v1  ;;  %225 = vst.msk [vmem:[#allocation2 + $0x54] sm:$0x1] %vm91_vm0, %v5759_v48  ;;  %v6303_v9 = vpack.c.bf16 %v4639_v7, %v4639_v7  ;;  %v585_v53 = vld [vmem:[#allocation2 + $0x3c] sm:$0x1]  ;;  %v4656_v18 = vcombine.low %v6239_v28, %v6301_v8  ;;  %5130 = vmatpush3.bf16.msra.mxu0 %v5646_v46 }
  0x5c   :  { %132 = vst [vmem:[#allocation2 + $0x60] sm:$0x1] %v131_v5  ;;  %v714_v14 = vrot.slane %v713_v3, 4  ;;  %v721_v16 = vshrl.u32 %v6301_v8, 16  ;;  %v724_v17 = vshll.u32 %v6301_v8, 16  ;;  %v5648_v13 = vld [vmem:[%s7805_s1 + $0x120] sm:$0xff]   ;;  %5131 = vmatprep.subr.bf16.mxu0 %v5647_v2 }
  0x5d   :  { %v730_v33 = vshll.u32 %v585_v53, 16  ;;  %v4668_v15 = vrot.slane %v6301_v8, 9  ;;  %v795_v41 = vrot.slane %v585_v53, 5  ;;  %v442_v21 = vshrl.u32 %v4971_v4, 16  ;;  %v5652_v50 = vld [vmem:[%s7805_s1 + $0x168] sm:$0xff]   ;;  %872 = vst.msk [vmem:[#allocation3 + $0x28] sm:$0xff] %vm614_vm12, %v4682_v10 }
  0x5e   :  { %873 = vst.msk [vmem:[#allocation3 + $0x70] sm:$0xff] %vm614_vm12, %v4683_v11  ;;  %855 = vst.msk [vmem:[#allocation3 + $0x68] sm:$0xff] %vm614_vm12, %v4678_v12  ;;  %v1275_v20 = vld [vmem:[#allocation3 + $0x90] sm:$0xff]  ;;  %v1277_v23 = vld [vmem:[#allocation3 + $0xa0] sm:$0xff]  ;;  %v719_v24 = vsel %vm6070_vm13, %v714_v14, %v718_v62  ;;  %v723_v25 = vrot.slane %v721_v16, 4  ;;  %v726_v26 = vrot.slane %v724_v17, 5 }
  0x5f   :  { %618 = vst.msk [vmem:[#allocation3 + $0xd8] sm:$0xff] %vm614_vm12, %v4656_v18  ;;  %882 = vst.msk [vmem:[#allocation3 + $0xc0] sm:$0xff] %vm614_vm12, %v4656_v18  ;;  %v445_v27 = vshll.u32 %v4971_v4, 16  ;;  %v6329_v28 = vld [vmem:[#allocation2 + $0x50] sm:$0xf]  ;;  %v1278_v29 = vld [vmem:[#allocation3 + $0xa8] sm:$0xff]  ;;  %v6333_v32 = vsel %vm6055_vm11, %v4668_v15, %v795_v41  ;;  %5132 = vmatpush3.bf16.msra.mxu0 %v5648_v13  ;;  %v4679_v57 = vcombine.low %v6267_v44, %v719_v24 }
  0x60   :  { %v732_v31 = vrot.slane %v730_v33, 5  ;;  %v444_v35 = vrot.slane %v442_v21, 7  ;;  %v522_v37 = vld [vmem:[#allocation2 + $0x58] sm:$0xf]  ;;  %v966_v38 = vshrl.u32 %v6329_v28, 16  ;;  %2055 = vmatprep.mubr.bf16.mxu1 %v1278_v29  ;;  %v727_v39 = vor.u32 %v726_v26, %v723_v25  ;;  %5133 = vmatprep.subr.bf16.mxu0 %v5652_v50  ;;  %v5653_v1 = vld [vmem:[%s7805_s1 + $0x188] sm:$0xff]  }
  0x61   :  { %v4672_v42 = vcombine.low %v6284_v0, %v6333_v32  ;;  %v969_v43 = vshll.u32 %v6329_v28, 16  ;;  %v450_v45 = vshrl.u32 %v6296_v6, 16  ;;  %v133_v46 = vld [vmem:[#allocation2 + $0x68] sm:$0x1]  ;;  %v1276_v47 = vld [vmem:[#allocation3 + $0x98] sm:$0xff]  ;;  %2056 = vmatmul.mubr.bf16.gmra.mrb[8].mxu1 %v1277_v23  ;;  %874 = vst.msk [vmem:[#allocation3 + $0xb8] sm:$0xff] %vm614_vm12, %v4684_v56 }
  0x62   :  { %v6340_v48 = vld [vmem:[#allocation2 + $0x40] sm:$0xf]  ;;  %v447_v49 = vor.u32 %v445_v27, %v444_v35  ;;  %v448_v51 = vrot.slane %v444_v35, 4  ;;  %v525_v52 = vld [vmem:[#allocation2 + $0x5c] sm:$0x1]  ;;  %1958 = vmatprep.mubr.bf16.mxu0 %v1276_v47  ;;  %v728_v59 = vrot.slane %v727_v39, 4  ;;  %5190 = vmatpush3.bf16.msra.mxu1 %v5653_v1 }
  0x63   :  { %v192_v54 = vld [vmem:[#allocation2 + $0x64] sm:$0x1]  ;;  %v195_v55 = vld [vmem:[#allocation2 + $0x6c] sm:$0x1]  ;;  %v4676_v60 = vcombine.low %v6301_v8, %v6340_v48  ;;  %816 = vst.msk [vmem:[#allocation3 + $0xe8] sm:$0xff] %vm614_vm12, %v4672_v42  ;;  %915 = vst.msk [vmem:[#allocation3 + $0xd0] sm:$0xff] %vm614_vm12, %v4672_v42  ;;  %1959 = vmatmul.mubr.bf16.gmra.mrb[8].mxu0 %v1275_v20 }
  0x64   :  { %v918_v61 = vld [vmem:[#allocation2 + $0x54] sm:$0x1]  ;;  %v968_v62 = vrot.slane %v966_v38, 4  ;;  %v971_v63 = vrot.slane %v969_v43, 5  ;;  %v523_v19 = vsel %vm6029_vm8, %v447_v49, %v522_v37  ;;  %v526_v44 = vsel %vm5989_vm2, %v448_v51, %v525_v52  ;;  %v528_v3 = vld [vmem:[#allocation2 + $0x60] sm:$0xf] }
  0x65   :  { %v975_v0 = vshll.u32 %v918_v61, 16  ;;  %v6356_v2 = vrot.slane %v450_v45, 7  ;;  %856 = vst.msk [vmem:[#allocation3 + $0xb0] sm:$0xff] %vm614_vm12, %v4679_v57  ;;  %v6362_v4 = vsel %vm6070_vm13, %v728_v59, %v732_v31  ;;  %830 = vst.msk [vmem:[#allocation3 + $0xf0] sm:$0xff] %vm614_vm12, %v4676_v60  ;;  %v453_v7 = vshll.u32 %v6296_v6, 16  ;;  %v5654_v17 = vld [vmem:[%s7805_s1 + $0x128] sm:$0xff]  }
  0x66   :  { %524 = vst [vmem:[#allocation2 + $0x58] sm:$0xf] %v523_v19  ;;  %527 = vst [vmem:[#allocation2 + $0x5c] sm:$0x1] %v526_v44  ;;  %v972_v5 = vor.u32 %v971_v63, %v968_v62  ;;  %v4660_v8 = vcombine.low %v719_v24, %v6362_v4  ;;  %v4698_v11 = vrot.slane %v6329_v28, 9  ;;  %v134_v12 = vsel %vm5989_vm2, 0, %v133_v46  ;;  %5134 = vmatpush3.bf16.msra.mxu0 %v5654_v17 }
  0x67   :  { %v6367_v10 = vrot.slane %v975_v0, 5  ;;  %v455_v53 = vor.u32 %v453_v7, %v6356_v2  ;;  %v1107_v14 = vrot.slane %v918_v61, 5  ;;  %135 = vst [vmem:[#allocation2 + $0x68] sm:$0x1] %v134_v12  ;;  %v193_v16 = vsel %vm6001_vm4, 0, %v192_v54  ;;  %v4640_v41 = vld [vmem:[%s7804_s0 + $0x58] sm:$0xff] }
  0x68   :  { %v196_v6 = vsel %vm6001_vm4, 0, %v195_v55  ;;  %v136_v18 = vld [vmem:[#allocation2 + $0x70] sm:$0x1]  ;;  %753 = vst.msk [vmem:[#allocation3 + $0xe0] sm:$0xff] %vm614_vm12, %v4660_v8  ;;  %903 = vst.msk [vmem:[#allocation3 + $0xc8] sm:$0xff] %vm614_vm12, %v4660_v8  ;;  %v6382_v13 = vrot.slane %v972_v5, 4  ;;  %v4974_v20 = vpack.c.bf16 %v4640_v41, %v4640_v41 }
  0x69   :  { %194 = vst [vmem:[#allocation2 + $0x64] sm:$0x1] %v193_v16  ;;  %197 = vst [vmem:[#allocation2 + $0x6c] sm:$0x1] %v196_v6  ;;  %v458_v33 = vshrl.u32 %v6303_v9, 16  ;;  %v461_v15 = vshll.u32 %v6303_v9, 16  ;;  %v529_v21 = vsel %vm6029_vm8, %v455_v53, %v528_v3  ;;  %v1108_v39 = vsel %vm6055_vm11, %v4698_v11, %v1107_v14 }
  0x6a   :  { %v137_v50 = vsel %vm5989_vm2, 0, %v136_v18  ;;  %v5655_v23 = vld [vmem:[%s7805_s1 + $0x1d0] sm:$0xff]   ;;  %v1286_v24 = vld [vmem:[#allocation3 + $0xe8] sm:$0xff]  ;;  %530 = vst [vmem:[#allocation2 + $0x60] sm:$0xf] %v529_v21  ;;  %v456_v9 = vrot.slane %v6356_v2, 4 }
  0x6b   :  { %v460_v25 = vrot.slane %v458_v33, 7  ;;  %138 = vst [vmem:[#allocation2 + $0x70] sm:$0x1] %v137_v50  ;;  %v5656_v26 = vld [vmem:[%s7805_s1 + $0x190] sm:$0xff]   ;;  %v466_v27 = vshrl.u32 %v4974_v20, 16  ;;  %v469_v29 = vshll.u32 %v4974_v20, 16  ;;  %5191 = vmatprep.subr.bf16.mxu1 %v5655_v23 }
  0x6c   :  { %v1284_v31 = vld [vmem:[#allocation3 + $0xd8] sm:$0xff]  ;;  %v1287_v35 = vld [vmem:[#allocation3 + $0xf0] sm:$0xff]  ;;  %5192 = vmatpush3.bf16.msra.mxu1 %v5656_v26  ;;  %v4641_v16 = vld [vmem:[%s7804_s0 + $0x60] sm:$0xff] }
  0x6d   :  { %v919_v37 = vld [vmem:[#allocation2 + $0x58] sm:$0xf]  ;;  %v920_v38 = vld [vmem:[#allocation2 + $0x5c] sm:$0x1]  ;;  %v463_v42 = vor.u32 %v461_v15, %v460_v25  ;;  %v464_v43 = vrot.slane %v460_v25, 4  ;;  %2063 = vmatprep.mubr.bf16.mxu1 %v1287_v35  ;;  %v6406_v57 = vrot.slane %v466_v27, 7  ;;  %v978_v15 = vsel %vm6070_vm13, %v6382_v13, %v6367_v10 }
  0x6e   :  { %v980_v45 = vshrl.u32 %v919_v37, 16  ;;  %v983_v46 = vshll.u32 %v919_v37, 16  ;;  %v989_v47 = vshll.u32 %v920_v38, 16  ;;  %v4690_v49 = vcombine.low %v6329_v28, %v919_v37  ;;  %v5657_v51 = vld [vmem:[%s7805_s1 + $0x1d8] sm:$0xff]   ;;  %2064 = vmatmul.mubr.bf16.gmra.mrb[12].mxu1 %v1286_v24  ;;  %v534_v56 = vld [vmem:[#allocation2 + $0x68] sm:$0xf] }
  0x6f   :  { %v139_v52 = vld [vmem:[#allocation2 + $0x78] sm:$0x1]  ;;  %v4699_v54 = vrot.slane %v919_v37, 9  ;;  %v1111_v55 = vrot.slane %v920_v38, 5  ;;  %v1285_v60 = vld [vmem:[#allocation3 + $0xe0] sm:$0xff]  ;;  %v535_v1 = vsel %vm6029_vm8, %v463_v42, %v534_v56  ;;  %5193 = vmatprep.subr.bf16.mxu1 %v5657_v51  ;;  %v471_v2 = vor.u32 %v469_v29, %v6406_v57  ;;  %v5658_v20 = vld [vmem:[%s7805_s1 + $0x170] sm:$0xff]  }
  0x70   :  { %v140_v59 = vsel %vm5989_vm2, 0, %v139_v52  ;;  %v982_v61 = vrot.slane %v980_v45, 4  ;;  %v985_v62 = vrot.slane %v983_v46, 5  ;;  %v991_v63 = vrot.slane %v989_v47, 5  ;;  %961 = vst.msk [vmem:[#allocation3 + $0x120] sm:$0xff] %vm614_vm12, %v4690_v49  ;;  %1966 = vmatprep.mubr.bf16.mxu0 %v1285_v60  ;;  %v5659_v10 = vld [vmem:[%s7805_s1 + $0x198] sm:$0xff]   ;;  %5135 = vmatprep.subr.bf16.mxu0 %v5658_v20 }
  0x71   :  { %v531_v28 = vld [vmem:[#allocation2 + $0x64] sm:$0x1]  ;;  %141 = vst [vmem:[#allocation2 + $0x78] sm:$0x1] %v140_v59  ;;  %v6415_v19 = vsel %vm6055_vm11, %v4699_v54, %v1111_v55  ;;  %536 = vst [vmem:[#allocation2 + $0x68] sm:$0xf] %v535_v1  ;;  %1967 = vmatmul.mubr.bf16.gmra.mrb[12].mxu0 %v1284_v31  ;;  %v4975_v50 = vpack.c.bf16 %v4641_v16, %v4641_v16  ;;  %5194 = vmatpush3.bf16.msra.mxu1 %v5659_v10 }
  0x72   :  { %v532_v44 = vsel %vm5989_vm2, %v456_v9, %v531_v28  ;;  %v537_v0 = vld [vmem:[#allocation2 + $0x6c] sm:$0x1]  ;;  %v198_v3 = vld [vmem:[#allocation2 + $0x74] sm:$0x1]  ;;  %v201_v5 = vld [vmem:[#allocation2 + $0x7c] sm:$0x1]  ;;  %v986_v7 = vor.u32 %v985_v62, %v982_v61  ;;  %v4706_v11 = vcombine.low %v1108_v39, %v6415_v19 }
  0x73   :  { %v6420_v8 = vld [vmem:[#allocation2 + $0x60] sm:$0xf]  ;;  %533 = vst [vmem:[#allocation2 + $0x64] sm:$0x1] %v532_v44  ;;  %v538_v12 = vsel %vm5989_vm2, %v464_v43, %v537_v0  ;;  %v540_v53 = vld [vmem:[#allocation2 + $0x70] sm:$0xf] }
  0x74   :  { %v199_v14 = vsel %vm6001_vm4, 0, %v198_v3  ;;  %v4710_v6 = vcombine.low %v919_v37, %v6420_v8  ;;  %539 = vst [vmem:[#allocation2 + $0x6c] sm:$0x1] %v538_v12  ;;  %v994_v17 = vshrl.u32 %v6420_v8, 16  ;;  %v997_v18 = vshll.u32 %v6420_v8, 16  ;;  %1153 = vst.msk [vmem:[#allocation3 + $0x130] sm:$0xff] %vm614_vm12, %v4706_v11 }
  0x75   :  { %v541_v33 = vsel %vm6029_vm8, %v471_v2, %v540_v53  ;;  %200 = vst [vmem:[#allocation2 + $0x74] sm:$0x1] %v199_v14  ;;  %v987_v41 = vrot.slane %v986_v7, 4  ;;  %v202_v21 = vsel %vm6001_vm4, 0, %v201_v5  ;;  %v474_v9 = vshrl.u32 %v4975_v50, 16  ;;  %v5660_v29 = vld [vmem:[%s7805_s1 + $0x130] sm:$0xff]  }
  0x76   :  { %542 = vst [vmem:[#allocation2 + $0x70] sm:$0xf] %v541_v33  ;;  %1167 = vst.msk [vmem:[#allocation3 + $0x138] sm:$0xff] %vm614_vm12, %v4710_v6  ;;  %v996_v23 = vrot.slane %v994_v17, 4  ;;  %v999_v24 = vrot.slane %v997_v18, 5  ;;  %v477_v25 = vshll.u32 %v4975_v50, 16  ;;  %5136 = vmatpush3.bf16.msra.mxu0 %v5660_v29 }
  0x77   :  { %203 = vst [vmem:[#allocation2 + $0x7c] sm:$0x1] %v202_v21  ;;  %v6451_v13 = vsel %vm6070_vm13, %v987_v41, %v991_v63  ;;  %v4700_v35 = vrot.slane %v6420_v8, 9  ;;  %v472_v37 = vrot.slane %v6406_v57, 4  ;;  %v476_v38 = vrot.slane %v474_v9, 7  ;;  %v4642_v39 = vld [vmem:[%s7804_s0 + $0x68] sm:$0xff] }
  0x78   :  { %v4694_v26 = vcombine.low %v978_v15, %v6451_v13  ;;  %v1000_v27 = vor.u32 %v999_v24, %v996_v23  ;;  %v923_v31 = vld [vmem:[#allocation2 + $0x68] sm:$0xf]  ;;  %v546_v49 = vld [vmem:[#allocation2 + $0x78] sm:$0xf]  ;;  %v5661_v51 = vld [vmem:[%s7805_s1 + $0x1e0] sm:$0xff]   ;;  %v6474_v44 = vpack.c.bf16 %v4642_v39, %v4642_v39 }
  0x79   :  { %v1008_v45 = vshrl.u32 %v923_v31, 16  ;;  %v1011_v46 = vshll.u32 %v923_v31, 16  ;;  %v4691_v47 = vcombine.low %v6420_v8, %v923_v31  ;;  %v4701_v56 = vrot.slane %v923_v31, 9  ;;  %v5662_v59 = vld [vmem:[%s7805_s1 + $0x1a0] sm:$0xff]   ;;  %5195 = vmatprep.subr.bf16.mxu1 %v5661_v51  ;;  %v5663_v11 = vld [vmem:[%s7805_s1 + $0x1e8] sm:$0xff]   ;;  %v4643_v21 = vld [vmem:[%s7804_s0 + $0x70] sm:$0xff] }
  0x7a   :  { %1093 = vst.msk [vmem:[#allocation3 + $0x128] sm:$0xff] %vm614_vm12, %v4694_v26  ;;  %v922_v42 = vld [vmem:[#allocation2 + $0x64] sm:$0x1]  ;;  %v1001_v43 = vrot.slane %v1000_v27, 4  ;;  %v479_v57 = vor.u32 %v477_v25, %v476_v38  ;;  %v142_v1 = vld [vmem:[#allocation2 + $0x80] sm:$0x1]  ;;  %5196 = vmatpush3.bf16.msra.mxu1 %v5662_v59  ;;  %v4977_v39 = vpack.c.bf16 %v4643_v21, %v4643_v21 }
  0x7b   :  { %v924_v52 = vld [vmem:[#allocation2 + $0x6c] sm:$0x1]  ;;  %v1003_v54 = vshll.u32 %v922_v42, 16  ;;  %v1115_v55 = vrot.slane %v922_v42, 5  ;;  %v1295_v60 = vld [vmem:[#allocation3 + $0x130] sm:$0xff]  ;;  %v1010_v61 = vrot.slane %v1008_v45, 4  ;;  %5197 = vmatprep.subr.bf16.mxu1 %v5663_v11 }
  0x7c   :  { %v1013_v62 = vrot.slane %v1011_v46, 5  ;;  %v1017_v63 = vshll.u32 %v924_v52, 16  ;;  %962 = vst.msk [vmem:[#allocation3 + $0x168] sm:$0xff] %vm614_vm12, %v4691_v47  ;;  %1220 = vst.msk [vmem:[#allocation3 + $0x150] sm:$0xff] %vm614_vm12, %v4691_v47  ;;  %v1119_v7 = vrot.slane %v924_v52, 5  ;;  %v1293_v12 = vld [vmem:[#allocation3 + $0x120] sm:$0xff]  ;;  %v547_v15 = vsel %vm6029_vm8, %v479_v57, %v546_v49 }
  0x7d   :  { %v6472_v28 = vld [vmem:[#allocation2 + $0x70] sm:$0xf]  ;;  %v1296_v0 = vld [vmem:[#allocation3 + $0x138] sm:$0xff]  ;;  %v1005_v2 = vrot.slane %v1003_v54, 5  ;;  %v6479_v5 = vsel %vm6055_vm11, %v4700_v35, %v1115_v55  ;;  %v543_v8 = vld [vmem:[#allocation2 + $0x74] sm:$0x1] }
  0x7e   :  { %v4711_v3 = vcombine.low %v923_v31, %v6472_v28  ;;  %2071 = vmatprep.mubr.bf16.mxu1 %v1296_v0  ;;  %v1014_v53 = vor.u32 %v1013_v62, %v1010_v61  ;;  %v1019_v14 = vrot.slane %v1017_v63, 5  ;;  %v480_v16 = vrot.slane %v476_v38, 4  ;;  %v549_v17 = vld [vmem:[#allocation2 + $0x7c] sm:$0x1]  ;;  %548 = vst [vmem:[#allocation2 + $0x78] sm:$0xf] %v547_v15 }
  0x7f   :  { %v544_v6 = vsel %vm5989_vm2, %v472_v37, %v543_v8  ;;  %2072 = vmatmul.mubr.bf16.gmra.mrb[16].mxu1 %v1295_v60  ;;  %v6488_v18 = vsel %vm6070_vm13, %v1001_v43, %v1005_v2  ;;  %v6493_v33 = vsel %vm6055_vm11, %v4701_v56, %v1119_v7  ;;  %v1022_v41 = vshrl.u32 %v6472_v28, 16  ;;  %v5664_v29 = vld [vmem:[%s7805_s1 + $0x178] sm:$0xff]   ;;  %v145_v38 = vld [vmem:[#allocation2 + $0x88] sm:$0x1]  ;;  %v204_v46 = vld [vmem:[#allocation2 + $0x84] sm:$0x1] }
  0x80   :  { %1168 = vst.msk [vmem:[#allocation3 + $0x180] sm:$0xff] %vm614_vm12, %v4711_v3  ;;  %545 = vst [vmem:[#allocation2 + $0x74] sm:$0x1] %v544_v6  ;;  %v1015_v50 = vrot.slane %v1014_v53, 4  ;;  %v4707_v20 = vcombine.low %v6479_v5, %v6493_v33  ;;  %v550_v23 = vsel %vm5989_vm2, %v480_v16, %v549_v17  ;;  %v1025_v24 = vshll.u32 %v6472_v28, 16  ;;  %5137 = vmatprep.subr.bf16.mxu0 %v5664_v29  ;;  %v5665_v47 = vld [vmem:[%s7805_s1 + $0x1a8] sm:$0xff]  }
  0x81   :  { %v1294_v10 = vld [vmem:[#allocation3 + $0x128] sm:$0xff]  ;;  %551 = vst [vmem:[#allocation2 + $0x7c] sm:$0x1] %v550_v23  ;;  %v1024_v9 = vrot.slane %v1022_v41, 4  ;;  %v143_v25 = vsel %vm5989_vm2, 0, %v142_v1  ;;  %v482_v26 = vshrl.u32 %v6474_v44, 16  ;;  %v4719_v49 = vcombine.low %v6415_v19, %v6479_v5  ;;  %5198 = vmatpush3.bf16.msra.mxu1 %v5665_v47 }
  0x82   :  { %v485_v27 = vshll.u32 %v6474_v44, 16  ;;  %1974 = vmatprep.mubr.bf16.mxu0 %v1294_v10  ;;  %v6515_v31 = vsel %vm6070_vm13, %v1015_v50, %v1019_v14  ;;  %1154 = vst.msk [vmem:[#allocation3 + $0x178] sm:$0xff] %vm614_vm12, %v4707_v20  ;;  %1253 = vst.msk [vmem:[#allocation3 + $0x160] sm:$0xff] %vm614_vm12, %v4707_v20  ;;  %v1027_v35 = vrot.slane %v1025_v24, 5  ;;  %v4702_v37 = vrot.slane %v6472_v28, 9  ;;  %v5666_v57 = vld [vmem:[%s7805_s1 + $0x138] sm:$0xff]  }
  0x83   :  { %144 = vst [vmem:[#allocation2 + $0x80] sm:$0x1] %v143_v25  ;;  %1975 = vmatmul.mubr.bf16.gmra.mrb[16].mxu0 %v1293_v12  ;;  %v4695_v42 = vcombine.low %v6488_v18, %v6515_v31  ;;  %v6522_v43 = vrot.slane %v482_v26, 7  ;;  %v146_v45 = vsel %vm5989_vm2, 0, %v145_v38  ;;  %v205_v52 = vsel %vm6001_vm4, 0, %v204_v46  ;;  %1212 = vst.msk [vmem:[#allocation3 + $0x148] sm:$0xff] %vm614_vm12, %v4719_v49 }
  0x84   :  { %v1028_v51 = vor.u32 %v1027_v35, %v1024_v9  ;;  %147 = vst [vmem:[#allocation2 + $0x88] sm:$0x1] %v146_v45  ;;  %v207_v54 = vld [vmem:[#allocation2 + $0x8c] sm:$0x1]  ;;  %v490_v55 = vshrl.u32 %v4977_v39, 16  ;;  %v493_v56 = vshll.u32 %v4977_v39, 16  ;;  %v4714_v60 = vcombine.low %v6451_v13, %v6488_v18  ;;  %5138 = vmatpush3.bf16.msra.mxu0 %v5666_v57 }
  0x85   :  { %1094 = vst.msk [vmem:[#allocation3 + $0x170] sm:$0xff] %vm614_vm12, %v4695_v42  ;;  %1241 = vst.msk [vmem:[#allocation3 + $0x158] sm:$0xff] %vm614_vm12, %v4695_v42  ;;  %v208_v19 = vsel %vm6001_vm4, 0, %v207_v54  ;;  %v488_v59 = vrot.slane %v6522_v43, 4  ;;  %v487_v1 = vor.u32 %v485_v27, %v6522_v43  ;;  %v4644_v0 = vld [vmem:[%s7804_s0 + $0x78] sm:$0xff]  ;;  %v5667_v14 = vld [vmem:[%s7805_s1 + $0x1f0] sm:$0xff]  }
  0x86   :  { %206 = vst [vmem:[#allocation2 + $0x84] sm:$0x1] %v205_v52  ;;  %v1029_v63 = vrot.slane %v1028_v51, 4  ;;  %209 = vst [vmem:[#allocation2 + $0x8c] sm:$0x1] %v208_v19  ;;  %v492_v44 = vrot.slane %v490_v55, 7  ;;  %v6550_v7 = vpack.c.bf16 %v4644_v0, %v4644_v0  ;;  %5199 = vmatprep.subr.bf16.mxu1 %v5667_v14 }
  0x87   :  { %v1305_v61 = vld [vmem:[#allocation3 + $0x180] sm:$0xff]  ;;  %v926_v62 = vld [vmem:[#allocation2 + $0x74] sm:$0x1]  ;;  %v6548_v2 = vld [vmem:[#allocation2 + $0x78] sm:$0xf]  ;;  %1194 = vst.msk [vmem:[#allocation3 + $0x140] sm:$0xff] %vm614_vm12, %v4714_v60 }
  0x88   :  { %2079 = vmatprep.mubr.bf16.mxu1 %v1305_v61  ;;  %v1031_v3 = vshll.u32 %v926_v62, 16  ;;  %v1123_v5 = vrot.slane %v926_v62, 5  ;;  %v928_v13 = vld [vmem:[#allocation2 + $0x7c] sm:$0x1]  ;;  %v1036_v8 = vshrl.u32 %v6548_v2, 16  ;;  %v1039_v11 = vshll.u32 %v6548_v2, 16 }
  0x89   :  { %v4692_v12 = vcombine.low %v6472_v28, %v6548_v2  ;;  %v4703_v53 = vrot.slane %v6548_v2, 9  ;;  %v1302_v16 = vld [vmem:[#allocation3 + $0x168] sm:$0xff]  ;;  %v1304_v6 = vld [vmem:[#allocation3 + $0x178] sm:$0xff]  ;;  %v1045_v18 = vshll.u32 %v928_v13, 16  ;;  %v1127_v21 = vrot.slane %v928_v13, 5 }
  0x8a   :  { %v1033_v17 = vrot.slane %v1031_v3, 5  ;;  %v552_v15 = vld [vmem:[#allocation2 + $0x80] sm:$0xf]  ;;  %v1124_v41 = vsel %vm6055_vm11, %v4702_v37, %v1123_v5  ;;  %2080 = vmatmul.mubr.bf16.gmra.mrb[20].mxu1 %v1304_v6  ;;  %v1038_v50 = vrot.slane %v1036_v8, 4  ;;  %v1041_v20 = vrot.slane %v1039_v11, 5  ;;  %v5669_v57 = vld [vmem:[%s7805_s1 + $0x1f8] sm:$0xff]  }
  0x8b   :  { %963 = vst.msk [vmem:[#allocation3 + $0x1b0] sm:$0xff] %vm614_vm12, %v4692_v12  ;;  %1221 = vst.msk [vmem:[#allocation3 + $0x198] sm:$0xff] %vm614_vm12, %v4692_v12  ;;  %v553_v28 = vsel %vm6029_vm8, %v487_v1, %v552_v15  ;;  %v495_v23 = vor.u32 %v493_v56, %v492_v44  ;;  %v1047_v24 = vrot.slane %v1045_v18, 5  ;;  %v6569_v10 = vsel %vm6055_vm11, %v4703_v53, %v1127_v21  ;;  %v558_v25 = vld [vmem:[#allocation2 + $0x88] sm:$0xf]  ;;  %v6613_v1 = vld [vmem:[%s7805_s1 + $0x200] sm:$0xff]  }
  0x8c   :  { %554 = vst [vmem:[#allocation2 + $0x80] sm:$0xf] %v553_v28  ;;  %v496_v9 = vrot.slane %v492_v44, 4  ;;  %v1303_v26 = vld [vmem:[#allocation3 + $0x170] sm:$0xff]  ;;  %v1042_v27 = vor.u32 %v1041_v20, %v1038_v50  ;;  %v4708_v29 = vcombine.low %v1124_v41, %v6569_v10  ;;  %v498_v39 = vshrl.u32 %v6550_v7, 16  ;;  %5539 = vmatprep.subr.bf16.mxu0 %v6613_v1 }
  0x8d   :  { %v555_v35 = vld [vmem:[#allocation2 + $0x84] sm:$0x1]  ;;  %v559_v37 = vsel %vm6029_vm8, %v495_v23, %v558_v25  ;;  %v148_v38 = vld [vmem:[#allocation2 + $0x90] sm:$0x1]  ;;  %1982 = vmatprep.mubr.bf16.mxu0 %v1303_v26  ;;  %v1034_v42 = vsel %vm6070_vm13, %v1029_v63, %v1033_v17  ;;  %v561_v45 = vld [vmem:[#allocation2 + $0x8c] sm:$0x1]  ;;  %v4720_v47 = vcombine.low %v6493_v33, %v1124_v41 }
  0x8e   :  { %v556_v43 = vsel %vm5989_vm2, %v488_v59, %v555_v35  ;;  %560 = vst [vmem:[#allocation2 + $0x88] sm:$0xf] %v559_v37  ;;  %v149_v46 = vsel %vm5989_vm2, 0, %v148_v38  ;;  %1983 = vmatmul.mubr.bf16.gmra.mrb[20].mxu0 %v1302_v16  ;;  %v1043_v49 = vrot.slane %v1042_v27, 4  ;;  %1155 = vst.msk [vmem:[#allocation3 + $0x1c0] sm:$0xff] %vm614_vm12, %v4708_v29  ;;  %v562_v51 = vsel %vm5989_vm2, %v496_v9, %v561_v45  ;;  %v5668_v33 = vld [vmem:[%s7805_s1 + $0x1b0] sm:$0xff]  }
  0x8f   :  { %1254 = vst.msk [vmem:[#allocation3 + $0x1a8] sm:$0xff] %vm614_vm12, %v4708_v29  ;;  %557 = vst [vmem:[#allocation2 + $0x84] sm:$0x1] %v556_v43  ;;  %v501_v52 = vshll.u32 %v6550_v7, 16  ;;  %v4715_v54 = vcombine.low %v6515_v31, %v1034_v42  ;;  %v6588_v55 = vrot.slane %v498_v39, 7  ;;  %5200 = vmatpush3.bf16.msra.mxu1 %v5668_v33  ;;  %v5670_v59 = vld [vmem:[%s7805_s1 + $0x1b8] sm:$0xff]  }
  0x90   :  { %150 = vst [vmem:[#allocation2 + $0x90] sm:$0x1] %v149_v46  ;;  %563 = vst [vmem:[#allocation2 + $0x8c] sm:$0x1] %v562_v51  ;;  %v6596_v56 = vsel %vm6070_vm13, %v1043_v49, %v1047_v24  ;;  %5201 = vmatprep.subr.bf16.mxu1 %v5669_v57  ;;  %v180_v43 = vld [vmem:[#allocation2 + $0x44] sm:$0x1] }
  0x91   :  { %1213 = vst.msk [vmem:[#allocation3 + $0x190] sm:$0xff] %vm614_vm12, %v4720_v47  ;;  %1195 = vst.msk [vmem:[#allocation3 + $0x188] sm:$0xff] %vm614_vm12, %v4715_v54  ;;  %v4696_v31 = vcombine.low %v1034_v42, %v6596_v56  ;;  %v503_v63 = vor.u32 %v501_v52, %v6588_v55  ;;  %v832_v46 = vshrl.u32 %v6340_v48, 16  ;;  %v835_v47 = vshll.u32 %v6340_v48, 16  ;;  %v121_v52 = vld [vmem:[#allocation2 + $0x48] sm:$0x1] }
  0x92   :  { %v1311_v50 = vld [vmem:[#allocation3 + $0x1b0] sm:$0xff]  ;;  %v183_v54 = vld [vmem:[#allocation2 + $0x4c] sm:$0x1] }
  0x93   :  { %v929_v19 = vld [vmem:[#allocation2 + $0x80] sm:$0xf]  ;;  %1095 = vst.msk [vmem:[#allocation3 + $0x1b8] sm:$0xff] %vm614_vm12, %v4696_v31  ;;  %1242 = vst.msk [vmem:[#allocation3 + $0x1a0] sm:$0xff] %vm614_vm12, %v4696_v31  ;;  %5202 = vmatpush3.bf16.msra.mxu1 %v5670_v59  ;;  %v184_v57 = vsel %vm6001_vm4, 0, %v183_v54  ;;  %v5760_v31 = vld [vmem:[#allocation3 + $0xf8] sm:$0xff] }
  0x94   :  { %v4712_v60 = vcombine.low %v6548_v2, %v929_v19  ;;  %v1050_v61 = vshrl.u32 %v929_v19, 16  ;;  %v1053_v62 = vshll.u32 %v929_v19, 16  ;;  %v4704_v0 = vrot.slane %v929_v19, 9  ;;  %185 = vst [vmem:[#allocation2 + $0x4c] sm:$0x1] %v184_v57  ;;  %v5673_v57 = vld [vmem:[%s7805_s1 + $0x210] sm:$0xff]  }
  0x95   :  { %v6615_v44 = vld [vmem:[#allocation2 + $0x88] sm:$0xf]  ;;  %v1313_v26 = vld [vmem:[#allocation3 + $0x1c0] sm:$0xff]  ;;  %222 = vst.msk [vmem:[#allocation2 + $0x4c] sm:$0x1] %vm91_vm0, %v5760_v31  ;;  %v834_v59 = vrot.slane %v832_v46, 4 }
  0x96   :  { %1169 = vst.msk [vmem:[#allocation3 + $0x1c8] sm:$0xff] %vm614_vm12, %v4712_v60  ;;  %v930_v3 = vld [vmem:[#allocation2 + $0x84] sm:$0x1]  ;;  %v1052_v5 = vrot.slane %v1050_v61, 4  ;;  %v1055_v7 = vrot.slane %v1053_v62, 5  ;;  %v1064_v13 = vshrl.u32 %v6615_v44, 16  ;;  %v4693_v2 = vcombine.low %v929_v19, %v6615_v44 }
  0x97   :  { %v932_v8 = vld [vmem:[#allocation2 + $0x8c] sm:$0x1]  ;;  %v1059_v11 = vshll.u32 %v930_v3, 16  ;;  %v1067_v12 = vshll.u32 %v6615_v44, 16  ;;  %v564_v53 = vld [vmem:[#allocation2 + $0x90] sm:$0xf] }
  0x98   :  { %v1056_v14 = vor.u32 %v1055_v7, %v1052_v5  ;;  %v1066_v16 = vrot.slane %v1064_v13, 4  ;;  %v1073_v6 = vshll.u32 %v932_v8, 16  ;;  %964 = vst.msk [vmem:[#allocation3 + $0x1f8] sm:$0xff] %vm614_vm12, %v4693_v2  ;;  %1222 = vst.msk [vmem:[#allocation3 + $0x1e0] sm:$0xff] %vm614_vm12, %v4693_v2  ;;  %v565_v17 = vsel %vm6029_vm8, %v503_v63, %v564_v53  ;;  %v1262_v61 = vld [vmem:[#allocation3 + $0x28] sm:$0xff] }
  0x99   :  { %v1061_v18 = vrot.slane %v1059_v11, 5  ;;  %v1069_v15 = vrot.slane %v1067_v12, 5  ;;  %566 = vst [vmem:[#allocation2 + $0x90] sm:$0xf] %v565_v17  ;;  %v1131_v41 = vrot.slane %v930_v3, 5  ;;  %v4705_v21 = vrot.slane %v6615_v44, 9 }
  0x9a   :  { %v1057_v20 = vrot.slane %v1056_v14, 4  ;;  %v1135_v28 = vrot.slane %v932_v8, 5  ;;  %v1312_v23 = vld [vmem:[#allocation3 + $0x1b8] sm:$0xff]  ;;  %v1075_v9 = vrot.slane %v1073_v6, 5  ;;  %v332_v19 = vrot.slane %v6243_v30, 4 }
  0x9b   :  { %v1070_v24 = vor.u32 %v1069_v15, %v1066_v16  ;;  %v1132_v25 = vsel %vm6055_vm11, %v4704_v0, %v1131_v41  ;;  %1990 = vmatprep.mubr.bf16.mxu0 %v1312_v23  ;;  %v837_v60 = vrot.slane %v835_v47, 5  ;;  %v210_v5 = vld [vmem:[#allocation2 + $0x94] sm:$0x1]  ;;  %v4681_v15 = vrot.slane %v6340_v48, 9 }
  0x9c   :  { %v1062_v27 = vsel %vm6070_vm13, %v1057_v20, %v1061_v18  ;;  %v6633_v29 = vsel %vm6055_vm11, %v4705_v21, %v1135_v28  ;;  %v4721_v35 = vcombine.low %v6569_v10, %v1132_v25  ;;  %1991 = vmatmul.mubr.bf16.gmra.mrb[24].mxu0 %v1311_v50  ;;  %v181_v10 = vsel %vm6001_vm4, 0, %v180_v43  ;;  %v589_v12 = vld [vmem:[#allocation2 + $0x4c] sm:$0x1]  ;;  %v151_v18 = vld [vmem:[#allocation2 + $0x98] sm:$0x1] }
  0x9d   :  { %v1314_v37 = vld [vmem:[#allocation3 + $0x1c8] sm:$0xff]  ;;  %v1071_v38 = vrot.slane %v1070_v24, 4  ;;  %v4709_v39 = vcombine.low %v1132_v25, %v6633_v29  ;;  %v4716_v42 = vcombine.low %v6596_v56, %v1062_v27  ;;  %182 = vst [vmem:[#allocation2 + $0x44] sm:$0x1] %v181_v10  ;;  %v122_v56 = vsel %vm5989_vm2, 0, %v121_v52  ;;  %v1261_v25 = vld [vmem:[#allocation3 + $0x20] sm:$0xff] }
  0x9e   :  { %2087 = vmatprep.mubr.bf16.mxu1 %v1314_v37  ;;  %1214 = vst.msk [vmem:[#allocation3 + $0x1d8] sm:$0xff] %vm614_vm12, %v4721_v35  ;;  %123 = vst [vmem:[#allocation2 + $0x48] sm:$0x1] %v122_v56  ;;  %v838_v3 = vor.u32 %v837_v60, %v834_v59  ;;  %v211_v2 = vsel %vm6001_vm4, 0, %v210_v5  ;;  %v894_v6 = vshll.u32 %v589_v12, 16  ;;  %v504_v21 = vrot.slane %v6588_v55, 4 }
  0x9f   :  { %2088 = vmatmul.mubr.bf16.gmra.mrb[24].mxu1 %v1313_v26  ;;  %v6641_v45 = vsel %vm6070_vm13, %v1071_v38, %v1075_v9  ;;  %1156 = vst.msk [vmem:[#allocation3 + $0x208] sm:$0xff] %vm614_vm12, %v4709_v39  ;;  %1255 = vst.msk [vmem:[#allocation3 + $0x1f0] sm:$0xff] %vm614_vm12, %v4709_v39  ;;  %v1320_v63 = vld [vmem:[#allocation3 + $0x1f8] sm:$0xff]  ;;  %v152_v50 = vsel %vm5989_vm2, 0, %v151_v18  ;;  %v908_v55 = vrot.slane %v589_v12, 5  ;;  %v1263_v35 = vld [vmem:[#allocation3 + $0x30] sm:$0xff] }
  0xa0   :  { %1196 = vst.msk [vmem:[#allocation3 + $0x1d0] sm:$0xff] %vm614_vm12, %v4716_v42  ;;  %v4697_v49 = vcombine.low %v1062_v27, %v6641_v45  ;;  %v6651_v51 = vld [vmem:[#allocation2 + $0x90] sm:$0xf]  ;;  %212 = vst [vmem:[#allocation2 + $0x94] sm:$0x1] %v211_v2  ;;  %v839_v41 = vrot.slane %v838_v3, 4 }
  0xa1   :  { %v4713_v33 = vcombine.low %v6615_v44, %v6651_v51  ;;  %221 = vst.msk [vmem:[#allocation2 + $0x48] sm:$0xf] %vm216_vm5, %v5760_v31  ;;  %v1264_v44 = vld [vmem:[#allocation3 + $0x38] sm:$0xff]  ;;  %v1172_v8 = vshrl.u32 %v6651_v51, 16  ;;  %v1175_v53 = vshll.u32 %v6651_v51, 16  ;;  %v896_v26 = vrot.slane %v894_v6, 5 }
  0xa2   :  { %1096 = vst.msk [vmem:[#allocation3 + $0x200] sm:$0xff] %vm614_vm12, %v4697_v49  ;;  %1243 = vst.msk [vmem:[#allocation3 + $0x1e8] sm:$0xff] %vm614_vm12, %v4697_v49  ;;  %v213_v20 = vld [vmem:[#allocation2 + $0x9c] sm:$0x1]  ;;  %v1271_v38 = vld [vmem:[#allocation3 + $0x70] sm:$0xff] }
  0xa3   :  { %1170 = vst.msk [vmem:[#allocation3 + $0x210] sm:$0xff] %vm614_vm12, %v4713_v33  ;;  %153 = vst [vmem:[#allocation2 + $0x98] sm:$0x1] %v152_v50  ;;  %v214_v24 = vsel %vm6001_vm4, 0, %v213_v20  ;;  %v1177_v27 = vrot.slane %v1175_v53, 5  ;;  %v1273_v52 = vld [vmem:[#allocation3 + $0x80] sm:$0xff] }
  0xa4   :  { %v397_v62 = vld [vmem:[#allocation2 + $0x44] sm:$0x1]  ;;  %215 = vst [vmem:[#allocation2 + $0x9c] sm:$0x1] %v214_v24  ;;  %227 = vst.msk [vmem:[#allocation2 + $0x98] sm:$0xf] %vm216_vm5, %v5760_v31 }
  0xa5   :  { %v398_v0 = vsel %vm5989_vm2, %v332_v19, %v397_v62  ;;  %228 = vst.msk [vmem:[#allocation2 + $0x9c] sm:$0x1] %vm91_vm0, %v5760_v31  ;;  %v4718_v19 = vrot.slane %v6651_v51, 9  ;;  %v1272_v5 = vld [vmem:[#allocation3 + $0x78] sm:$0xff] }
  0xa6   :  { %v1322_v13 = vld [vmem:[#allocation3 + $0x208] sm:$0xff]  ;;  %399 = vst [vmem:[#allocation2 + $0x44] sm:$0x1] %v398_v0  ;;  %v5674_v12 = vld [vmem:[%s7805_s1 + $0x218] sm:$0xff]  }
  0xa7   :  { %v567_v46 = vld [vmem:[#allocation2 + $0x94] sm:$0x1] }
  0xa8   :  { %v588_v11 = vld [vmem:[#allocation2 + $0x48] sm:$0xf]  ;;  %v568_v49 = vsel %vm5989_vm2, %v504_v21, %v567_v46  ;;  %v5675_v21 = vld [vmem:[%s7805_s1 + $0x220] sm:$0xff]   ;;  %v1307_v46 = vld [vmem:[#allocation3 + $0x190] sm:$0xff] }
  0xa9   :  { %v1321_v7 = vld [vmem:[#allocation3 + $0x200] sm:$0xff]  ;;  %v885_v14 = vshrl.u32 %v588_v11, 16  ;;  %v888_v16 = vshll.u32 %v588_v11, 16  ;;  %v4686_v17 = vcombine.low %v6340_v48, %v588_v11  ;;  %v4688_v9 = vrot.slane %v588_v11, 9  ;;  %569 = vst [vmem:[#allocation2 + $0x94] sm:$0x1] %v568_v49 }
  0xaa   :  { %1998 = vmatprep.mubr.bf16.mxu0 %v1321_v7  ;;  %v1323_v30 = vld [vmem:[#allocation3 + $0x210] sm:$0xff]  ;;  %v1174_v48 = vrot.slane %v1172_v8, 4  ;;  %v1280_v7 = vld [vmem:[#allocation3 + $0xb8] sm:$0xff]  ;;  %v1282_v11 = vld [vmem:[#allocation3 + $0xc8] sm:$0xff] }
  0xab   :  { %1999 = vmatmul.mubr.bf16.gmra.mrb[28].mxu0 %v1320_v63  ;;  %2095 = vmatprep.mubr.bf16.mxu1 %v1323_v30  ;;  %v887_v28 = vrot.slane %v885_v14, 4  ;;  %v890_v23 = vrot.slane %v888_v16, 5  ;;  %883 = vst.msk [vmem:[#allocation3 + $0x108] sm:$0xff] %vm614_vm12, %v4686_v17  ;;  %v909_v47 = vsel %vm6055_vm11, %v4688_v9, %v908_v55  ;;  %v935_v62 = vld [vmem:[#allocation2 + $0x98] sm:$0xf]  ;;  %v1270_v63 = vld [vmem:[#allocation3 + $0x68] sm:$0xff] }
  0xac   :  { %2096 = vmatmul.mubr.bf16.gmra.mrb[28].mxu1 %v1322_v13  ;;  %2136 = vmatprep.mubr.bf16.mxu0 %v1262_v61  ;;  %v1178_v61 = vor.u32 %v1177_v27, %v1174_v48  ;;  %v936_v0 = vld [vmem:[#allocation2 + $0x9c] sm:$0x1]  ;;  %v1225_v3 = vshrl.u32 %v935_v62, 16  ;;  %v4723_v2 = vcombine.low %v6651_v51, %v935_v62  ;;  %v4725_v8 = vrot.slane %v935_v62, 9  ;;  %v5676_v55 = vld [vmem:[%s7805_s1 + $0x228] sm:$0xff]  }
  0xad   :  { %2233 = vmatprep.mubr.bf16.mxu1 %v1264_v44  ;;  %v891_v37 = vor.u32 %v890_v23, %v887_v28  ;;  %v587_v39 = vld [vmem:[#allocation2 + $0x44] sm:$0x1]  ;;  %v1234_v13 = vshll.u32 %v936_v0, 16  ;;  %v1248_v30 = vrot.slane %v936_v0, 5  ;;  %v1279_v28 = vld [vmem:[#allocation3 + $0xb0] sm:$0xff]  ;;  %v1306_v49 = vld [vmem:[#allocation3 + $0x188] sm:$0xff] }
  0xae   :  { %v861_v42 = vrot.slane %v587_v39, 5  ;;  %v841_v43 = vshll.u32 %v587_v39, 16  ;;  %v1179_v14 = vrot.slane %v1178_v61, 4  ;;  %1223 = vst.msk [vmem:[#allocation3 + $0x228] sm:$0xff] %vm614_vm12, %v4723_v2  ;;  %v1300_v39 = vld [vmem:[#allocation3 + $0x158] sm:$0xff] }
  0xaf   :  { %v892_v10 = vrot.slane %v891_v37, 4  ;;  %v1236_v16 = vrot.slane %v1234_v13, 5 }
  0xb0   :  { %v862_v54 = vsel %vm6055_vm11, %v4681_v15, %v861_v42  ;;  %v843_v33 = vrot.slane %v841_v43, 5  ;;  %v934_v51 = vld [vmem:[#allocation2 + $0x94] sm:$0x1]  ;;  %v1249_v15 = vsel %vm6055_vm11, %v4725_v8, %v1248_v30  ;;  %v5678_v42 = vld [vmem:[%s7805_s1 + $0x238] sm:$0xff]   ;;  %v1297_v43 = vld [vmem:[#allocation3 + $0x140] sm:$0xff] }
  0xb1   :  { %v897_v56 = vsel %vm6070_vm13, %v892_v10, %v896_v26  ;;  %v4685_v31 = vcombine.low %v6333_v32, %v862_v54  ;;  %v4689_v59 = vcombine.low %v862_v54, %v909_v47  ;;  %v1228_v32 = vshll.u32 %v935_v62, 16  ;;  %v1299_v10 = vld [vmem:[#allocation3 + $0x150] sm:$0xff]  ;;  %v1309_v47 = vld [vmem:[#allocation3 + $0x1a0] sm:$0xff]  ;;  %v1316_v54 = vld [vmem:[#allocation3 + $0x1d8] sm:$0xff] }
  0xb2   :  { %v844_v60 = vsel %vm6070_vm13, %v839_v41, %v843_v33  ;;  %v1201_v17 = vrot.slane %v934_v51, 5  ;;  %v1181_v18 = vshll.u32 %v934_v51, 16  ;;  %v1318_v33 = vld [vmem:[#allocation3 + $0x1e8] sm:$0xff] }
  0xb3   :  { %2137 = vmatmul.mubr.bf16.vlgmr.msra.gmra.mrb[32].mxu0 %v1261_v25  ;;  %875 = vst.msk [vmem:[#allocation3 + $0x100] sm:$0xff] %vm614_vm12, %v4685_v31  ;;  %v4687_v44 = vcombine.low %v844_v60, %v897_v56  ;;  %916 = vst.msk [vmem:[#allocation3 + $0x118] sm:$0xff] %vm614_vm12, %v4689_v59  ;;  %v1230_v53 = vrot.slane %v1228_v32, 5  ;;  %v1281_v25 = vld [vmem:[#allocation3 + $0xc0] sm:$0xff]  ;;  %v1315_v56 = vld [vmem:[#allocation3 + $0x1d0] sm:$0xff] }
  0xb4   :  { %5540 = vmatpush3.bf16.msra.mxu0 %v6613_v1  ;;  %2234 = vmatmul.mubr.bf16.vlgmr.msra.gmra.mrb[32].mxu1 %v1263_v35  ;;  %v4680_v1 = vcombine.low %v6362_v4, %v844_v60  ;;  %v1227_v4 = vrot.slane %v1225_v3, 4  ;;  %v1202_v50 = vsel %vm6055_vm11, %v4718_v19, %v1201_v17  ;;  %v1183_v20 = vrot.slane %v1181_v18, 5 }
  0xb5   :  { %2144 = vmatprep.mubr.bf16.mxu0 %v1271_v38  ;;  %5541 = vmatprep.subr.bf16.mxu0 %v5672_v40  ;;  %904 = vst.msk [vmem:[#allocation3 + $0x110] sm:$0xff] %vm614_vm12, %v4687_v44  ;;  %v4722_v23 = vcombine.low %v6633_v29, %v1202_v50  ;;  %v4726_v9 = vcombine.low %v1202_v50, %v1249_v15  ;;  %v5677_v29 = vld [vmem:[%s7805_s1 + $0x230] sm:$0xff]   ;;  %v1298_v38 = vld [vmem:[#allocation3 + $0x148] sm:$0xff] }
  0xb6   :  { %2241 = vmatprep.mubr.bf16.mxu1 %v1273_v52  ;;  %857 = vst.msk [vmem:[#allocation3 + $0xf8] sm:$0xff] %vm614_vm12, %v4680_v1  ;;  %v1231_v6 = vor.u32 %v1230_v53, %v1227_v4  ;;  %v1184_v48 = vsel %vm6070_vm13, %v1179_v14, %v1183_v20  ;;  %v1308_v52 = vld [vmem:[#allocation3 + $0x198] sm:$0xff] }
  0xb7   :  { %1215 = vst.msk [vmem:[#allocation3 + $0x220] sm:$0xff] %vm614_vm12, %v4722_v23  ;;  %v4717_v35 = vcombine.low %v6641_v45, %v1184_v48  ;;  %1256 = vst.msk [vmem:[#allocation3 + $0x238] sm:$0xff] %vm614_vm12, %v4726_v9 }
  0xb8   :  { %5542 = vmatpush3.bf16.msra.mxu0 %v5672_v40  ;;  %v1232_v41 = vrot.slane %v1231_v6, 4  ;;  %v1290_v40 = vld [vmem:[#allocation3 + $0x108] sm:$0xff] }
  0xb9   :  { %5543 = vmatprep.subr.bf16.mxu0 %v5673_v57  ;;  %1197 = vst.msk [vmem:[#allocation3 + $0x218] sm:$0xff] %vm614_vm12, %v4717_v35 }
  0xba   :  { %v1237_v24 = vsel %vm6070_vm13, %v1232_v41, %v1236_v16  ;;  %v1289_v26 = vld [vmem:[#allocation3 + $0x100] sm:$0xff] }
  0xbb   :  { %2145 = vmatmul.mubr.bf16.gmra.mrb[36].mxu0 %v1270_v63  ;;  %v4724_v37 = vcombine.low %v1184_v48, %v1237_v24 }
  0xbc   :  { %2242 = vmatmul.mubr.bf16.gmra.mrb[36].mxu1 %v1272_v5  ;;  %2152 = vmatprep.mubr.bf16.mxu0 %v1280_v7  ;;  %v1291_v27 = vld [vmem:[#allocation3 + $0x110] sm:$0xff] }
  0xbd   :  { %5544 = vmatpush3.bf16.msra.mxu0 %v5673_v57  ;;  %2249 = vmatprep.mubr.bf16.mxu1 %v1282_v11  ;;  %1244 = vst.msk [vmem:[#allocation3 + $0x230] sm:$0xff] %vm614_vm12, %v4724_v37  ;;  %v1288_v45 = vld [vmem:[#allocation3 + $0xf8] sm:$0xff]  ;;  %v1317_v57 = vld [vmem:[#allocation3 + $0x1e0] sm:$0xff] }
  0xbe   :  { %5545 = vmatprep.subr.bf16.mxu0 %v5674_v12  ;;  %v1325_v31 = vld [vmem:[#allocation3 + $0x220] sm:$0xff] }
  0xc1   :  { %5546 = vmatpush3.bf16.msra.mxu0 %v5674_v12 }
  0xc2   :  { %5547 = vmatprep.subr.bf16.mxu0 %v5675_v21 }
  0xc3   :  { %2153 = vmatmul.mubr.bf16.gmra.mrb[40].mxu0 %v1279_v28 }
  0xc4   :  { %2250 = vmatmul.mubr.bf16.gmra.mrb[40].mxu1 %v1281_v25  ;;  %2160 = vmatprep.mubr.bf16.mxu0 %v1289_v26  ;;  %v1327_v19 = vld [vmem:[#allocation3 + $0x230] sm:$0xff] }
  0xc5   :  { %2257 = vmatprep.mubr.bf16.mxu1 %v1291_v27  ;;  %5548 = vmatpush3.bf16.msra.mxu0 %v5675_v21 }
  0xc6   :  { %5549 = vmatprep.subr.bf16.mxu0 %v5676_v55 }
  0xc9   :  { %5550 = vmatpush3.bf16.msra.mxu0 %v5676_v55 }
  0xca   :  { %5551 = vmatprep.subr.bf16.mxu0 %v5677_v29 }
  0xcb   :  { %2161 = vmatmul.mubr.bf16.gmra.mrb[44].mxu0 %v1288_v45 }
  0xcc   :  { %2258 = vmatmul.mubr.bf16.gmra.mrb[44].mxu1 %v1290_v40  ;;  %2168 = vmatprep.mubr.bf16.mxu0 %v1298_v38 }
  0xcd   :  { %2265 = vmatprep.mubr.bf16.mxu1 %v1300_v39  ;;  %5552 = vmatpush3.bf16.msra.mxu0 %v5677_v29 }
  0xce   :  { %5553 = vmatprep.subr.bf16.mxu0 %v5678_v42 }
  0xd1   :  { %5554 = vmatpush3.bf16.msra.mxu0 %v5678_v42 }
  0xd3   :  { %2169 = vmatmul.mubr.bf16.gmra.mrb[48].mxu0 %v1297_v43 }
  0xd4   :  { %2266 = vmatmul.mubr.bf16.gmra.mrb[48].mxu1 %v1299_v10  ;;  %2176 = vmatprep.mubr.bf16.mxu0 %v1307_v46 }
  0xd5   :  { %2273 = vmatprep.mubr.bf16.mxu1 %v1309_v47 }
  0xdb   :  { %2177 = vmatmul.mubr.bf16.gmra.mrb[52].mxu0 %v1306_v49 }
  0xdc   :  { %2274 = vmatmul.mubr.bf16.gmra.mrb[52].mxu1 %v1308_v52  ;;  %2184 = vmatprep.mubr.bf16.mxu0 %v1316_v54 }
  0xdd   :  { %2281 = vmatprep.mubr.bf16.mxu1 %v1318_v33 }
  0xe3   :  { %2185 = vmatmul.mubr.bf16.gmra.mrb[56].mxu0 %v1315_v56 }
  0xe4   :  { %2282 = vmatmul.mubr.bf16.gmra.mrb[56].mxu1 %v1317_v57  ;;  %2192 = vmatprep.mubr.bf16.mxu0 %v1325_v31 }
  0xe5   :  { %2289 = vmatprep.mubr.bf16.mxu1 %v1327_v19 }
  0xe6   :  { %9 = vsyncpa [#allocation5], 0  ;;  %v1324_v59 = vld [vmem:[#allocation3 + $0x218] sm:$0xff]  ;;  %v1326_v60 = vld [vmem:[#allocation3 + $0x228] sm:$0xff]  ;;  %s5789_s22 = smov [#allocation4]  }
  0xe7   :  { %v1265_v61 = vld [vmem:[#allocation3 + $0x40] sm:$0xff]  ;;  %v1274_v62 = vld [vmem:[#allocation3 + $0x88] sm:$0xff]  ;;  %v1283_v63 = vld [vmem:[#allocation3 + $0xd0] sm:$0xff]  ;;  %s4618_s23 = sshll.u32 %s5789_s22, 4  ;;  %s4619_s23 = int_to_ptr.vmem [resolvable:$true] %s4618_s23 }
  0xe8   :  { %v1292_v1 = vld [vmem:[#allocation3 + $0x118] sm:$0xff]  ;;  %v1301_v44 = vld [vmem:[#allocation3 + $0x160] sm:$0xff]  ;;  %v1310_v0 = vld [vmem:[#allocation3 + $0x1a8] sm:$0xff]  ;;  %p5769_p1 = scmp.lt.s32.totalorder %s4619_s23, %s4619_s23 }
  0xe9   :  { %v1319_v3 = vld [vmem:[#allocation3 + $0x1f0] sm:$0xff]  ;;  %v1328_v32 = vld [vmem:[#allocation3 + $0x238] sm:$0xff]  ;;  %v6739_v12 = vld [vmem:[%s7807_s3] ss:$0 sm:$0xff] }
  0xea   :  { %v5679_v9 = vld [vmem:[%s7806_s2 + $0x40] sm:$0xff]   ;;  %v5681_v46 = vld [vmem:[%s7806_s2 + $0x48] sm:$0xff]  }
  0xeb   :  { %2193 = vmatmul.mubr.bf16.gmra.mrb[60].mxu0 %v1324_v59  ;;  %5267 = vmatprep.subr.bf16.mxu1 %v5679_v9  ;;  %v5680_v27 = vld [vmem:[%s7806_s2] sm:$0xff]   ;;  %v5682_v56 = vld [vmem:[%s7806_s2 + $0x8] sm:$0xff]   ;;  %v5694_v9 = vld [vmem:[%s7806_s2 + $0x90] sm:$0xff]  }
  0xec   :  { %2290 = vmatmul.mubr.bf16.gmra.mrb[60].mxu1 %v1326_v60  ;;  %5555 = vmatprep.mubr.bf16.mxu0 %v1265_v61 }
  0xed   :  { %5268 = vmatpush3.bf16.msra.mxu1 %v5680_v27 }
  0xee   :  { %5269 = vmatprep.subr.bf16.mxu1 %v5681_v46 }
  0xf1   :  { %5270 = vmatpush3.bf16.msra.mxu1 %v5682_v56  ;;  %v5699_v56 = vld [vmem:[%s7806_s2 + $0xe0] sm:$0xff]  }
  0xf3   :  { %5556 = vmatmul.mubr.bf16.vlgmr.msra.gmra.mrb[64].mxu0 %v1274_v62  ;;  %v5683_v62 = vld [vmem:[%s7806_s2 + $0x50] sm:$0xff]  }
  0xf4   :  { %5559 = vmatprep.mubr.bf16.mxu0 %v1283_v63  ;;  %5271 = vmatprep.subr.bf16.mxu1 %v5683_v62 }
  0xfb   :  { %5560 = vmatmul.mubr.bf16.gmra.mrb[68].mxu0 %v1292_v1  ;;  %v5684_v1 = vld [vmem:[%s7806_s2 + $0x10] sm:$0xff]  }
  0xfc   :  { %5563 = vmatprep.mubr.bf16.mxu0 %v1301_v44  ;;  %5272 = vmatpush3.bf16.msra.mxu1 %v5684_v1  ;;  %v5692_v1 = vld [vmem:[%s7806_s2 + $0x20] sm:$0xff]  }
 0x103   :  { %5564 = vmatmul.mubr.bf16.gmra.mrb[72].mxu0 %v1310_v0 }
 0x104   :  { %5567 = vmatprep.mubr.bf16.mxu0 %v1319_v3 }
 0x10b   :  { %5568 = vmatmul.mubr.bf16.gmra.mrb[76].mxu0 %v1328_v32 }
 0x11b   :  { %v5075_v5 = vpop.f32.mrb[0].mxu1 }
 0x11c   :  { %v5076_v7 = vpop.f32.mrb[1].mxu1 }
 0x11d   :  { %v5077_v13 = vadd.f32 %v5076_v7, %v5075_v5  ;;  %v5078_v2 = vpop.f32.mrb[2].mxu1 }
 0x11e   :  { %v5079_v8 = vpop.f32.mrb[3].mxu1 }
 0x11f   :  { %v5080_v11 = vadd.f32 %v5079_v8, %v5078_v2  ;;  %v5687_v2 = vld [vmem:[%s7806_s2 + $0xc0] sm:$0xff]  }
 0x120   :  { %v5011_v30 = vpop.f32.mrb[0].mxu0  ;;  %5331 = vmatprep.subr.bf16.mxu0 %v5687_v2 }
 0x121   :  { %v5012_v4 = vpop.f32.mrb[1].mxu0 }
 0x122   :  { %v5013_v53 = vadd.f32 %v5012_v4, %v5011_v30  ;;  %v5014_v14 = vpop.f32.mrb[2].mxu0 }
 0x123   :  { %v5015_v16 = vpop.f32.mrb[3].mxu0 }
 0x124   :  { %v1945_v51 = vadd.f32 %v5013_v53, %v6739_v12  ;;  %v5016_v6 = vadd.f32 %v5015_v16, %v5014_v14 }
 0x126   :  { %v1948_v17 = vadd.f32 %v5016_v6, %v6739_v12  ;;  %v6743_v18 = vadd.f32 %v5077_v13, %v1945_v51  ;;  %v5689_v6 = vld [vmem:[%s7806_s2 + $0xc8] sm:$0xff]  }
 0x128   :  { %v6745_v15 = vadd.f32 %v5080_v11, %v1948_v17  ;;  %v5081_v41 = vpop.f32.mrb[4].mxu1  ;;  %v5688_v11 = vld [vmem:[%s7806_s2 + $0x80] sm:$0xff]  }
 0x129   :  { %v5082_v21 = vpop.f32.mrb[5].mxu1  ;;  %5332 = vmatpush3.bf16.msra.mxu0 %v5688_v11  ;;  %v5706_v11 = vld [vmem:[%s7806_s2 + $0xb0] sm:$0xff]  }
 0x12a   :  { %v5083_v50 = vadd.f32 %v5082_v21, %v5081_v41  ;;  %v5084_v20 = vpop.f32.mrb[6].mxu1  ;;  %v5690_v41 = vld [vmem:[%s7806_s2 + $0x88] sm:$0xff]   ;;  %5333 = vmatprep.subr.bf16.mxu0 %v5689_v6  ;;  %v5708_v6 = vld [vmem:[%s7806_s2 + $0xb8] sm:$0xff]  }
 0x12b   :  { %v5085_v28 = vpop.f32.mrb[7].mxu1 }
 0x12c   :  { %v5086_v24 = vadd.f32 %v5085_v28, %v5084_v20 }
 0x12d   :  { %v5017_v23 = vpop.f32.mrb[4].mxu0  ;;  %5334 = vmatpush3.bf16.msra.mxu0 %v5690_v41  ;;  %v5703_v41 = vld [vmem:[%s7806_s2 + $0x70] sm:$0xff]  }
 0x12e   :  { %v5018_v25 = vpop.f32.mrb[5].mxu0 }
 0x12f   :  { %v5019_v26 = vadd.f32 %v5018_v25, %v5017_v23  ;;  %v5020_v48 = vpop.f32.mrb[6].mxu0  ;;  %v5693_v23 = vld [vmem:[%s7806_s2 + $0xd0] sm:$0xff]  }
 0x130   :  { %v5021_v55 = vpop.f32.mrb[7].mxu0  ;;  %5335 = vmatprep.subr.bf16.mxu0 %v5693_v23 }
 0x131   :  { %v1953_v35 = vadd.f32 %v5019_v26, %v6739_v12  ;;  %v5022_v37 = vadd.f32 %v5021_v55, %v5020_v48  ;;  %5336 = vmatpush3.bf16.msra.mxu0 %v5694_v9 }
 0x133   :  { %v1956_v29 = vadd.f32 %v5022_v37, %v6739_v12  ;;  %v6755_v45 = vadd.f32 %v5083_v50, %v1953_v35  ;;  %v5695_v35 = vld [vmem:[%s7806_s2 + $0xd8] sm:$0xff]  }
 0x134   :  { %v5087_v38 = vpop.f32.mrb[8].mxu1  ;;  %5337 = vmatprep.subr.bf16.mxu0 %v5695_v35 }
 0x135   :  { %v5088_v39 = vpop.f32.mrb[9].mxu1  ;;  %v6757_v40 = vadd.f32 %v5086_v24, %v1956_v29  ;;  %v5696_v29 = vld [vmem:[%s7806_s2 + $0x98] sm:$0xff]  }
 0x136   :  { %v5023_v42 = vpop.f32.mrb[8].mxu0  ;;  %v5089_v43 = vadd.f32 %v5088_v39, %v5087_v38  ;;  %v5090_v10 = vpop.f32.mrb[10].mxu1  ;;  %5338 = vmatpush3.bf16.msra.mxu0 %v5696_v29 }
 0x137   :  { %v5024_v47 = vpop.f32.mrb[9].mxu0  ;;  %v5091_v49 = vpop.f32.mrb[11].mxu1  ;;  %5339 = vmatprep.subr.bf16.mxu0 %v5699_v56 }
 0x138   :  { %v5025_v52 = vadd.f32 %v5024_v47, %v5023_v42  ;;  %v5026_v54 = vpop.f32.mrb[10].mxu0  ;;  %v5092_v33 = vadd.f32 %v5091_v49, %v5090_v10  ;;  %v5685_v42 = vld [vmem:[%s7806_s2 + $0x58] sm:$0xff]  }
 0x139   :  { %v5027_v57 = vpop.f32.mrb[11].mxu0  ;;  %5273 = vmatprep.subr.bf16.mxu1 %v5685_v42 }
 0x13a   :  { %v1961_v31 = vadd.f32 %v5025_v52, %v6739_v12  ;;  %v5028_v19 = vadd.f32 %v5027_v57, %v5026_v54 }
 0x13c   :  { %v1964_v59 = vadd.f32 %v5028_v19, %v6739_v12  ;;  %v6767_v60 = vadd.f32 %v5089_v43, %v1961_v31  ;;  %v5686_v43 = vld [vmem:[%s7806_s2 + $0x18] sm:$0xff]   ;;  %v5700_v31 = vld [vmem:[%s7806_s2 + $0xa0] sm:$0xff]  }
 0x13d   :  { %5274 = vmatpush3.bf16.msra.mxu1 %v5686_v43  ;;  %5340 = vmatpush3.bf16.msra.mxu0 %v5700_v31 }
 0x13e   :  { %v6769_v61 = vadd.f32 %v5092_v33, %v1964_v59 }
 0x141   :  { %v5093_v63 = vpop.f32.mrb[12].mxu1 }
 0x142   :  { %v5094_v44 = vpop.f32.mrb[13].mxu1 }
 0x143   :  { %v5095_v0 = vadd.f32 %v5094_v44, %v5093_v63  ;;  %v5096_v3 = vpop.f32.mrb[14].mxu1  ;;  %v5691_v63 = vld [vmem:[%s7806_s2 + $0x60] sm:$0xff]  }
 0x144   :  { %v5029_v32 = vpop.f32.mrb[12].mxu0  ;;  %v5097_v5 = vpop.f32.mrb[15].mxu1  ;;  %5275 = vmatprep.subr.bf16.mxu1 %v5691_v63 }
 0x145   :  { %v5030_v7 = vpop.f32.mrb[13].mxu0  ;;  %v5098_v13 = vadd.f32 %v5097_v5, %v5096_v3  ;;  %v5701_v3 = vld [vmem:[%s7806_s2 + $0xe8] sm:$0xff]   ;;  %5276 = vmatpush3.bf16.msra.mxu1 %v5692_v1 }
 0x146   :  { %v5031_v8 = vadd.f32 %v5030_v7, %v5029_v32  ;;  %v5032_v30 = vpop.f32.mrb[14].mxu0  ;;  %v5702_v5 = vld [vmem:[%s7806_s2 + $0xa8] sm:$0xff]   ;;  %5341 = vmatprep.subr.bf16.mxu0 %v5701_v3 }
 0x147   :  { %v5033_v4 = vpop.f32.mrb[15].mxu0  ;;  %5342 = vmatpush3.bf16.msra.mxu0 %v5702_v5  ;;  %v5713_v5 = vld [vmem:[%s7806_s2 + $0x140] sm:$0xff]  }
 0x148   :  { %v1969_v53 = vadd.f32 %v5031_v8, %v6739_v12  ;;  %v5034_v14 = vadd.f32 %v5033_v4, %v5032_v30  ;;  %v5705_v30 = vld [vmem:[%s7806_s2 + $0xf0] sm:$0xff]  }
 0x149   :  { %5343 = vmatprep.subr.bf16.mxu0 %v5705_v30 }
 0x14a   :  { %v1972_v16 = vadd.f32 %v5034_v14, %v6739_v12  ;;  %v6785_v51 = vadd.f32 %v5095_v0, %v1969_v53  ;;  %v5697_v53 = vld [vmem:[%s7806_s2 + $0x68] sm:$0xff]  }
 0x14b   :  { %5344 = vmatpush3.bf16.msra.mxu0 %v5706_v11  ;;  %5277 = vmatprep.subr.bf16.mxu1 %v5697_v53  ;;  %v5698_v14 = vld [vmem:[%s7806_s2 + $0x28] sm:$0xff]  }
 0x14c   :  { %v6790_v17 = vadd.f32 %v5098_v13, %v1972_v16  ;;  %v5707_v16 = vld [vmem:[%s7806_s2 + $0xf8] sm:$0xff]   ;;  %5278 = vmatpush3.bf16.msra.mxu1 %v5698_v14 }
 0x14d   :  { %5345 = vmatprep.subr.bf16.mxu0 %v5707_v16  ;;  %5279 = vmatprep.subr.bf16.mxu1 %v5703_v41 }
 0x14f   :  { %5346 = vmatpush3.bf16.msra.mxu0 %v5708_v6 }
 0x152   :  { %v5099_v21 = vpop.f32.mrb[16].mxu1 }
 0x153   :  { %v5100_v50 = vpop.f32.mrb[17].mxu1 }
 0x154   :  { %v5101_v20 = vadd.f32 %v5100_v50, %v5099_v21  ;;  %v5102_v28 = vpop.f32.mrb[18].mxu1  ;;  %v5704_v50 = vld [vmem:[%s7806_s2 + $0x30] sm:$0xff]  }
 0x155   :  { %v5103_v24 = vpop.f32.mrb[19].mxu1  ;;  %5280 = vmatpush3.bf16.msra.mxu1 %v5704_v50 }
 0x156   :  { %v5035_v25 = vpop.f32.mrb[16].mxu0  ;;  %v5104_v26 = vadd.f32 %v5103_v24, %v5102_v28 }
 0x157   :  { %v5036_v48 = vpop.f32.mrb[17].mxu0 }
 0x158   :  { %v5037_v27 = vadd.f32 %v5036_v48, %v5035_v25  ;;  %v5038_v55 = vpop.f32.mrb[18].mxu0 }
 0x159   :  { %v5039_v37 = vpop.f32.mrb[19].mxu0 }
 0x15a   :  { %v1977_v38 = vadd.f32 %v5037_v27, %v6739_v12  ;;  %v5040_v39 = vadd.f32 %v5039_v37, %v5038_v55  ;;  %v5710_v37 = vld [vmem:[%s7806_s2 + $0x38] sm:$0xff]  }
 0x15c   :  { %v1980_v10 = vadd.f32 %v5040_v39, %v6739_v12  ;;  %v6815_v46 = vadd.f32 %v5101_v20, %v1977_v38 }
 0x15d   :  { %v5105_v47 = vpop.f32.mrb[20].mxu1 }
 0x15e   :  { %v6817_v49 = vadd.f32 %v5104_v26, %v1980_v10  ;;  %v5106_v52 = vpop.f32.mrb[21].mxu1  ;;  %v5709_v26 = vld [vmem:[%s7806_s2 + $0x78] sm:$0xff]  }
 0x15f   :  { %v5107_v54 = vadd.f32 %v5106_v52, %v5105_v47  ;;  %v5108_v33 = vpop.f32.mrb[22].mxu1  ;;  %5281 = vmatprep.subr.bf16.mxu1 %v5709_v26 }
 0x160   :  { %v5109_v57 = vpop.f32.mrb[23].mxu1  ;;  %5282 = vmatpush3.bf16.msra.mxu1 %v5710_v37 }
 0x161   :  { %v5041_v19 = vpop.f32.mrb[20].mxu0  ;;  %v5110_v59 = vadd.f32 %v5109_v57, %v5108_v33  ;;  %5395 = vmatprep.subr.bf16.mxu1 %v5713_v5 }
 0x162   :  { %v5042_v62 = vpop.f32.mrb[21].mxu0 }
 0x163   :  { %v5043_v44 = vadd.f32 %v5042_v62, %v5041_v19  ;;  %v5044_v0 = vpop.f32.mrb[22].mxu0 }
 0x164   :  { %v5045_v32 = vpop.f32.mrb[23].mxu0 }
 0x165   :  { %v1985_v7 = vadd.f32 %v5043_v44, %v6739_v12  ;;  %v5046_v13 = vadd.f32 %v5045_v32, %v5044_v0 }
 0x167   :  { %v1988_v2 = vadd.f32 %v5046_v13, %v6739_v12  ;;  %v6839_v8 = vadd.f32 %v5107_v54, %v1985_v7 }
 0x169   :  { %v6847_v4 = vadd.f32 %v5110_v59, %v1988_v2 }
 0x16f   :  { %v5047_v21 = vpop.f32.mrb[24].mxu0 }
 0x170   :  { %v5048_v20 = vpop.f32.mrb[25].mxu0 }
 0x171   :  { %v5049_v28 = vadd.f32 %v5048_v20, %v5047_v21  ;;  %v5050_v23 = vpop.f32.mrb[26].mxu0 }
 0x172   :  { %v5111_v24 = vpop.f32.mrb[24].mxu1  ;;  %v5051_v9 = vpop.f32.mrb[27].mxu0 }
 0x173   :  { %v5112_v25 = vpop.f32.mrb[25].mxu1  ;;  %v1993_v48 = vadd.f32 %v5049_v28, %v6739_v12  ;;  %v5052_v27 = vadd.f32 %v5051_v9, %v5050_v23 }
 0x174   :  { %v5113_v55 = vadd.f32 %v5112_v25, %v5111_v24  ;;  %v5114_v35 = vpop.f32.mrb[26].mxu1 }
 0x175   :  { %v5115_v29 = vpop.f32.mrb[27].mxu1  ;;  %v1996_v38 = vadd.f32 %v5052_v27, %v6739_v12 }
 0x176   :  { %v6875_v39 = vadd.f32 %v5113_v55, %v1993_v48  ;;  %v5116_v42 = vadd.f32 %v5115_v29, %v5114_v35 }
 0x178   :  { %v6877_v43 = vadd.f32 %v5116_v42, %v1996_v38 }
 0x17e   :  { %v5053_v10 = vpop.f32.mrb[28].mxu0 }
 0x17f   :  { %v5054_v47 = vpop.f32.mrb[29].mxu0  ;;  %v5117_v52 = vpop.f32.mrb[28].mxu1 }
 0x180   :  { %v5055_v54 = vadd.f32 %v5054_v47, %v5053_v10  ;;  %v5056_v33 = vpop.f32.mrb[30].mxu0  ;;  %v5118_v56 = vpop.f32.mrb[29].mxu1 }
 0x181   :  { %v5057_v57 = vpop.f32.mrb[31].mxu0  ;;  %v5119_v31 = vadd.f32 %v5118_v56, %v5117_v52  ;;  %v5120_v19 = vpop.f32.mrb[30].mxu1 }
 0x182   :  { %v2001_v59 = vadd.f32 %v5055_v54, %v6739_v12  ;;  %v5058_v62 = vadd.f32 %v5057_v57, %v5056_v33  ;;  %v5121_v63 = vpop.f32.mrb[31].mxu1 }
 0x183   :  { %v5122_v1 = vadd.f32 %v5121_v63, %v5120_v19 }
 0x184   :  { %v2004_v44 = vadd.f32 %v5058_v62, %v6739_v12  ;;  %v6881_v0 = vadd.f32 %v5119_v31, %v2001_v59 }
 0x186   :  { %v6883_v3 = vadd.f32 %v5122_v1, %v2004_v44  ;;  %v5139_v32 = vpop.f32.mrb[32].mxu0 }
 0x187   :  { %v5140_v7 = vpop.f32.mrb[33].mxu0  ;;  %v5203_v13 = vpop.f32.mrb[32].mxu1 }
 0x188   :  { %v5141_v2 = vadd.f32 %v5140_v7, %v5139_v32  ;;  %v5142_v30 = vpop.f32.mrb[34].mxu0  ;;  %v5204_v11 = vpop.f32.mrb[33].mxu1 }
 0x189   :  { %v5143_v53 = vpop.f32.mrb[35].mxu0  ;;  %v5205_v14 = vadd.f32 %v5204_v11, %v5203_v13  ;;  %v5206_v16 = vpop.f32.mrb[34].mxu1 }
 0x18a   :  { %v2139_v12 = vadd.f32 %v5141_v2, %v6743_v18  ;;  %v5144_v6 = vadd.f32 %v5143_v53, %v5142_v30  ;;  %v5207_v41 = vpop.f32.mrb[35].mxu1  ;;  %v5724_v53 = vld [vmem:[%s7806_s2 + $0x1c0] sm:$0xff]  }
 0x18b   :  { %v5208_v21 = vadd.f32 %v5207_v41, %v5206_v16  ;;  %5459 = vmatprep.subr.bf16.mxu0 %v5724_v53 }
 0x18c   :  { %v2142_v50 = vadd.f32 %v5144_v6, %v6745_v15  ;;  %v6890_v20 = vadd.f32 %v5205_v14, %v2139_v12 }
 0x18e   :  { %v5145_v28 = vpop.f32.mrb[36].mxu0  ;;  %v6892_v23 = vadd.f32 %v5208_v21, %v2142_v50 }
 0x18f   :  { %v5146_v24 = vpop.f32.mrb[37].mxu0  ;;  %v5209_v9 = vpop.f32.mrb[36].mxu1 }
 0x190   :  { %v5147_v25 = vadd.f32 %v5146_v24, %v5145_v28  ;;  %v5148_v26 = vpop.f32.mrb[38].mxu0  ;;  %v5210_v48 = vpop.f32.mrb[37].mxu1 }
 0x191   :  { %v5149_v27 = vpop.f32.mrb[39].mxu0  ;;  %v5211_v55 = vadd.f32 %v5210_v48, %v5209_v9  ;;  %v5212_v35 = vpop.f32.mrb[38].mxu1 }
 0x192   :  { %v2147_v18 = vadd.f32 %v5147_v25, %v6755_v45  ;;  %v5150_v37 = vadd.f32 %v5149_v27, %v5148_v26  ;;  %v5213_v29 = vpop.f32.mrb[39].mxu1 }
 0x193   :  { %v5214_v38 = vadd.f32 %v5213_v29, %v5212_v35 }
 0x194   :  { %v2150_v15 = vadd.f32 %v5150_v37, %v6757_v40  ;;  %v6896_v42 = vadd.f32 %v5211_v55, %v2147_v18 }
 0x196   :  { %v5151_v10 = vpop.f32.mrb[40].mxu0  ;;  %v6898_v47 = vadd.f32 %v5214_v38, %v2150_v15 }
 0x197   :  { %v5152_v52 = vpop.f32.mrb[41].mxu0  ;;  %v5215_v54 = vpop.f32.mrb[40].mxu1 }
 0x198   :  { %v5153_v33 = vadd.f32 %v5152_v52, %v5151_v10  ;;  %v5154_v56 = vpop.f32.mrb[42].mxu0  ;;  %v5216_v57 = vpop.f32.mrb[41].mxu1 }
 0x199   :  { %v5155_v31 = vpop.f32.mrb[43].mxu0  ;;  %v5217_v19 = vadd.f32 %v5216_v57, %v5215_v54  ;;  %v5218_v59 = vpop.f32.mrb[42].mxu1 }
 0x19a   :  { %v2155_v45 = vadd.f32 %v5153_v33, %v6767_v60  ;;  %v5156_v62 = vadd.f32 %v5155_v31, %v5154_v56  ;;  %v5219_v63 = vpop.f32.mrb[43].mxu1 }
 0x19b   :  { %v5220_v1 = vadd.f32 %v5219_v63, %v5218_v59 }
 0x19c   :  { %v2158_v40 = vadd.f32 %v5156_v62, %v6769_v61  ;;  %v6902_v44 = vadd.f32 %v5217_v19, %v2155_v45 }
 0x19e   :  { %v5157_v32 = vpop.f32.mrb[44].mxu0  ;;  %v6904_v5 = vadd.f32 %v5220_v1, %v2158_v40 }
 0x19f   :  { %v5158_v7 = vpop.f32.mrb[45].mxu0  ;;  %v5221_v13 = vpop.f32.mrb[44].mxu1 }
 0x1a0   :  { %v5159_v2 = vadd.f32 %v5158_v7, %v5157_v32  ;;  %v5160_v30 = vpop.f32.mrb[46].mxu0  ;;  %v5222_v11 = vpop.f32.mrb[45].mxu1 }
 0x1a1   :  { %v5161_v60 = vpop.f32.mrb[47].mxu0  ;;  %v5223_v14 = vadd.f32 %v5222_v11, %v5221_v13  ;;  %v5224_v16 = vpop.f32.mrb[46].mxu1  ;;  %v6927_v13 = vld [vmem:[#allocation2] sm:$0xf]  ;;  %v6929_v11 = vld [vmem:[#allocation2 + $0x50] sm:$0xf] }
 0x1a2   :  { %v2163_v12 = vadd.f32 %v5159_v2, %v6785_v51  ;;  %v5162_v61 = vadd.f32 %v5161_v60, %v5160_v30  ;;  %v5225_v6 = vpop.f32.mrb[47].mxu1 }
 0x1a3   :  { %v5226_v41 = vadd.f32 %v5225_v6, %v5224_v16  ;;  %v6933_v6 = vld [vmem:[#allocation2 + $0x48] sm:$0xf] }
 0x1a4   :  { %v2166_v21 = vadd.f32 %v5162_v61, %v6790_v17  ;;  %v6911_v50 = vadd.f32 %v5223_v14, %v2163_v12  ;;  %v2780_v61 = vshrl.u32 %v6927_v13, 16 }
 0x1a6   :  { %v5163_v28 = vpop.f32.mrb[48].mxu0  ;;  %v6913_v24 = vadd.f32 %v5226_v41, %v2166_v21 }
 0x1a7   :  { %v5164_v9 = vpop.f32.mrb[49].mxu0  ;;  %v5227_v25 = vpop.f32.mrb[48].mxu1 }
 0x1a8   :  { %v5165_v26 = vadd.f32 %v5164_v9, %v5163_v28  ;;  %v5166_v48 = vpop.f32.mrb[50].mxu0  ;;  %v5228_v27 = vpop.f32.mrb[49].mxu1  ;;  %v3120_v9 = vshrl.u32 %v6929_v11, 16 }
 0x1a9   :  { %v5167_v55 = vpop.f32.mrb[51].mxu0  ;;  %v5229_v35 = vadd.f32 %v5228_v27, %v5227_v25  ;;  %v5230_v18 = vpop.f32.mrb[50].mxu1  ;;  %v3123_v25 = vshll.u32 %v6929_v11, 16 }
 0x1aa   :  { %v2171_v51 = vadd.f32 %v5165_v26, %v6815_v46  ;;  %v5168_v37 = vadd.f32 %v5167_v55, %v5166_v48  ;;  %v5231_v29 = vpop.f32.mrb[51].mxu1  ;;  %v2732_v55 = vld [vmem:[#allocation2 + $0x4] sm:$0x1] }
 0x1ab   :  { %v5232_v38 = vadd.f32 %v5231_v29, %v5230_v18  ;;  %v3042_v18 = vshll.u32 %v6933_v6, 16 }
 0x1ac   :  { %v2174_v17 = vadd.f32 %v5168_v37, %v6817_v49  ;;  %v6917_v15 = vadd.f32 %v5229_v35, %v2171_v51  ;;  %v3039_v35 = vshrl.u32 %v6933_v6, 16  ;;  %v2782_v51 = vrot.slane %v2780_v61, 4 }
 0x1ae   :  { %v5169_v10 = vpop.f32.mrb[52].mxu0  ;;  %v6919_v52 = vadd.f32 %v5232_v38, %v2174_v17  ;;  %v3122_v38 = vrot.slane %v3120_v9, 4  ;;  %v3125_v17 = vrot.slane %v3123_v25, 5  ;;  %v4861_v25 = vrot.slane %v6929_v11, 9 }
 0x1af   :  { %v5170_v54 = vpop.f32.mrb[53].mxu0  ;;  %v5233_v33 = vpop.f32.mrb[52].mxu1 }
 0x1b0   :  { %v5171_v56 = vadd.f32 %v5170_v54, %v5169_v10  ;;  %v5172_v57 = vpop.f32.mrb[54].mxu0  ;;  %v5234_v31 = vpop.f32.mrb[53].mxu1 }
 0x1b1   :  { %v5173_v19 = vpop.f32.mrb[55].mxu0  ;;  %v5235_v59 = vadd.f32 %v5234_v31, %v5233_v33  ;;  %v5236_v45 = vpop.f32.mrb[54].mxu1  ;;  %v4824_v33 = vrot.slane %v6927_v13, 9 }
 0x1b2   :  { %v2179_v46 = vadd.f32 %v5171_v56, %v6839_v8  ;;  %v5174_v62 = vadd.f32 %v5173_v19, %v5172_v57  ;;  %v5237_v63 = vpop.f32.mrb[55].mxu1  ;;  %v2921_v56 = vrot.slane %v2732_v55, 5  ;;  %v2789_v19 = vshll.u32 %v2732_v55, 16 }
 0x1b3   :  { %v5238_v1 = vadd.f32 %v5237_v63, %v5236_v45  ;;  %v3044_v45 = vrot.slane %v3042_v18, 5 }
 0x1b4   :  { %v2182_v49 = vadd.f32 %v5174_v62, %v6847_v4  ;;  %v6923_v40 = vadd.f32 %v5235_v59, %v2179_v46  ;;  %v2783_v4 = vshll.u32 %v6927_v13, 16  ;;  %v3041_v59 = vrot.slane %v3039_v35, 4 }
 0x1b6   :  { %v5175_v32 = vpop.f32.mrb[56].mxu0  ;;  %v6925_v7 = vadd.f32 %v5238_v1, %v2182_v49  ;;  %v2785_v37 = vrot.slane %v2783_v4, 5  ;;  %v3072_v49 = vld [vmem:[#allocation2 + $0x54] sm:$0x1] }
 0x1b7   :  { %v5176_v2 = vpop.f32.mrb[57].mxu0  ;;  %v5239_v30 = vpop.f32.mrb[56].mxu1 }
 0x1b8   :  { %v5177_v53 = vadd.f32 %v5176_v2, %v5175_v32  ;;  %v5178_v60 = vpop.f32.mrb[58].mxu0  ;;  %v5240_v14 = vpop.f32.mrb[57].mxu1  ;;  %v2786_v1 = vor.u32 %v2785_v37, %v2782_v51  ;;  %v3089_v32 = vld [vmem:[#allocation2 + $0x98] sm:$0xf]  ;;  %v3261_v51 = vrot.slane %v3072_v49, 5 }
 0x1b9   :  { %v5179_v8 = vpop.f32.mrb[59].mxu0  ;;  %v5241_v16 = vadd.f32 %v5240_v14, %v5239_v30  ;;  %v5242_v12 = vpop.f32.mrb[58].mxu1  ;;  %v3129_v14 = vshll.u32 %v3072_v49, 16 }
 0x1ba   :  { %v2187_v41 = vadd.f32 %v5177_v53, %v6875_v39  ;;  %v5180_v21 = vadd.f32 %v5179_v8, %v5178_v60  ;;  %v5243_v28 = vpop.f32.mrb[59].mxu1  ;;  %v3126_v60 = vor.u32 %v3125_v17, %v3122_v38  ;;  %v2750_v8 = vld [vmem:[#allocation2 + $0x4c] sm:$0x1]  ;;  %v6954_v9 = vrot.slane %v2786_v1, 4 }
 0x1bb   :  { %v5244_v26 = vadd.f32 %v5243_v28, %v5242_v12  ;;  %v6949_v12 = vsel %vm6055_vm11, %v4824_v33, %v2921_v56  ;;  %v3048_v61 = vshll.u32 %v2750_v8, 16  ;;  %v3379_v28 = vshrl.u32 %v3089_v32, 16 }
 0x1bc   :  { %v2190_v48 = vadd.f32 %v5180_v21, %v6877_v43  ;;  %v6939_v27 = vadd.f32 %v5241_v16, %v2187_v41  ;;  %v3045_v21 = vor.u32 %v3044_v45, %v3041_v59  ;;  %v6961_v35 = vrot.slane %v3126_v60, 4 }
 0x1bd   :  { %v6963_v18 = vrot.slane %v3129_v14, 5  ;;  %v6968_v38 = vrot.slane %v3048_v61, 5  ;;  %v4851_v17 = vrot.slane %v6933_v6, 9  ;;  %v6974_v56 = vrot.slane %v3379_v28, 4  ;;  %v2538_v61 = vld [vmem:[#allocation2 + $0x1c] sm:$0x1] }
 0x1be   :  { %v5181_v29 = vpop.f32.mrb[60].mxu0  ;;  %v6943_v39 = vadd.f32 %v5244_v26, %v2190_v48  ;;  %v3382_v26 = vshll.u32 %v3089_v32, 16  ;;  %v6972_v33 = vrot.slane %v3045_v21, 4 }
 0x1bf   :  { %v5182_v10 = vpop.f32.mrb[61].mxu0  ;;  %v5245_v54 = vpop.f32.mrb[60].mxu1 }
 0x1c0   :  { %v5183_v43 = vadd.f32 %v5182_v10, %v5181_v29  ;;  %v5184_v57 = vpop.f32.mrb[62].mxu0  ;;  %v5246_v31 = vpop.f32.mrb[61].mxu1  ;;  %v3062_v10 = vrot.slane %v2750_v8, 5  ;;  %v6977_v59 = vrot.slane %v3382_v26, 5 }
 0x1c1   :  { %v5185_v46 = vpop.f32.mrb[63].mxu0  ;;  %v5247_v62 = vadd.f32 %v5246_v31, %v5245_v54  ;;  %v5248_v63 = vpop.f32.mrb[62].mxu1 }
 0x1c2   :  { %v2195_v2 = vadd.f32 %v5183_v43, %v6881_v0  ;;  %v5186_v30 = vadd.f32 %v5185_v46, %v5184_v57  ;;  %v5249_v53 = vpop.f32.mrb[63].mxu1  ;;  %v6956_v0 = vrot.slane %v2789_v19, 5  ;;  %v4888_v43 = vrot.slane %v3089_v32, 9 }
 0x1c3   :  { %v5250_v16 = vadd.f32 %v5249_v53, %v5248_v63  ;;  %v6987_v46 = vsel %vm6055_vm11, %v4861_v25, %v3261_v51  ;;  %v6995_v1 = vsel %vm6055_vm11, %v4851_v17, %v3062_v10  ;;  %v3385_v60 = vor.u32 %v6977_v59, %v6974_v56 }
 0x1c4   :  { %v2198_v4 = vadd.f32 %v5186_v30, %v6883_v3  ;;  %v6952_v41 = vadd.f32 %v5247_v62, %v2195_v2  ;;  %v6965_v3 = vld [vmem:[#allocation2 + $0x9c] sm:$0x1] }
 0x1c5   :  { %v3388_v2 = vshll.u32 %v6965_v3, 16 }
 0x1c6   :  { %v5557_v48 = vpop.f32.mrb[64].mxu0  ;;  %v6959_v55 = vadd.f32 %v5250_v16, %v2198_v4  ;;  %v2535_v16 = vld [vmem:[#allocation2 + $0x18] sm:$0xf] }
 0x1c7   :  { %v2341_v37 = vadd.f32 %v5557_v48, %v6896_v42  ;;  %v2332_v29 = vpop.f32.mrb[65].mxu0  ;;  %v3402_v42 = vrot.slane %v6965_v3, 5  ;;  %v2523_v48 = vld [vmem:[#allocation2 + $0x8] sm:$0xf]  ;;  %v2550_v3 = vld [vmem:[#allocation2 + $0x2c] sm:$0x1] }
 0x1c8   :  { %v2333_v11 = vadd.f32 %v2332_v29, %v6890_v20  ;;  %v5558_v54 = vpop.f32.mrb[66].mxu0  ;;  %v2792_v20 = vsel %vm6070_vm13, %v6954_v9, %v6956_v0 }
 0x1c9   :  { %v2397_v57 = vmax.f32 %v2341_v37, 0.0  ;;  %v2344_v31 = vadd.f32 %v5558_v54, %v6898_v47  ;;  %v2335_v19 = vpop.f32.mrb[67].mxu0  ;;  %v3132_v47 = vsel %vm6070_vm13, %v6961_v35, %v6963_v18  ;;  %v7006_v14 = vsel %vm6055_vm11, %v4888_v43, %v3402_v42  ;;  %v5736_v18 = vld [vmem:[%s7806_s2 + $0x168] sm:$0xff]  }
 0x1ca   :  { %v2395_v45 = vmax.f32 %v2333_v11, 0.0  ;;  %v2336_v6 = vadd.f32 %v2335_v19, %v6892_v23  ;;  %v2526_v11 = vld [vmem:[#allocation2 + $0xc] sm:$0x1] }
 0x1cb   :  { %v4981_v62 = vpack.c.bf16 %v2397_v57, %v2397_v57  ;;  %v2398_v63 = vmax.f32 %v2344_v31, 0.0 }
 0x1cc   :  { %v4979_v23 = vpack.c.bf16 %v2395_v45, %v2395_v45  ;;  %v2396_v49 = vmax.f32 %v2336_v6, 0.0  ;;  %v2541_v6 = vld [vmem:[#allocation2 + $0x20] sm:$0xf] }
 0x1cd   :  { %v2460_v30 = vshrl.u32 %v4981_v62, 16  ;;  %v4982_v53 = vpack.c.bf16 %v2398_v63, %v2398_v63  ;;  %v2463_v8 = vshll.u32 %v4981_v62, 16 }
 0x1ce   :  { %v2444_v4 = vshrl.u32 %v4979_v23, 16  ;;  %v2447_v21 = vshll.u32 %v4979_v23, 16  ;;  %v4980_v28 = vpack.c.bf16 %v2396_v49, %v2396_v49  ;;  %v5561_v25 = vpop.f32.mrb[68].mxu0 }
 0x1cf   :  { %v2462_v26 = vrot.slane %v2460_v30, 7  ;;  %v2468_v51 = vshrl.u32 %v4982_v53, 16  ;;  %v2471_v37 = vshll.u32 %v4982_v53, 16  ;;  %v2357_v29 = vadd.f32 %v5561_v25, %v6911_v50  ;;  %v2348_v17 = vpop.f32.mrb[69].mxu0  ;;  %v2544_v30 = vld [vmem:[#allocation2 + $0x24] sm:$0x1] }
 0x1d0   :  { %v2446_v10 = vrot.slane %v2444_v4, 7  ;;  %v2452_v54 = vshrl.u32 %v4980_v28, 16  ;;  %v2455_v57 = vshll.u32 %v4980_v28, 16  ;;  %v2349_v43 = vadd.f32 %v2348_v17, %v6902_v44  ;;  %v5562_v31 = vpop.f32.mrb[70].mxu0  ;;  %v2529_v25 = vld [vmem:[#allocation2 + $0x10] sm:$0xf] }
 0x1d1   :  { %v2465_v19 = vor.u32 %v2463_v8, %v2462_v26  ;;  %v2466_v42 = vrot.slane %v2462_v26, 4  ;;  %v2470_v45 = vrot.slane %v2468_v51, 7  ;;  %v2401_v62 = vmax.f32 %v2357_v29, 0.0  ;;  %v2351_v63 = vpop.f32.mrb[71].mxu0  ;;  %v2532_v8 = vld [vmem:[#allocation2 + $0x14] sm:$0x1] }
 0x1d2   :  { %v2449_v23 = vor.u32 %v2447_v21, %v2446_v10  ;;  %v2450_v49 = vrot.slane %v2446_v10, 4  ;;  %v2454_v53 = vrot.slane %v2452_v54, 7  ;;  %v2399_v32 = vmax.f32 %v2349_v43, 0.0 }
 0x1d3   :  { %v2536_v50 = vsel %vm6029_vm8, %v2465_v19, %v2535_v16  ;;  %v2539_v4 = vsel %vm5989_vm2, %v2466_v42, %v2538_v61  ;;  %v2473_v28 = vor.u32 %v2471_v37, %v2470_v45  ;;  %v2474_v44 = vrot.slane %v2470_v45, 4 }
 0x1d4   :  { %2537 = vst [vmem:[#allocation2 + $0x18] sm:$0xf] %v2536_v50  ;;  %2540 = vst [vmem:[#allocation2 + $0x1c] sm:$0x1] %v2539_v4  ;;  %v2524_v26 = vsel %vm6029_vm8, %v2449_v23, %v2523_v48  ;;  %v2527_v21 = vsel %vm5989_vm2, %v2450_v49, %v2526_v11  ;;  %v2457_v51 = vor.u32 %v2455_v57, %v2454_v53  ;;  %v2458_v29 = vrot.slane %v2454_v53, 4 }
 0x1d5   :  { %2525 = vst [vmem:[#allocation2 + $0x8] sm:$0xf] %v2524_v26  ;;  %2528 = vst [vmem:[#allocation2 + $0xc] sm:$0x1] %v2527_v21  ;;  %v2542_v16 = vsel %vm6029_vm8, %v2473_v28, %v2541_v6  ;;  %v2545_v61 = vsel %vm5989_vm2, %v2474_v44, %v2544_v30  ;;  %v4985_v37 = vpack.c.bf16 %v2401_v62, %v2401_v62  ;;  %v2559_v6 = vld [vmem:[#allocation2 + $0x38] sm:$0xf] }
 0x1d6   :  { %v4983_v17 = vpack.c.bf16 %v2399_v32, %v2399_v32  ;;  %2543 = vst [vmem:[#allocation2 + $0x20] sm:$0xf] %v2542_v16  ;;  %2546 = vst [vmem:[#allocation2 + $0x24] sm:$0x1] %v2545_v61  ;;  %v2530_v48 = vsel %vm6029_vm8, %v2457_v51, %v2529_v25  ;;  %v2533_v10 = vsel %vm5989_vm2, %v2458_v29, %v2532_v8  ;;  %v5565_v57 = vpop.f32.mrb[72].mxu0  ;;  %v7030_v32 = vrot.slane %v3388_v2, 5 }
 0x1d7   :  { %v2360_v11 = vadd.f32 %v5562_v31, %v6913_v24  ;;  %v2352_v54 = vadd.f32 %v2351_v63, %v6904_v5  ;;  %2531 = vst [vmem:[#allocation2 + $0x10] sm:$0xf] %v2530_v48  ;;  %2534 = vst [vmem:[#allocation2 + $0x14] sm:$0x1] %v2533_v10  ;;  %v2492_v43 = vshrl.u32 %v4985_v37, 16  ;;  %v2495_v19 = vshll.u32 %v4985_v37, 16 }
 0x1d8   :  { %v2476_v42 = vshrl.u32 %v4983_v17, 16  ;;  %v2364_v45 = vpop.f32.mrb[73].mxu0  ;;  %v2373_v49 = vadd.f32 %v5565_v57, %v6923_v40  ;;  %v2562_v63 = vld [vmem:[#allocation2 + $0x3c] sm:$0x1]  ;;  %v2479_v53 = vshll.u32 %v4983_v17, 16 }
 0x1d9   :  { %v2402_v62 = vmax.f32 %v2360_v11, 0.0  ;;  %v2400_v23 = vmax.f32 %v2352_v54, 0.0  ;;  %v2365_v24 = vadd.f32 %v2364_v45, %v6917_v15  ;;  %v5566_v31 = vpop.f32.mrb[74].mxu0  ;;  %v2494_v5 = vrot.slane %v2492_v43, 7  ;;  %v2547_v28 = vld [vmem:[#allocation2 + $0x28] sm:$0xf] }
 0x1da   :  { %v2478_v30 = vrot.slane %v2476_v42, 7  ;;  %v7035_v50 = vadd.f32 %v5566_v31, %v6925_v7  ;;  %v2367_v4 = vpop.f32.mrb[75].mxu0  ;;  %v2405_v25 = vmax.f32 %v2373_v49, 0.0  ;;  %v2565_v10 = vld [vmem:[#allocation2 + $0x40] sm:$0xf] }
 0x1db   :  { %v4986_v2 = vpack.c.bf16 %v2402_v62, %v2402_v62  ;;  %v4984_v44 = vpack.c.bf16 %v2400_v23, %v2400_v23  ;;  %v2403_v8 = vmax.f32 %v2365_v24, 0.0  ;;  %v2497_v26 = vor.u32 %v2495_v19, %v2494_v5  ;;  %v2568_v11 = vld [vmem:[#allocation2 + $0x44] sm:$0x1]  ;;  %v2553_v62 = vld [vmem:[#allocation2 + $0x30] sm:$0xf] }
 0x1dc   :  { %v2498_v21 = vrot.slane %v2494_v5, 4  ;;  %v2481_v40 = vor.u32 %v2479_v53, %v2478_v30  ;;  %v2482_v51 = vrot.slane %v2478_v30, 4  ;;  %v7045_v54 = vld [vmem:[#allocation2 + $0x8] sm:$0xf]  ;;  %v4989_v19 = vpack.c.bf16 %v2405_v25, %v2405_v25  ;;  %v2556_v23 = vld [vmem:[#allocation2 + $0x34] sm:$0x1] }
 0x1dd   :  { %v2500_v15 = vshrl.u32 %v4986_v2, 16  ;;  %v2503_v29 = vshll.u32 %v4986_v2, 16  ;;  %v2484_v16 = vshrl.u32 %v4984_v44, 16  ;;  %v2487_v61 = vshll.u32 %v4984_v44, 16 }
 0x1de   :  { %v2560_v37 = vsel %vm6029_vm8, %v2497_v26, %v2559_v6  ;;  %v2563_v7 = vsel %vm5989_vm2, %v2498_v21, %v2562_v63  ;;  %v2548_v17 = vsel %vm6029_vm8, %v2481_v40, %v2547_v28  ;;  %v2551_v48 = vsel %vm5989_vm2, %v2482_v51, %v2550_v3  ;;  %v5569_v45 = vpop.f32.mrb[76].mxu0  ;;  %v7047_v6 = vld [vmem:[#allocation2 + $0x10] sm:$0xf]  ;;  %v2695_v40 = vld [vmem:[#allocation2 + $0x68] sm:$0xf] }
 0x1df   :  { %2561 = vst [vmem:[#allocation2 + $0x38] sm:$0xf] %v2560_v37  ;;  %2564 = vst [vmem:[#allocation2 + $0x3c] sm:$0x1] %v2563_v7  ;;  %v2502_v57 = vrot.slane %v2500_v15, 7  ;;  %v2486_v43 = vrot.slane %v2484_v16, 7  ;;  %v4987_v42 = vpack.c.bf16 %v2403_v8, %v2403_v8  ;;  %v2368_v24 = vadd.f32 %v2367_v4, %v6919_v52 }
 0x1e0   :  { %2549 = vst [vmem:[#allocation2 + $0x28] sm:$0xf] %v2548_v17  ;;  %2552 = vst [vmem:[#allocation2 + $0x2c] sm:$0x1] %v2551_v48  ;;  %v2406_v49 = vmax.f32 %v7035_v50, 0.0  ;;  %v2389_v31 = vadd.f32 %v5569_v45, %v6952_v41  ;;  %v2380_v5 = vpop.f32.mrb[77].mxu0  ;;  %v4836_v63 = vcombine.low %v7045_v54, %v7047_v6 }
 0x1e1   :  { %v2505_v30 = vor.u32 %v2503_v29, %v2502_v57  ;;  %v2506_v53 = vrot.slane %v2502_v57, 4  ;;  %v2489_v28 = vor.u32 %v2487_v61, %v2486_v43  ;;  %v2490_v3 = vrot.slane %v2486_v43, 4  ;;  %v5570_v2 = vpop.f32.mrb[78].mxu0  ;;  %v2698_v15 = vld [vmem:[#allocation2 + $0x6c] sm:$0x1] }
 0x1e2   :  { %v2620_v44 = vshrl.u32 %v4989_v19, 16  ;;  %v2623_v25 = vshll.u32 %v4989_v19, 16  ;;  %v2604_v8 = vshrl.u32 %v4987_v42, 16  ;;  %v2607_v26 = vshll.u32 %v4987_v42, 16  ;;  %v2383_v21 = vpop.f32.mrb[79].mxu0  ;;  %2981 = vst.msk [vmem:[#allocation3 + $0x18] sm:$0xff] %vm614_vm12, %v4836_v63 }
 0x1e3   :  { %v2566_v52 = vsel %vm6029_vm8, %v2505_v30, %v2565_v10  ;;  %v2569_v41 = vsel %vm5989_vm2, %v2506_v53, %v2568_v11  ;;  %v2554_v50 = vsel %vm6029_vm8, %v2489_v28, %v2553_v62  ;;  %v2557_v4 = vsel %vm5989_vm2, %v2490_v3, %v2556_v23  ;;  %v2683_v37 = vld [vmem:[#allocation2 + $0x58] sm:$0xf]  ;;  %v2686_v7 = vld [vmem:[#allocation2 + $0x5c] sm:$0x1]  ;;  %v2704_v3 = vld [vmem:[#allocation2 + $0x74] sm:$0x1] }
 0x1e4   :  { %2567 = vst [vmem:[#allocation2 + $0x40] sm:$0xf] %v2566_v52  ;;  %2570 = vst [vmem:[#allocation2 + $0x44] sm:$0x1] %v2569_v41  ;;  %v2622_v51 = vrot.slane %v2620_v44, 7  ;;  %v2606_v29 = vrot.slane %v2604_v8, 7  ;;  %v4990_v16 = vpack.c.bf16 %v2406_v49, %v2406_v49  ;;  %v2381_v48 = vadd.f32 %v2380_v5, %v6939_v27 }
 0x1e5   :  { %2555 = vst [vmem:[#allocation2 + $0x30] sm:$0xf] %v2554_v50  ;;  %2558 = vst [vmem:[#allocation2 + $0x34] sm:$0x1] %v2557_v4  ;;  %v2404_v61 = vmax.f32 %v2368_v24, 0.0  ;;  %v2409_v17 = vmax.f32 %v2389_v31, 0.0  ;;  %v2392_v10 = vadd.f32 %v5570_v2, %v6959_v55  ;;  %v2384_v11 = vadd.f32 %v2383_v21, %v6943_v39 }
 0x1e6   :  { %v2625_v57 = vor.u32 %v2623_v25, %v2622_v51  ;;  %v2626_v43 = vrot.slane %v2622_v51, 4  ;;  %v2609_v19 = vor.u32 %v2607_v26, %v2606_v29  ;;  %v2610_v42 = vrot.slane %v2606_v29, 4  ;;  %v2701_v55 = vld [vmem:[#allocation2 + $0x70] sm:$0xf]  ;;  %v2689_v41 = vld [vmem:[#allocation2 + $0x60] sm:$0xf] }
 0x1e7   :  { %v2628_v45 = vshrl.u32 %v4990_v16, 16  ;;  %v2631_v62 = vshll.u32 %v4990_v16, 16  ;;  %v4988_v23 = vpack.c.bf16 %v2404_v61, %v2404_v61  ;;  %v4993_v63 = vpack.c.bf16 %v2409_v17, %v2409_v17  ;;  %v2692_v4 = vld [vmem:[#allocation2 + $0x64] sm:$0x1]  ;;  %v7075_v61 = vld [vmem:[#allocation2 + $0xc] sm:$0x1] }
 0x1e8   :  { %v2696_v49 = vsel %vm6029_vm8, %v2625_v57, %v2695_v40  ;;  %v2699_v24 = vsel %vm5989_vm2, %v2626_v43, %v2698_v15  ;;  %v2684_v27 = vsel %vm6029_vm8, %v2609_v19, %v2683_v37  ;;  %v2687_v39 = vsel %vm5989_vm2, %v2610_v42, %v2686_v7  ;;  %v2719_v40 = vld [vmem:[#allocation2 + $0x88] sm:$0xf]  ;;  %v7081_v42 = vld [vmem:[#allocation2 + $0x20] sm:$0xf] }
 0x1e9   :  { %2697 = vst [vmem:[#allocation2 + $0x68] sm:$0xf] %v2696_v49  ;;  %2700 = vst [vmem:[#allocation2 + $0x6c] sm:$0x1] %v2699_v24  ;;  %v2630_v31 = vrot.slane %v2628_v45, 7  ;;  %v2612_v5 = vshrl.u32 %v4988_v23, 16 }
 0x1ea   :  { %2685 = vst [vmem:[#allocation2 + $0x58] sm:$0xf] %v2684_v27  ;;  %2688 = vst [vmem:[#allocation2 + $0x5c] sm:$0x1] %v2687_v39  ;;  %v2615_v30 = vshll.u32 %v4988_v23, 16  ;;  %v2652_v53 = vshrl.u32 %v4993_v63, 16 }
 0x1eb   :  { %v3414_v28 = vld [vmem:[#allocation3 + $0x18] sm:$0xff]  ;;  %v2655_v2 = vshll.u32 %v4993_v63, 16  ;;  %v2407_v44 = vmax.f32 %v2381_v48, 0.0  ;;  %v2410_v25 = vmax.f32 %v2392_v10, 0.0  ;;  %v2408_v8 = vmax.f32 %v2384_v11, 0.0 }
 0x1ec   :  { %4209 = vmatprep.mubr.bf16.mxu0 %v3414_v28  ;;  %v2633_v26 = vor.u32 %v2631_v62, %v2630_v31  ;;  %v2634_v21 = vrot.slane %v2630_v31, 4  ;;  %v2614_v52 = vrot.slane %v2612_v5, 7  ;;  %v2654_v50 = vrot.slane %v2652_v53, 7  ;;  %v2722_v10 = vld [vmem:[#allocation2 + $0x8c] sm:$0x1] }
 0x1ed   :  { %v4991_v51 = vpack.c.bf16 %v2407_v44, %v2407_v44  ;;  %v4994_v15 = vpack.c.bf16 %v2410_v25, %v2410_v25  ;;  %v4992_v29 = vpack.c.bf16 %v2408_v8, %v2408_v8  ;;  %v4825_v16 = vrot.slane %v7045_v54, 9  ;;  %v2707_v23 = vld [vmem:[#allocation2 + $0x78] sm:$0xf]  ;;  %v2725_v53 = vld [vmem:[#allocation2 + $0x90] sm:$0xf] }
 0x1ee   :  { %v2702_v37 = vsel %vm6029_vm8, %v2633_v26, %v2701_v55  ;;  %v2705_v7 = vsel %vm5989_vm2, %v2634_v21, %v2704_v3  ;;  %v2617_v17 = vor.u32 %v2615_v30, %v2614_v52  ;;  %v2618_v48 = vrot.slane %v2614_v52, 4  ;;  %v2710_v55 = vld [vmem:[#allocation2 + $0x7c] sm:$0x1]  ;;  %v7091_v5 = vld [vmem:[#allocation2 + $0x18] sm:$0xf] }
 0x1ef   :  { %2703 = vst [vmem:[#allocation2 + $0x70] sm:$0xf] %v2702_v37  ;;  %2706 = vst [vmem:[#allocation2 + $0x74] sm:$0x1] %v2705_v7  ;;  %v2657_v11 = vor.u32 %v2655_v2, %v2654_v50  ;;  %v2658_v57 = vrot.slane %v2654_v50, 4  ;;  %v2636_v43 = vshrl.u32 %v4991_v51, 16  ;;  %v4837_v2 = vcombine.low %v7091_v5, %v7081_v42 }
 0x1f0   :  { %v2639_v19 = vshll.u32 %v4991_v51, 16  ;;  %v2690_v45 = vsel %vm6029_vm8, %v2617_v17, %v2689_v41  ;;  %v2693_v62 = vsel %vm5989_vm2, %v2618_v48, %v2692_v4  ;;  %v2660_v63 = vshrl.u32 %v4994_v15, 16  ;;  %v2728_v8 = vld [vmem:[#allocation2 + $0x94] sm:$0x1]  ;;  %v2713_v50 = vld [vmem:[#allocation2 + $0x80] sm:$0xf] }
 0x1f1   :  { %v2663_v49 = vshll.u32 %v4994_v15, 16  ;;  %2691 = vst [vmem:[#allocation2 + $0x60] sm:$0xf] %v2690_v45  ;;  %2694 = vst [vmem:[#allocation2 + $0x64] sm:$0x1] %v2693_v62  ;;  %v2720_v24 = vsel %vm6029_vm8, %v2657_v11, %v2719_v40  ;;  %v2723_v27 = vsel %vm5989_vm2, %v2658_v57, %v2722_v10  ;;  %v2638_v39 = vrot.slane %v2636_v43, 7 }
 0x1f2   :  { %v2644_v31 = vshrl.u32 %v4992_v29, 16  ;;  %2721 = vst [vmem:[#allocation2 + $0x88] sm:$0xf] %v2720_v24  ;;  %2724 = vst [vmem:[#allocation2 + $0x8c] sm:$0x1] %v2723_v27  ;;  %v2662_v30 = vrot.slane %v2660_v63, 7 }
 0x1f3   :  { %v2647_v28 = vshll.u32 %v4992_v29, 16  ;;  %v2925_v3 = vrot.slane %v7075_v61, 5  ;;  %v2641_v44 = vor.u32 %v2639_v19, %v2638_v39  ;;  %v2642_v25 = vrot.slane %v2638_v39, 4  ;;  %v2716_v4 = vld [vmem:[#allocation2 + $0x84] sm:$0x1]  ;;  %2982 = vst.msk [vmem:[#allocation3 + $0x60] sm:$0xff] %vm614_vm12, %v4837_v2 }
 0x1f4   :  { %v2646_v26 = vrot.slane %v2644_v31, 7  ;;  %v2794_v21 = vshrl.u32 %v7045_v54, 16  ;;  %v2665_v52 = vor.u32 %v2663_v49, %v2662_v30  ;;  %v2666_v41 = vrot.slane %v2662_v30, 4  ;;  %v2736_v17 = vld [vmem:[#allocation2 + $0x14] sm:$0x1] }
 0x1f5   :  { %v7099_v40 = vsel %vm6055_vm11, %v4825_v16, %v2925_v3  ;;  %v2797_v51 = vshll.u32 %v7045_v54, 16  ;;  %v2708_v15 = vsel %vm6029_vm8, %v2641_v44, %v2707_v23  ;;  %v2711_v29 = vsel %vm5989_vm2, %v2642_v25, %v2710_v55  ;;  %v2738_v62 = vld [vmem:[#allocation2 + $0x1c] sm:$0x1]  ;;  %v7126_v30 = vld [vmem:[#allocation2 + $0x30] sm:$0xf] }
 0x1f6   :  { %v2649_v37 = vor.u32 %v2647_v28, %v2646_v26  ;;  %v2650_v7 = vrot.slane %v2646_v26, 4  ;;  %2709 = vst [vmem:[#allocation2 + $0x78] sm:$0xf] %v2708_v15  ;;  %2712 = vst [vmem:[#allocation2 + $0x7c] sm:$0x1] %v2711_v29  ;;  %v2726_v48 = vsel %vm6029_vm8, %v2665_v52, %v2725_v53  ;;  %v2729_v16 = vsel %vm5989_vm2, %v2666_v41, %v2728_v8 }
 0x1f7   :  { %v4832_v10 = vcombine.low %v6949_v12, %v7099_v40  ;;  %v2796_v11 = vrot.slane %v2794_v21, 4  ;;  %2727 = vst [vmem:[#allocation2 + $0x90] sm:$0xf] %v2726_v48  ;;  %2730 = vst [vmem:[#allocation2 + $0x94] sm:$0x1] %v2729_v16  ;;  %v2799_v19 = vrot.slane %v2797_v51, 5  ;;  %v4816_v12 = vcombine.low %v6927_v13, %v7045_v54 }
 0x1f8   :  { %v2714_v57 = vsel %vm6029_vm8, %v2649_v37, %v2713_v50  ;;  %v2717_v43 = vsel %vm5989_vm2, %v2650_v7, %v2716_v4  ;;  %v2803_v45 = vshll.u32 %v7075_v61, 16  ;;  %v2808_v23 = vshrl.u32 %v7047_v6, 16  ;;  %v7130_v8 = vld [vmem:[#allocation2 + $0x28] sm:$0xf]  ;;  %v2740_v50 = vld [vmem:[#allocation2 + $0x24] sm:$0x1] }
 0x1f9   :  { %2715 = vst [vmem:[#allocation2 + $0x80] sm:$0xf] %v2714_v57  ;;  %2718 = vst [vmem:[#allocation2 + $0x84] sm:$0x1] %v2717_v43  ;;  %v2811_v63 = vshll.u32 %v7047_v6, 16  ;;  %v2817_v58 = vshll.u32 %v2736_v17, 16  ;;  %v2800_v49 = vor.u32 %v2799_v19, %v2796_v11  ;;  %v4838_v41 = vcombine.low %v7130_v8, %v7126_v30 }
 0x1fa   :  { %2967 = vst.msk [vmem:[#allocation3 + $0x10] sm:$0xff] %vm614_vm12, %v4832_v10  ;;  %v2805_v24 = vrot.slane %v2803_v45, 5  ;;  %v2822_v34 = vshrl.u32 %v7091_v5, 16  ;;  %v2825_v27 = vshll.u32 %v7091_v5, 16  ;;  %2775 = vst.msk [vmem:[#allocation3] sm:$0xff] %vm614_vm12, %v4816_v12  ;;  %v2810_v61 = vrot.slane %v2808_v23, 4 }
 0x1fb   :  { %v2813_v39 = vrot.slane %v2811_v63, 5  ;;  %v2819_v55 = vrot.slane %v2817_v58, 5  ;;  %v2831_v31 = vshll.u32 %v2738_v62, 16  ;;  %v2801_v13 = vrot.slane %v2800_v49, 4  ;;  %v5726_v4 = vld [vmem:[%s7806_s2 + $0x180] sm:$0xff]   ;;  %v5727_v7 = vld [vmem:[%s7806_s2 + $0x1c8] sm:$0xff]  }
 0x1fc   :  { %v2824_v54 = vrot.slane %v2822_v34, 4  ;;  %v2827_v53 = vrot.slane %v2825_v27, 5  ;;  %v4826_v28 = vrot.slane %v7047_v6, 9  ;;  %v2929_v44 = vrot.slane %v2736_v17, 5  ;;  %2983 = vst.msk [vmem:[#allocation3 + $0xa8] sm:$0xff] %vm614_vm12, %v4838_v41  ;;  %v5728_v23 = vld [vmem:[%s7806_s2 + $0x188] sm:$0xff]  }
 0x1fd   :  { %v2814_v3 = vor.u32 %v2813_v39, %v2810_v61  ;;  %v2833_v2 = vrot.slane %v2831_v31, 5  ;;  %v4827_v25 = vrot.slane %v7091_v5, 9  ;;  %v2806_v26 = vsel %vm6070_vm13, %v2801_v13, %v2805_v24  ;;  %v2742_v10 = vld [vmem:[#allocation2 + $0x2c] sm:$0x1]  ;;  %v7172_v12 = vld [vmem:[#allocation2 + $0x40] sm:$0xf] }
 0x1fe   :  { %v2828_v21 = vor.u32 %v2827_v53, %v2824_v54  ;;  %v2933_v52 = vrot.slane %v2738_v62, 5  ;;  %v4820_v51 = vcombine.low %v2792_v20, %v2806_v26  ;;  %v7146_v29 = vsel %vm6055_vm11, %v4826_v28, %v2929_v44  ;;  %v3423_v20 = vld [vmem:[#allocation3 + $0x60] sm:$0xff]  ;;  %v5731_v34 = vld [vmem:[%s7806_s2 + $0x1d0] sm:$0xff]   ;;  %v7186_v31 = vld [vmem:[#allocation2 + $0x38] sm:$0xf] }
 0x1ff   :  { %v2815_v15 = vrot.slane %v2814_v3, 4  ;;  %v4817_v37 = vcombine.low %v7047_v6, %v7091_v5  ;;  %v2836_v9 = vshrl.u32 %v7081_v42, 16  ;;  %v2839_v0 = vshll.u32 %v7081_v42, 16  ;;  %v7193_v3 = vld [vmem:[#allocation2 + $0x34] sm:$0x1] }
 0x200   :  { %v2829_v48 = vrot.slane %v2828_v21, 4  ;;  %v7155_v16 = vsel %vm6055_vm11, %v4827_v25, %v2933_v52  ;;  %2907 = vst.msk [vmem:[#allocation3 + $0x8] sm:$0xff] %vm614_vm12, %v4820_v51  ;;  %v2845_v11 = vshll.u32 %v2740_v50, 16  ;;  %v2850_v57 = vshrl.u32 %v7130_v8, 16  ;;  %v5733_v21 = vld [vmem:[%s7806_s2 + $0x190] sm:$0xff]   ;;  %v5714_v52 = vld [vmem:[%s7806_s2 + $0x100] sm:$0xff]  }
 0x201   :  { %v3413_v17 = vld [vmem:[#allocation3 + $0x10] sm:$0xff]  ;;  %v2820_v6 = vsel %vm6070_vm13, %v2815_v15, %v2819_v55  ;;  %v4833_v5 = vcombine.low %v7146_v29, %v7155_v16  ;;  %2776 = vst.msk [vmem:[#allocation3 + $0x48] sm:$0xff] %vm614_vm12, %v4817_v37  ;;  %3034 = vst.msk [vmem:[#allocation3 + $0x30] sm:$0xff] %vm614_vm12, %v4817_v37  ;;  %v2838_v45 = vrot.slane %v2836_v9, 4  ;;  %v2841_v62 = vrot.slane %v2839_v0, 5  ;;  %v5716_v15 = vld [vmem:[%s7806_s2 + $0x148] sm:$0xff]  }
 0x202   :  { %4210 = vmatmul.mubr.bf16.vlgmr.msra.gmra.mrb[80].mxu0 %v3413_v17  ;;  %v7170_v43 = vsel %vm6070_vm13, %v2829_v48, %v2833_v2  ;;  %v4840_v19 = vcombine.low %v2806_v26, %v2820_v6  ;;  %v2847_v58 = vrot.slane %v2845_v11, 5  ;;  %v2852_v49 = vrot.slane %v2850_v57, 4  ;;  %v7227_v9 = vld [vmem:[#allocation2 + $0x60] sm:$0xf]  ;;  %v5734_v57 = vld [vmem:[%s7806_s2 + $0x1d8] sm:$0xff]  }
 0x203   :  { %4217 = vmatprep.mubr.bf16.mxu0 %v3423_v20  ;;  %5460 = vmatpush3.bf16.msra.mxu0 %v5726_v4  ;;  %v4821_v63 = vcombine.low %v2820_v6, %v7170_v43  ;;  %2968 = vst.msk [vmem:[#allocation3 + $0x58] sm:$0xff] %vm614_vm12, %v4833_v5  ;;  %3067 = vst.msk [vmem:[#allocation3 + $0x40] sm:$0xff] %vm614_vm12, %v4833_v5  ;;  %v2853_v24 = vshll.u32 %v7130_v8, 16  ;;  %v2842_v27 = vor.u32 %v2841_v62, %v2838_v45  ;;  %v2746_v4 = vld [vmem:[#allocation2 + $0x3c] sm:$0x1]  ;;  %v3411_v0 = vld [vmem:[#allocation3] sm:$0xff] }
 0x204   :  { %5461 = vmatprep.subr.bf16.mxu0 %v5727_v7  ;;  %3008 = vst.msk [vmem:[#allocation3 + $0x20] sm:$0xff] %vm614_vm12, %v4840_v19  ;;  %v2859_v61 = vshll.u32 %v2742_v10, 16  ;;  %v4828_v39 = vrot.slane %v7081_v42, 9  ;;  %v2937_v55 = vrot.slane %v2740_v50, 5  ;;  %v4829_v54 = vrot.slane %v7130_v8, 9  ;;  %v5717_v20 = vld [vmem:[%s7806_s2 + $0x108] sm:$0xff]  }
 0x205   :  { %2908 = vst.msk [vmem:[#allocation3 + $0x50] sm:$0xff] %vm614_vm12, %v4821_v63  ;;  %3055 = vst.msk [vmem:[#allocation3 + $0x38] sm:$0xff] %vm614_vm12, %v4821_v63  ;;  %v2855_v13 = vrot.slane %v2853_v24, 5  ;;  %v2941_v53 = vrot.slane %v2742_v10, 5  ;;  %v4839_v28 = vcombine.low %v7186_v31, %v7172_v12  ;;  %v2843_v2 = vrot.slane %v2842_v27, 4  ;;  %v5719_v45 = vld [vmem:[%s7806_s2 + $0x150] sm:$0xff]  }
 0x206   :  { %v2861_v44 = vrot.slane %v2859_v61, 5  ;;  %v7197_v25 = vsel %vm6055_vm11, %v4828_v39, %v2937_v55  ;;  %v4818_v26 = vcombine.low %v7081_v42, %v7130_v8  ;;  %v2864_v51 = vshrl.u32 %v7126_v30, 16  ;;  %v3432_v24 = vld [vmem:[#allocation3 + $0xa8] sm:$0xff]  ;;  %v7250_v55 = vld [vmem:[#allocation2 + $0x58] sm:$0xf] }
 0x207   :  { %5462 = vmatpush3.bf16.msra.mxu0 %v5728_v23  ;;  %v2856_v41 = vor.u32 %v2855_v13, %v2852_v49  ;;  %v7209_v50 = vsel %vm6055_vm11, %v4829_v54, %v2941_v53  ;;  %2984 = vst.msk [vmem:[#allocation3 + $0xf0] sm:$0xff] %vm614_vm12, %v4839_v28  ;;  %v2867_v42 = vshll.u32 %v7126_v30, 16  ;;  %v3412_v8 = vld [vmem:[#allocation3 + $0x8] sm:$0xff]  ;;  %v7219_v37 = vsel %vm6070_vm13, %v2843_v2, %v2847_v58  ;;  %v5735_v49 = vld [vmem:[%s7806_s2 + $0x198] sm:$0xff]   ;;  %v5738_v13 = vld [vmem:[%s7806_s2 + $0x1e0] sm:$0xff]  }
 0x208   :  { %5463 = vmatprep.subr.bf16.mxu0 %v5731_v34  ;;  %v4834_v7 = vcombine.low %v7197_v25, %v7209_v50  ;;  %2777 = vst.msk [vmem:[#allocation3 + $0x90] sm:$0xff] %vm614_vm12, %v4818_v26  ;;  %3035 = vst.msk [vmem:[#allocation3 + $0x78] sm:$0xff] %vm614_vm12, %v4818_v26  ;;  %v2873_v17 = vshll.u32 %v7193_v3, 16  ;;  %v2878_v48 = vshrl.u32 %v7186_v31, 16  ;;  %4112 = vmatprep.mubr.bf16.mxu1 %v3412_v8  ;;  %v2866_v5 = vrot.slane %v2864_v51, 4  ;;  %v3417_v36 = vld [vmem:[#allocation3 + $0x30] sm:$0xff] }
 0x209   :  { %v2857_v6 = vrot.slane %v2856_v41, 4  ;;  %v2869_v10 = vrot.slane %v2867_v42, 5  ;;  %v2881_v11 = vshll.u32 %v7186_v31, 16  ;;  %4113 = vmatmul.mubr.bf16.vlgmr.msra.gmra.mrb[64].mxu1 %v3411_v0  ;;  %v2887_v63 = vshll.u32 %v2746_v4, 16  ;;  %v3074_v26 = vld [vmem:[#allocation2 + $0x5c] sm:$0x1] }
 0x20a   :  { %v3422_v19 = vld [vmem:[#allocation3 + $0x58] sm:$0xff]  ;;  %2969 = vst.msk [vmem:[#allocation3 + $0xa0] sm:$0xff] %vm614_vm12, %v4834_v7  ;;  %3068 = vst.msk [vmem:[#allocation3 + $0x88] sm:$0xff] %vm614_vm12, %v4834_v7  ;;  %v2875_v62 = vrot.slane %v2873_v17, 5  ;;  %v2880_v23 = vrot.slane %v2878_v48, 4  ;;  %v4830_v58 = vrot.slane %v7126_v30, 9  ;;  %5396 = vmatpush3.bf16.msra.mxu1 %v5714_v52  ;;  %v4873_v41 = vcombine.low %v7250_v55, %v7227_v9 }
 0x20b   :  { %5464 = vmatpush3.bf16.msra.mxu0 %v5733_v21  ;;  %v7247_v34 = vsel %vm6070_vm13, %v2857_v6, %v2861_v44  ;;  %v2870_v27 = vor.u32 %v2869_v10, %v2866_v5  ;;  %v2883_v61 = vrot.slane %v2881_v11, 5  ;;  %v2945_v39 = vrot.slane %v7193_v3, 5  ;;  %5397 = vmatprep.subr.bf16.mxu1 %v5716_v15  ;;  %v7274_v15 = vld [vmem:[#allocation2 + $0x70] sm:$0xf]  ;;  %v5740_v7 = vld [vmem:[%s7806_s2 + $0x1a0] sm:$0xff]   ;;  %v5722_v0 = vld [vmem:[%s7806_s2 + $0x158] sm:$0xff]  }
 0x20c   :  { %4218 = vmatmul.mubr.bf16.gmra.mrb[84].mxu0 %v3422_v19  ;;  %v3421_v54 = vld [vmem:[#allocation3 + $0x50] sm:$0xff]  ;;  %v4822_v53 = vcombine.low %v7219_v37, %v7247_v34  ;;  %v2889_v28 = vrot.slane %v2887_v63, 5  ;;  %v4831_v2 = vrot.slane %v7186_v31, 9  ;;  %v2949_v44 = vrot.slane %v2746_v4, 5  ;;  %5465 = vmatprep.subr.bf16.mxu0 %v5734_v57  ;;  %3321 = vst.msk [vmem:[#allocation3 + $0x138] sm:$0xff] %vm614_vm12, %v4873_v41 }
 0x20d   :  { %4225 = vmatprep.mubr.bf16.mxu0 %v3432_v24  ;;  %4120 = vmatprep.mubr.bf16.mxu1 %v3421_v54  ;;  %v2871_v21 = vrot.slane %v2870_v27, 4  ;;  %v2884_v3 = vor.u32 %v2883_v61, %v2880_v23  ;;  %v7260_v52 = vsel %vm6055_vm11, %v4830_v58, %v2945_v39  ;;  %v4819_v4 = vcombine.low %v7126_v30, %v7186_v31  ;;  %v5720_v17 = vld [vmem:[%s7806_s2 + $0x110] sm:$0xff]   ;;  %v7297_v19 = vld [vmem:[#allocation2 + $0x64] sm:$0x1]  ;;  %v7308_v24 = vld [vmem:[#allocation2 + $0x6c] sm:$0x1] }
 0x20e   :  { %2909 = vst.msk [vmem:[#allocation3 + $0x98] sm:$0xff] %vm614_vm12, %v4822_v53  ;;  %3056 = vst.msk [vmem:[#allocation3 + $0x80] sm:$0xff] %vm614_vm12, %v4822_v53  ;;  %v7268_v51 = vsel %vm6055_vm11, %v4831_v2, %v2949_v44  ;;  %v3134_v42 = vshrl.u32 %v7250_v55, 16  ;;  %v3137_v8 = vshll.u32 %v7250_v55, 16  ;;  %5398 = vmatpush3.bf16.msra.mxu1 %v5717_v20  ;;  %v3143_v6 = vshll.u32 %v3074_v26, 16  ;;  %v5741_v27 = vld [vmem:[%s7806_s2 + $0x1e8] sm:$0xff]  }
 0x20f   :  { %5466 = vmatpush3.bf16.msra.mxu0 %v5735_v49  ;;  %v7284_v48 = vsel %vm6070_vm13, %v2871_v21, %v2875_v62  ;;  %v2885_v30 = vrot.slane %v2884_v3, 4  ;;  %v4835_v31 = vcombine.low %v7260_v52, %v7268_v51  ;;  %v7292_v20 = vld [vmem:[#allocation2 + $0x68] sm:$0xf]  ;;  %5399 = vmatprep.subr.bf16.mxu1 %v5719_v45  ;;  %2778 = vst.msk [vmem:[#allocation3 + $0xd8] sm:$0xff] %vm614_vm12, %v4819_v4  ;;  %3036 = vst.msk [vmem:[#allocation3 + $0xc0] sm:$0xff] %vm614_vm12, %v4819_v4  ;;  %v3441_v2 = vld [vmem:[#allocation3 + $0xf0] sm:$0xff] }
 0x210   :  { %5467 = vmatprep.subr.bf16.mxu0 %v5738_v13  ;;  %v3136_v5 = vrot.slane %v3134_v42, 4  ;;  %v3139_v10 = vrot.slane %v3137_v8, 5  ;;  %v4862_v11 = vrot.slane %v7250_v55, 9  ;;  %v3265_v57 = vrot.slane %v3074_v26, 5  ;;  %v3420_v62 = vld [vmem:[#allocation3 + $0x48] sm:$0xff]  ;;  %v5723_v13 = vld [vmem:[%s7806_s2 + $0x118] sm:$0xff]  }
 0x211   :  { %v7301_v23 = vsel %vm6070_vm13, %v2885_v30, %v2889_v28  ;;  %2970 = vst.msk [vmem:[#allocation3 + $0xe8] sm:$0xff] %vm614_vm12, %v4835_v31  ;;  %3069 = vst.msk [vmem:[#allocation3 + $0xd0] sm:$0xff] %vm614_vm12, %v4835_v31  ;;  %v3145_v45 = vrot.slane %v3143_v6, 5  ;;  %v4874_v63 = vcombine.low %v7292_v20, %v7274_v15  ;;  %v5761_v58 = vld [vmem:[#allocation2 + $0x50] sm:$0xf]  ;;  %4121 = vmatmul.mubr.bf16.gmra.mrb[68].mxu1 %v3420_v62  ;;  %v3431_v61 = vld [vmem:[#allocation3 + $0xa0] sm:$0xff] }
 0x212   :  { %v4853_v49 = vcombine.low %v5761_v58, %v7250_v55  ;;  %v4823_v39 = vcombine.low %v7284_v48, %v7301_v23  ;;  %v3140_v54 = vor.u32 %v3139_v10, %v3136_v5  ;;  %v7320_v53 = vsel %vm6055_vm11, %v4862_v11, %v3265_v57  ;;  %v5742_v28 = vld [vmem:[%s7806_s2 + $0x1a8] sm:$0xff]   ;;  %5400 = vmatpush3.bf16.msra.mxu1 %v5720_v17  ;;  %v5729_v26 = vld [vmem:[%s7806_s2 + $0x160] sm:$0xff]   ;;  %v5745_v4 = vld [vmem:[%s7806_s2 + $0x1f0] sm:$0xff]  }
 0x213   :  { %v3148_v55 = vshrl.u32 %v7227_v9, 16  ;;  %5468 = vmatpush3.bf16.msra.mxu0 %v5740_v7  ;;  %v4869_v44 = vcombine.low %v6987_v46, %v7320_v53  ;;  %3322 = vst.msk [vmem:[#allocation3 + $0x180] sm:$0xff] %vm614_vm12, %v4874_v63  ;;  %v3151_v21 = vshll.u32 %v7227_v9, 16  ;;  %v3157_v3 = vshll.u32 %v7297_v19, 16  ;;  %5401 = vmatprep.subr.bf16.mxu1 %v5722_v0  ;;  %v7343_v17 = vld [vmem:[#allocation2 + $0x80] sm:$0xf] }
 0x214   :  { %4226 = vmatmul.mubr.bf16.gmra.mrb[88].mxu0 %v3431_v61  ;;  %3115 = vst.msk [vmem:[#allocation3 + $0x120] sm:$0xff] %vm614_vm12, %v4853_v49  ;;  %v3162_v41 = vshrl.u32 %v7292_v20, 16  ;;  %2910 = vst.msk [vmem:[#allocation3 + $0xe0] sm:$0xff] %vm614_vm12, %v4823_v39  ;;  %v3141_v46 = vrot.slane %v3140_v54, 4  ;;  %v3165_v8 = vshll.u32 %v7292_v20, 16  ;;  %v3171_v7 = vshll.u32 %v7308_v24, 16  ;;  %5469 = vmatprep.subr.bf16.mxu0 %v5741_v27 }
 0x215   :  { %4233 = vmatprep.mubr.bf16.mxu0 %v3441_v2  ;;  %3057 = vst.msk [vmem:[#allocation3 + $0xc8] sm:$0xff] %vm614_vm12, %v4823_v39  ;;  %v3150_v42 = vrot.slane %v3148_v55, 4  ;;  %v3430_v30 = vld [vmem:[#allocation3 + $0x98] sm:$0xff]  ;;  %3307 = vst.msk [vmem:[#allocation3 + $0x130] sm:$0xff] %vm614_vm12, %v4869_v44  ;;  %v3153_v31 = vrot.slane %v3151_v21, 5  ;;  %v3159_v6 = vrot.slane %v3157_v3, 5 }
 0x216   :  { %v3164_v5 = vrot.slane %v3162_v41, 4  ;;  %v4863_v10 = vrot.slane %v7227_v9, 9  ;;  %4128 = vmatprep.mubr.bf16.mxu1 %v3430_v30  ;;  %v7349_v0 = vsel %vm6070_vm13, %v3141_v46, %v3145_v45  ;;  %v5730_v11 = vld [vmem:[%s7806_s2 + $0x120] sm:$0xff]   ;;  %v3167_v57 = vrot.slane %v3165_v8, 5  ;;  %v5746_v58 = vld [vmem:[%s7806_s2 + $0x1b0] sm:$0xff]   ;;  %5402 = vmatpush3.bf16.msra.mxu1 %v5723_v13  ;;  %v5748_v46 = vld [vmem:[%s7806_s2 + $0x1b8] sm:$0xff]  }
 0x217   :  { %v3173_v62 = vrot.slane %v3171_v7, 5  ;;  %v3269_v63 = vrot.slane %v7297_v19, 5  ;;  %5470 = vmatpush3.bf16.msra.mxu0 %v5742_v28  ;;  %v4857_v45 = vcombine.low %v3132_v47, %v7349_v0  ;;  %v3154_v49 = vor.u32 %v3153_v31, %v3150_v42  ;;  %v7366_v39 = vld [vmem:[#allocation2 + $0x78] sm:$0xf]  ;;  %v7368_v19 = vld [vmem:[#allocation2 + $0x74] sm:$0x1]  ;;  %5403 = vmatprep.subr.bf16.mxu1 %v5729_v26 }
 0x218   :  { %v4864_v27 = vrot.slane %v7292_v20, 9  ;;  %v3273_v61 = vrot.slane %v7308_v24, 5  ;;  %5471 = vmatprep.subr.bf16.mxu0 %v5745_v4  ;;  %v3168_v54 = vor.u32 %v3167_v57, %v3164_v5  ;;  %v4875_v35 = vcombine.low %v7366_v39, %v7343_v17  ;;  %v5747_v24 = vld [vmem:[%s7806_s2 + $0x1f8] sm:$0xff]   ;;  %v3429_v55 = vld [vmem:[#allocation3 + $0x90] sm:$0xff]  ;;  %v3440_v3 = vld [vmem:[#allocation3 + $0xe8] sm:$0xff] }
 0x219   :  { %v7372_v13 = vsel %vm6055_vm11, %v4863_v10, %v3269_v63  ;;  %v4854_v47 = vcombine.low %v7227_v9, %v7292_v20  ;;  %3247 = vst.msk [vmem:[#allocation3 + $0x128] sm:$0xff] %vm614_vm12, %v4857_v45  ;;  %v3155_v28 = vrot.slane %v3154_v49, 4  ;;  %v3082_v44 = vld [vmem:[#allocation2 + $0x7c] sm:$0x1]  ;;  %v3176_v26 = vshrl.u32 %v7274_v15, 16  ;;  %4129 = vmatmul.mubr.bf16.gmra.mrb[72].mxu1 %v3429_v55  ;;  %v5737_v30 = vld [vmem:[%s7806_s2 + $0x128] sm:$0xff]  }
 0x21a   :  { %v7387_v2 = vsel %vm6055_vm11, %v4864_v27, %v3273_v61  ;;  %v3179_v21 = vshll.u32 %v7274_v15, 16  ;;  %v3169_v9 = vrot.slane %v3168_v54, 4  ;;  %3323 = vst.msk [vmem:[#allocation3 + $0x1c8] sm:$0xff] %vm614_vm12, %v4875_v35  ;;  %v3185_v41 = vshll.u32 %v7368_v19, 16  ;;  %v3450_v8 = vld [vmem:[#allocation3 + $0x138] sm:$0xff]  ;;  %5404 = vmatpush3.bf16.msra.mxu1 %v5730_v11  ;;  %v5743_v45 = vld [vmem:[%s7806_s2 + $0x170] sm:$0xff]  }
 0x21b   :  { %v4870_v20 = vcombine.low %v7372_v13, %v7387_v2  ;;  %3116 = vst.msk [vmem:[#allocation3 + $0x168] sm:$0xff] %vm614_vm12, %v4854_v47  ;;  %3374 = vst.msk [vmem:[#allocation3 + $0x150] sm:$0xff] %vm614_vm12, %v4854_v47  ;;  %v3190_v4 = vshrl.u32 %v7366_v39, 16  ;;  %5472 = vmatpush3.bf16.msra.mxu0 %v5746_v58  ;;  %v3439_v42 = vld [vmem:[#allocation3 + $0xe0] sm:$0xff]  ;;  %v7403_v7 = vsel %vm6070_vm13, %v3155_v28, %v3159_v6  ;;  %v3178_v31 = vrot.slane %v3176_v26, 4 }
 0x21c   :  { %4234 = vmatmul.mubr.bf16.gmra.mrb[92].mxu0 %v3440_v3  ;;  %v3181_v5 = vrot.slane %v3179_v21, 5  ;;  %v3193_v10 = vshll.u32 %v7366_v39, 16  ;;  %4136 = vmatprep.mubr.bf16.mxu1 %v3439_v42  ;;  %v7411_v57 = vsel %vm6070_vm13, %v3169_v9, %v3173_v62  ;;  %v3187_v6 = vrot.slane %v3185_v41, 5  ;;  %v7415_v58 = vld [vmem:[#allocation2 + $0x90] sm:$0xf] }
 0x21d   :  { %4241 = vmatprep.mubr.bf16.mxu0 %v3450_v8  ;;  %3308 = vst.msk [vmem:[#allocation3 + $0x178] sm:$0xff] %vm614_vm12, %v4870_v20  ;;  %3407 = vst.msk [vmem:[#allocation3 + $0x160] sm:$0xff] %vm614_vm12, %v4870_v20  ;;  %v3192_v11 = vrot.slane %v3190_v4, 4  ;;  %v3199_v63 = vshll.u32 %v3082_v44, 16  ;;  %v4858_v49 = vcombine.low %v7403_v7, %v7411_v57  ;;  %5405 = vmatprep.subr.bf16.mxu1 %v5736_v18  ;;  %v4865_v61 = vrot.slane %v7274_v15, 9  ;;  %v5744_v9 = vld [vmem:[%s7806_s2 + $0x130] sm:$0xff]  }
 0x21e   :  { %v3182_v27 = vor.u32 %v3181_v5, %v3178_v31  ;;  %v3195_v62 = vrot.slane %v3193_v10, 5  ;;  %v7423_v54 = vld [vmem:[#allocation2 + $0x88] sm:$0xf]  ;;  %5473 = vmatprep.subr.bf16.mxu0 %v5747_v24  ;;  %v3277_v47 = vrot.slane %v7368_v19, 5  ;;  %v4866_v55 = vrot.slane %v7366_v39, 9  ;;  %5406 = vmatpush3.bf16.msra.mxu1 %v5737_v30  ;;  %v5749_v30 = vld [vmem:[%s7806_s2 + $0x178] sm:$0xff]  }
 0x21f   :  { %v3201_v35 = vrot.slane %v3199_v63, 5  ;;  %v3281_v28 = vrot.slane %v3082_v44, 5  ;;  %v7427_v26 = vld [vmem:[#allocation2 + $0x84] sm:$0x1]  ;;  %5474 = vmatpush3.bf16.msra.mxu0 %v5748_v46  ;;  %3248 = vst.msk [vmem:[#allocation3 + $0x170] sm:$0xff] %vm614_vm12, %v4858_v49  ;;  %3395 = vst.msk [vmem:[#allocation3 + $0x158] sm:$0xff] %vm614_vm12, %v4858_v49  ;;  %v4876_v3 = vcombine.low %v7423_v54, %v7415_v58  ;;  %v4855_v24 = vcombine.low %v7274_v15, %v7366_v39 }
 0x220   :  { %v3183_v18 = vrot.slane %v3182_v27, 4  ;;  %v3196_v21 = vor.u32 %v3195_v62, %v3192_v11  ;;  %v7437_v19 = vsel %vm6055_vm11, %v4865_v61, %v3277_v47  ;;  %5407 = vmatprep.subr.bf16.mxu1 %v5743_v45  ;;  %v3086_v20 = vld [vmem:[#allocation2 + $0x8c] sm:$0x1]  ;;  %v3204_v41 = vshrl.u32 %v7343_v17, 16  ;;  %v3438_v46 = vld [vmem:[#allocation3 + $0xd8] sm:$0xff]  ;;  %v3449_v5 = vld [vmem:[#allocation3 + $0x130] sm:$0xff] }
 0x221   :  { %v7441_v44 = vsel %vm6055_vm11, %v4866_v55, %v3281_v28  ;;  %v3207_v4 = vshll.u32 %v7343_v17, 16  ;;  %3324 = vst.msk [vmem:[#allocation3 + $0x210] sm:$0xff] %vm614_vm12, %v4876_v3  ;;  %3117 = vst.msk [vmem:[#allocation3 + $0x1b0] sm:$0xff] %vm614_vm12, %v4855_v24  ;;  %v3213_v8 = vshll.u32 %v7427_v26, 16  ;;  %4137 = vmatmul.mubr.bf16.gmra.mrb[76].mxu1 %v3438_v46  ;;  %v3448_v31 = vld [vmem:[#allocation3 + $0x128] sm:$0xff]  ;;  %v3218_v11 = vshrl.u32 %v7423_v54, 16 }
 0x222   :  { %v7450_v15 = vsel %vm6070_vm13, %v3183_v18, %v3187_v6  ;;  %v3197_v39 = vrot.slane %v3196_v21, 4  ;;  %v4871_v42 = vcombine.low %v7437_v19, %v7441_v44  ;;  %3375 = vst.msk [vmem:[#allocation3 + $0x198] sm:$0xff] %vm614_vm12, %v4855_v24  ;;  %v3206_v10 = vrot.slane %v3204_v41, 4  ;;  %4144 = vmatprep.mubr.bf16.mxu1 %v3448_v31  ;;  %v3459_v45 = vld [vmem:[#allocation3 + $0x180] sm:$0xff]  ;;  %5408 = vmatpush3.bf16.msra.mxu1 %v5744_v9 }
 0x223   :  { %v3209_v6 = vrot.slane %v3207_v4, 5  ;;  %v3221_v63 = vshll.u32 %v7423_v54, 16  ;;  %v3215_v27 = vrot.slane %v3213_v8, 5  ;;  %v3227_v62 = vshll.u32 %v3086_v20, 16  ;;  %5409 = vmatprep.subr.bf16.mxu1 %v5749_v30  ;;  %v7480_v4 = vld [vmem:[%s7806_s2 + $0x200] sm:$0xff]  }
 0x224   :  { %4242 = vmatmul.mubr.bf16.gmra.mrb[96].mxu0 %v3449_v5  ;;  %v7465_v49 = vsel %vm6070_vm13, %v3197_v39, %v3201_v35  ;;  %3309 = vst.msk [vmem:[#allocation3 + $0x1c0] sm:$0xff] %vm614_vm12, %v4871_v42  ;;  %3408 = vst.msk [vmem:[#allocation3 + $0x1a8] sm:$0xff] %vm614_vm12, %v4871_v42  ;;  %v4867_v61 = vrot.slane %v7343_v17, 9  ;;  %v3220_v28 = vrot.slane %v3218_v11, 4  ;;  %v5750_v35 = vld [vmem:[%s7806_s2 + $0x138] sm:$0xff]   ;;  %v3285_v3 = vrot.slane %v7427_v26, 5 }
 0x225   :  { %4249 = vmatprep.mubr.bf16.mxu0 %v3459_v45  ;;  %v4859_v47 = vcombine.low %v7450_v15, %v7465_v49  ;;  %v3210_v55 = vor.u32 %v3209_v6, %v3206_v10  ;;  %v3223_v18 = vrot.slane %v3221_v63, 5  ;;  %v3229_v21 = vrot.slane %v3227_v62, 5  ;;  %v2748_v42 = vld [vmem:[#allocation2 + $0x44] sm:$0x1]  ;;  %v3458_v6 = vld [vmem:[#allocation3 + $0x178] sm:$0xff] }
 0x226   :  { %v4868_v24 = vrot.slane %v7423_v54, 9  ;;  %v3289_v41 = vrot.slane %v3086_v20, 5  ;;  %v4856_v39 = vcombine.low %v7343_v17, %v7423_v54  ;;  %v4845_v26 = vcombine.low %v7099_v40, %v7146_v29  ;;  %5410 = vmatpush3.bf16.msra.mxu1 %v5750_v35  ;;  %v3457_v10 = vld [vmem:[#allocation3 + $0x170] sm:$0xff]  ;;  %v5762_v63 = vld [vmem:[#allocation2 + $0x48] sm:$0xf] }
 0x227   :  { %3249 = vst.msk [vmem:[#allocation3 + $0x1b8] sm:$0xff] %vm614_vm12, %v4859_v47  ;;  %3396 = vst.msk [vmem:[#allocation3 + $0x1a0] sm:$0xff] %vm614_vm12, %v4859_v47  ;;  %v3211_v9 = vrot.slane %v3210_v55, 4  ;;  %v3224_v46 = vor.u32 %v3223_v18, %v3220_v28  ;;  %v7490_v20 = vsel %vm6055_vm11, %v4867_v61, %v3285_v3  ;;  %v4846_v30 = vcombine.low %v7155_v16, %v7197_v25  ;;  %v3447_v25 = vld [vmem:[#allocation3 + $0x120] sm:$0xff]  ;;  %v3088_v18 = vld [vmem:[#allocation2 + $0x94] sm:$0x1] }
 0x228   :  { %v7494_v8 = vsel %vm6055_vm11, %v4868_v24, %v3289_v41  ;;  %v4841_v31 = vcombine.low %v7170_v43, %v7219_v37  ;;  %3118 = vst.msk [vmem:[#allocation3 + $0x1f8] sm:$0xff] %vm614_vm12, %v4856_v39  ;;  %3376 = vst.msk [vmem:[#allocation3 + $0x1e0] sm:$0xff] %vm614_vm12, %v4856_v39  ;;  %v4847_v16 = vcombine.low %v7209_v50, %v7260_v52  ;;  %5571 = vmatprep.subr.bf16.mxu1 %v7480_v4  ;;  %v3456_v24 = vld [vmem:[#allocation3 + $0x168] sm:$0xff]  ;;  %v3477_v22 = vld [vmem:[#allocation3 + $0x210] sm:$0xff] }
 0x229   :  { %v7502_v17 = vsel %vm6070_vm13, %v3211_v9, %v3215_v27  ;;  %v3225_v40 = vrot.slane %v3224_v46, 4  ;;  %v4872_v29 = vcombine.low %v7490_v20, %v7494_v8  ;;  %3026 = vst.msk [vmem:[#allocation3 + $0x28] sm:$0xff] %vm614_vm12, %v4845_v26  ;;  %3027 = vst.msk [vmem:[#allocation3 + $0x70] sm:$0xff] %vm614_vm12, %v4846_v30  ;;  %v2986_v43 = vshrl.u32 %v7172_v12, 16  ;;  %4145 = vmatmul.mubr.bf16.gmra.mrb[80].mxu1 %v3447_v25 }
 0x22a   :  { %3009 = vst.msk [vmem:[#allocation3 + $0x68] sm:$0xff] %vm614_vm12, %v4841_v31  ;;  %v2989_v37 = vshll.u32 %v7172_v12, 16  ;;  %v2995_v54 = vshll.u32 %v2748_v42, 16  ;;  %v4842_v5 = vcombine.low %v7247_v34, %v7284_v48  ;;  %3028 = vst.msk [vmem:[#allocation3 + $0xb8] sm:$0xff] %vm614_vm12, %v4847_v16  ;;  %v4844_v52 = vrot.slane %v7172_v12, 9  ;;  %4152 = vmatprep.mubr.bf16.mxu1 %v3457_v10  ;;  %v3468_v34 = vld [vmem:[#allocation3 + $0x1c8] sm:$0xff] }
 0x22b   :  { %v7520_v50 = vsel %vm6070_vm13, %v3225_v40, %v3229_v21  ;;  %3310 = vst.msk [vmem:[#allocation3 + $0x208] sm:$0xff] %vm614_vm12, %v4872_v29  ;;  %3409 = vst.msk [vmem:[#allocation3 + $0x1f0] sm:$0xff] %vm614_vm12, %v4872_v29  ;;  %v3015_v11 = vrot.slane %v2748_v42, 5  ;;  %v4849_v45 = vcombine.low %v7172_v12, %v5762_v63  ;;  %v2988_v27 = vrot.slane %v2986_v43, 4  ;;  %v3467_v39 = vld [vmem:[#allocation3 + $0x1c0] sm:$0xff]  ;;  %v3426_v10 = vld [vmem:[#allocation3 + $0x78] sm:$0xff] }
 0x22c   :  { %4250 = vmatmul.mubr.bf16.gmra.mrb[100].mxu0 %v3458_v6  ;;  %v4860_v48 = vcombine.low %v7502_v17, %v7520_v50  ;;  %v2991_v62 = vrot.slane %v2989_v37, 5  ;;  %3010 = vst.msk [vmem:[#allocation3 + $0xb0] sm:$0xff] %vm614_vm12, %v4842_v5  ;;  %v3386_v61 = vrot.slane %v3385_v60, 4  ;;  %v4882_v12 = vcombine.low %v7320_v53, %v7372_v13  ;;  %v3427_v43 = vld [vmem:[#allocation3 + $0x80] sm:$0xff]  ;;  %v5752_v37 = vld [vmem:[%s7806_s2 + $0x208] sm:$0xff]  }
 0x22d   :  { %4257 = vmatprep.mubr.bf16.mxu0 %v3468_v34  ;;  %v3016_v47 = vsel %vm6055_vm11, %v4844_v52, %v3015_v11  ;;  %3037 = vst.msk [vmem:[#allocation3 + $0x108] sm:$0xff] %vm614_vm12, %v4849_v45  ;;  %v4877_v55 = vcombine.low %v7349_v0, %v7403_v7  ;;  %v4883_v28 = vcombine.low %v7387_v2, %v7437_v19  ;;  %v2997_v13 = vrot.slane %v2995_v54, 5  ;;  %v3415_v54 = vld [vmem:[#allocation3 + $0x20] sm:$0xff]  ;;  %v3436_v6 = vld [vmem:[#allocation3 + $0xc8] sm:$0xff]  ;;  %v5754_v52 = vld [vmem:[%s7806_s2 + $0x218] sm:$0xff]  }
 0x22e   :  { %3250 = vst.msk [vmem:[#allocation3 + $0x200] sm:$0xff] %vm614_vm12, %v4860_v48  ;;  %3397 = vst.msk [vmem:[#allocation3 + $0x1e8] sm:$0xff] %vm614_vm12, %v4860_v48  ;;  %v2992_v56 = vor.u32 %v2991_v62, %v2988_v27  ;;  %v4848_v59 = vcombine.low %v7268_v51, %v3016_v47  ;;  %v4878_v60 = vcombine.low %v7411_v57, %v7450_v15  ;;  %v3326_v0 = vshrl.u32 %v7415_v58, 16  ;;  %v3466_v46 = vld [vmem:[#allocation3 + $0x1b8] sm:$0xff]  ;;  %v5755_v34 = vld [vmem:[%s7806_s2 + $0x220] sm:$0xff]  }
 0x22f   :  { %v4884_v53 = vcombine.low %v7441_v44, %v7490_v20  ;;  %3366 = vst.msk [vmem:[#allocation3 + $0x148] sm:$0xff] %vm614_vm12, %v4882_v12  ;;  %3348 = vst.msk [vmem:[#allocation3 + $0x140] sm:$0xff] %vm614_vm12, %v4877_v55  ;;  %v3329_v2 = vshll.u32 %v7415_v58, 16  ;;  %v4879_v51 = vcombine.low %v7465_v49, %v7502_v17  ;;  %v4881_v57 = vrot.slane %v7415_v58, 9  ;;  %v5763_v44 = vld [vmem:[#allocation2 + $0x98] sm:$0xf] }
 0x230   :  { %3367 = vst.msk [vmem:[#allocation3 + $0x190] sm:$0xff] %vm614_vm12, %v4883_v28  ;;  %v2993_v7 = vrot.slane %v2992_v56, 4  ;;  %3029 = vst.msk [vmem:[#allocation3 + $0x100] sm:$0xff] %vm614_vm12, %v4848_v59  ;;  %v3355_v19 = vrot.slane %v3088_v18, 5  ;;  %v4886_v15 = vcombine.low %v7415_v58, %v5763_v44  ;;  %v3328_v35 = vrot.slane %v3326_v0, 4  ;;  %v3465_v17 = vld [vmem:[#allocation3 + $0x1b0] sm:$0xff] }
 0x231   :  { %3349 = vst.msk [vmem:[#allocation3 + $0x188] sm:$0xff] %vm614_vm12, %v4878_v60  ;;  %3368 = vst.msk [vmem:[#allocation3 + $0x1d8] sm:$0xff] %vm614_vm12, %v4884_v53  ;;  %v3331_v21 = vrot.slane %v3329_v2, 5  ;;  %v3335_v3 = vshll.u32 %v3088_v18, 16  ;;  %v4852_v49 = vcombine.low %v3016_v47, %v6995_v1  ;;  %4153 = vmatmul.mubr.bf16.gmra.mrb[84].mxu1 %v3456_v24  ;;  %v7819_v58 = vsel %vm6070_vm13, %v6972_v33, %v6968_v38  ;;  %v3474_v16 = vld [vmem:[#allocation3 + $0x1f8] sm:$0xff]  ;;  %v3416_v25 = vld [vmem:[#allocation3 + $0x28] sm:$0xff] }
 0x232   :  { %3350 = vst.msk [vmem:[#allocation3 + $0x1d0] sm:$0xff] %vm614_vm12, %v4879_v51  ;;  %v2998_v41 = vsel %vm6070_vm13, %v2993_v7, %v2997_v13  ;;  %v3356_v9 = vsel %vm6055_vm11, %v4881_v57, %v3355_v19  ;;  %3377 = vst.msk [vmem:[#allocation3 + $0x228] sm:$0xff] %vm614_vm12, %v4886_v15  ;;  %4160 = vmatprep.mubr.bf16.mxu1 %v3466_v46  ;;  %v3391_v33 = vsel %vm6070_vm13, %v3386_v61, %v7030_v32  ;;  %v3476_v29 = vld [vmem:[#allocation3 + $0x208] sm:$0xff]  ;;  %v3418_v32 = vld [vmem:[#allocation3 + $0x38] sm:$0xff] }
 0x233   :  { %v4850_v26 = vcombine.low %v2998_v41, %v7819_v58  ;;  %v4843_v1 = vcombine.low %v7301_v23, %v2998_v41  ;;  %v3332_v42 = vor.u32 %v3331_v21, %v3328_v35  ;;  %v4885_v20 = vcombine.low %v7494_v8, %v3356_v9  ;;  %3070 = vst.msk [vmem:[#allocation3 + $0x118] sm:$0xff] %vm614_vm12, %v4852_v49  ;;  %v3425_v5 = vld [vmem:[#allocation3 + $0x70] sm:$0xff]  ;;  %v3424_v11 = vld [vmem:[#allocation3 + $0x68] sm:$0xff]  ;;  %v3434_v63 = vld [vmem:[#allocation3 + $0xb8] sm:$0xff] }
 0x234   :  { %4258 = vmatmul.mubr.bf16.gmra.mrb[104].mxu0 %v3467_v39  ;;  %v4889_v30 = vcombine.low %v3356_v9, %v7006_v14  ;;  %v3337_v38 = vrot.slane %v3335_v3, 5  ;;  %v5756_v48 = vld [vmem:[%s7806_s2 + $0x228] sm:$0xff]   ;;  %v3433_v27 = vld [vmem:[#allocation3 + $0xb0] sm:$0xff]  ;;  %v3454_v47 = vld [vmem:[#allocation3 + $0x158] sm:$0xff] }
 0x235   :  { %4265 = vmatprep.mubr.bf16.mxu0 %v3477_v22  ;;  %3058 = vst.msk [vmem:[#allocation3 + $0x110] sm:$0xff] %vm614_vm12, %v4850_v26  ;;  %3011 = vst.msk [vmem:[#allocation3 + $0xf8] sm:$0xff] %vm614_vm12, %v4843_v1  ;;  %v3333_v31 = vrot.slane %v3332_v42, 4  ;;  %v3475_v40 = vld [vmem:[#allocation3 + $0x200] sm:$0xff]  ;;  %v3444_v61 = vld [vmem:[#allocation3 + $0x108] sm:$0xff] }
 0x236   :  { %3369 = vst.msk [vmem:[#allocation3 + $0x220] sm:$0xff] %vm614_vm12, %v4885_v20  ;;  %3410 = vst.msk [vmem:[#allocation3 + $0x238] sm:$0xff] %vm614_vm12, %v4889_v30  ;;  %v5757_v12 = vld [vmem:[%s7806_s2 + $0x230] sm:$0xff]   ;;  %v5758_v55 = vld [vmem:[%s7806_s2 + $0x238] sm:$0xff]  }
 0x237   :  { %v3338_v23 = vsel %vm6070_vm13, %v3333_v31, %v3337_v38  ;;  %v3443_v62 = vld [vmem:[#allocation3 + $0x100] sm:$0xff]  ;;  %v3452_v18 = vld [vmem:[#allocation3 + $0x148] sm:$0xff]  ;;  %v3453_v56 = vld [vmem:[#allocation3 + $0x150] sm:$0xff] }
 0x238   :  { %v4887_v8 = vcombine.low %v3338_v23, %v3391_v33  ;;  %v4880_v14 = vcombine.low %v7520_v50, %v3338_v23  ;;  %v5753_v50 = vld [vmem:[%s7806_s2 + $0x210] sm:$0xff]   ;;  %v3463_v59 = vld [vmem:[#allocation3 + $0x1a0] sm:$0xff]  ;;  %v3462_v13 = vld [vmem:[#allocation3 + $0x198] sm:$0xff] }
 0x239   :  { %4161 = vmatmul.mubr.bf16.gmra.mrb[88].mxu1 %v3465_v17  ;;  %v3451_v60 = vld [vmem:[#allocation3 + $0x140] sm:$0xff]  ;;  %v3461_v53 = vld [vmem:[#allocation3 + $0x190] sm:$0xff]  ;;  %v3472_v0 = vld [vmem:[#allocation3 + $0x1e8] sm:$0xff] }
 0x23a   :  { %3398 = vst.msk [vmem:[#allocation3 + $0x230] sm:$0xff] %vm614_vm12, %v4887_v8  ;;  %3351 = vst.msk [vmem:[#allocation3 + $0x218] sm:$0xff] %vm614_vm12, %v4880_v14  ;;  %4168 = vmatprep.mubr.bf16.mxu1 %v3475_v40  ;;  %v3460_v2 = vld [vmem:[#allocation3 + $0x188] sm:$0xff]  ;;  %v3470_v51 = vld [vmem:[#allocation3 + $0x1d8] sm:$0xff] }
 0x23b   :  { %v3471_v7 = vld [vmem:[#allocation3 + $0x1e0] sm:$0xff]  ;;  %v3469_v19 = vld [vmem:[#allocation3 + $0x1d0] sm:$0xff]  ;;  %v3480_v15 = vld [vmem:[#allocation3 + $0x228] sm:$0xff] }
 0x23c   :  { %4266 = vmatmul.mubr.bf16.gmra.mrb[108].mxu0 %v3476_v29  ;;  %v3445_v45 = vld [vmem:[#allocation3 + $0x110] sm:$0xff]  ;;  %v3442_v28 = vld [vmem:[#allocation3 + $0xf8] sm:$0xff]  ;;  %v3419_v21 = vld [vmem:[#allocation3 + $0x40] sm:$0xff] }
 0x23d   :  { %4403 = vmatprep.mubr.bf16.mxu0 %v3418_v32  ;;  %v3479_v44 = vld [vmem:[#allocation3 + $0x220] sm:$0xff]  ;;  %v3428_v3 = vld [vmem:[#allocation3 + $0x88] sm:$0xff]  ;;  %v3437_v49 = vld [vmem:[#allocation3 + $0xd0] sm:$0xff] }
 0x23e   :  { %v3446_v24 = vld [vmem:[#allocation3 + $0x118] sm:$0xff]  ;;  %v3455_v41 = vld [vmem:[#allocation3 + $0x160] sm:$0xff]  ;;  %v3464_v9 = vld [vmem:[#allocation3 + $0x1a8] sm:$0xff] }
 0x23f   :  { %v3473_v46 = vld [vmem:[#allocation3 + $0x1f0] sm:$0xff]  ;;  %v3482_v39 = vld [vmem:[#allocation3 + $0x238] sm:$0xff]  ;;  %v7614_v31 = vld [vmem:[%s7807_s3 + $0x1] ss:$0 sm:$0xff] }
 0x241   :  { %4169 = vmatmul.mubr.bf16.gmra.mrb[92].mxu1 %v3474_v16  ;;  %v3481_v57 = vld [vmem:[#allocation3 + $0x230] sm:$0xff]  ;;  %v3478_v35 = vld [vmem:[#allocation3 + $0x218] sm:$0xff] }
 0x242   :  { %4306 = vmatprep.mubr.bf16.mxu1 %v3416_v25 }
 0x244   :  { %4404 = vmatmul.mubr.bf16.vlgmr.msra.gmra.mrb[112].mxu0 %v3417_v36 }
 0x245   :  { %4411 = vmatprep.mubr.bf16.mxu0 %v3427_v43 }
 0x249   :  { %4307 = vmatmul.mubr.bf16.vlgmr.msra.gmra.mrb[96].mxu1 %v3415_v54 }
 0x24a   :  { %5572 = vmatpush3.bf16.msra.mxu1 %v7480_v4  ;;  %4314 = vmatprep.mubr.bf16.mxu1 %v3425_v5  ;;  %v3435_v4 = vld [vmem:[#allocation3 + $0xc0] sm:$0xff] }
 0x24b   :  { %5573 = vmatprep.subr.bf16.mxu1 %v5752_v37 }
 0x24c   :  { %4412 = vmatmul.mubr.bf16.gmra.mrb[116].mxu0 %v3426_v10 }
 0x24d   :  { %4419 = vmatprep.mubr.bf16.mxu0 %v3436_v6 }
 0x24e   :  { %5574 = vmatpush3.bf16.msra.mxu1 %v5752_v37 }
 0x24f   :  { %5575 = vmatprep.subr.bf16.mxu1 %v5753_v50 }
 0x251   :  { %4315 = vmatmul.mubr.bf16.gmra.mrb[100].mxu1 %v3424_v11 }
 0x252   :  { %4322 = vmatprep.mubr.bf16.mxu1 %v3434_v63  ;;  %5576 = vmatpush3.bf16.msra.mxu1 %v5753_v50 }
 0x253   :  { %5577 = vmatprep.subr.bf16.mxu1 %v5754_v52 }
 0x254   :  { %4420 = vmatmul.mubr.bf16.gmra.mrb[120].mxu0 %v3435_v4 }
 0x255   :  { %4427 = vmatprep.mubr.bf16.mxu0 %v3445_v45 }
 0x256   :  { %5578 = vmatpush3.bf16.msra.mxu1 %v5754_v52 }
 0x257   :  { %5579 = vmatprep.subr.bf16.mxu1 %v5755_v34 }
 0x259   :  { %4323 = vmatmul.mubr.bf16.gmra.mrb[104].mxu1 %v3433_v27 }
 0x25a   :  { %4330 = vmatprep.mubr.bf16.mxu1 %v3443_v62  ;;  %5580 = vmatpush3.bf16.msra.mxu1 %v5755_v34 }
 0x25b   :  { %5581 = vmatprep.subr.bf16.mxu1 %v5756_v48 }
 0x25c   :  { %4428 = vmatmul.mubr.bf16.gmra.mrb[124].mxu0 %v3444_v61 }
 0x25d   :  { %4435 = vmatprep.mubr.bf16.mxu0 %v3454_v47 }
 0x25e   :  { %5582 = vmatpush3.bf16.msra.mxu1 %v5756_v48 }
 0x25f   :  { %5583 = vmatprep.subr.bf16.mxu1 %v5757_v12 }
 0x261   :  { %4331 = vmatmul.mubr.bf16.gmra.mrb[108].mxu1 %v3442_v28 }
 0x262   :  { %4338 = vmatprep.mubr.bf16.mxu1 %v3452_v18  ;;  %5584 = vmatpush3.bf16.msra.mxu1 %v5757_v12 }
 0x263   :  { %5585 = vmatprep.subr.bf16.mxu1 %v5758_v55 }
 0x264   :  { %4436 = vmatmul.mubr.bf16.gmra.mrb[128].mxu0 %v3453_v56 }
 0x265   :  { %4443 = vmatprep.mubr.bf16.mxu0 %v3463_v59 }
 0x266   :  { %5586 = vmatpush3.bf16.msra.mxu1 %v5758_v55 }
 0x269   :  { %4339 = vmatmul.mubr.bf16.gmra.mrb[112].mxu1 %v3451_v60 }
 0x26a   :  { %4346 = vmatprep.mubr.bf16.mxu1 %v3461_v53 }
 0x26c   :  { %4444 = vmatmul.mubr.bf16.gmra.mrb[132].mxu0 %v3462_v13 }
 0x26d   :  { %4451 = vmatprep.mubr.bf16.mxu0 %v3472_v0 }
 0x271   :  { %4347 = vmatmul.mubr.bf16.gmra.mrb[116].mxu1 %v3460_v2 }
 0x272   :  { %4354 = vmatprep.mubr.bf16.mxu1 %v3470_v51 }
 0x274   :  { %4452 = vmatmul.mubr.bf16.gmra.mrb[136].mxu0 %v3471_v7 }
 0x275   :  { %4459 = vmatprep.mubr.bf16.mxu0 %v3481_v57 }
 0x279   :  { %4355 = vmatmul.mubr.bf16.gmra.mrb[120].mxu1 %v3469_v19 }
 0x27a   :  { %4362 = vmatprep.mubr.bf16.mxu1 %v3479_v44 }
 0x27c   :  { %4460 = vmatmul.mubr.bf16.gmra.mrb[140].mxu0 %v3480_v15 }
 0x281   :  { %4363 = vmatmul.mubr.bf16.gmra.mrb[124].mxu1 %v3478_v35 }
 0x282   :  { %5587 = vmatprep.mubr.bf16.mxu1 %v3419_v21 }
 0x289   :  { %5588 = vmatmul.mubr.bf16.vlgmr.msra.gmra.mrb[128].mxu1 %v3428_v3 }
 0x28a   :  { %5591 = vmatprep.mubr.bf16.mxu1 %v3437_v49 }
 0x291   :  { %5592 = vmatmul.mubr.bf16.gmra.mrb[132].mxu1 %v3446_v24 }
 0x292   :  { %5595 = vmatprep.mubr.bf16.mxu1 %v3455_v41 }
 0x299   :  { %5596 = vmatmul.mubr.bf16.gmra.mrb[136].mxu1 %v3464_v9 }
 0x29a   :  { %5599 = vmatprep.mubr.bf16.mxu1 %v3473_v46 }
 0x2a1   :  { %5600 = vmatmul.mubr.bf16.gmra.mrb[140].mxu1 %v3482_v39 }
 0x2d5   :  { %v5347_v58 = vpop.f32.mrb[80].mxu0 }
 0x2d6   :  { %v5348_v26 = vpop.f32.mrb[81].mxu0 }
 0x2d7   :  { %v5349_v1 = vadd.f32 %v5348_v26, %v5347_v58  ;;  %v5350_v42 = vpop.f32.mrb[82].mxu0 }
 0x2d8   :  { %v5351_v20 = vpop.f32.mrb[83].mxu0 }
 0x2d9   :  { %v5352_v22 = vadd.f32 %v5351_v20, %v5350_v42 }
 0x2dc   :  { %v5283_v30 = vpop.f32.mrb[64].mxu1 }
 0x2dd   :  { %v5284_v38 = vpop.f32.mrb[65].mxu1 }
 0x2de   :  { %v5285_v23 = vadd.f32 %v5284_v38, %v5283_v30  ;;  %v5286_v8 = vpop.f32.mrb[66].mxu1 }
 0x2df   :  { %v5353_v33 = vpop.f32.mrb[84].mxu0  ;;  %v5287_v40 = vpop.f32.mrb[67].mxu1 }
 0x2e0   :  { %v5354_v14 = vpop.f32.mrb[85].mxu0  ;;  %v4115_v32 = vadd.f32 %v5285_v23, %v7614_v31  ;;  %v5288_v16 = vadd.f32 %v5287_v40, %v5286_v8 }
 0x2e1   :  { %v5355_v17 = vadd.f32 %v5354_v14, %v5353_v33  ;;  %v5356_v29 = vpop.f32.mrb[86].mxu0 }
 0x2e2   :  { %v5357_v25 = vpop.f32.mrb[87].mxu0  ;;  %v4118_v43 = vadd.f32 %v5288_v16, %v7614_v31  ;;  %v7618_v37 = vadd.f32 %v5349_v1, %v4115_v32 }
 0x2e3   :  { %v5358_v36 = vadd.f32 %v5357_v25, %v5356_v29 }
 0x2e4   :  { %v5289_v54 = vpop.f32.mrb[68].mxu1  ;;  %v7620_v5 = vadd.f32 %v5352_v22, %v4118_v43 }
 0x2e5   :  { %v5290_v10 = vpop.f32.mrb[69].mxu1 }
 0x2e6   :  { %v5291_v50 = vadd.f32 %v5290_v10, %v5289_v54  ;;  %v5292_v52 = vpop.f32.mrb[70].mxu1 }
 0x2e7   :  { %v5359_v6 = vpop.f32.mrb[88].mxu0  ;;  %v5293_v4 = vpop.f32.mrb[71].mxu1 }
 0x2e8   :  { %v5360_v11 = vpop.f32.mrb[89].mxu0  ;;  %v4123_v34 = vadd.f32 %v5291_v50, %v7614_v31  ;;  %v5294_v48 = vadd.f32 %v5293_v4, %v5292_v52 }
 0x2e9   :  { %v5361_v63 = vadd.f32 %v5360_v11, %v5359_v6  ;;  %v5362_v45 = vpop.f32.mrb[90].mxu0 }
 0x2ea   :  { %v5363_v27 = vpop.f32.mrb[91].mxu0  ;;  %v4126_v61 = vadd.f32 %v5294_v48, %v7614_v31  ;;  %v7624_v47 = vadd.f32 %v5355_v17, %v4123_v34 }
 0x2eb   :  { %v5364_v62 = vadd.f32 %v5363_v27, %v5362_v45 }
 0x2ec   :  { %v5295_v12 = vpop.f32.mrb[72].mxu1  ;;  %v7626_v55 = vadd.f32 %v5358_v36, %v4126_v61 }
 0x2ed   :  { %v5296_v28 = vpop.f32.mrb[73].mxu1 }
 0x2ee   :  { %v5297_v56 = vadd.f32 %v5296_v28, %v5295_v12  ;;  %v5298_v59 = vpop.f32.mrb[74].mxu1 }
 0x2ef   :  { %v5365_v18 = vpop.f32.mrb[92].mxu0  ;;  %v5299_v13 = vpop.f32.mrb[75].mxu1 }
 0x2f0   :  { %v5366_v60 = vpop.f32.mrb[93].mxu0  ;;  %v4131_v2 = vadd.f32 %v5297_v56, %v7614_v31  ;;  %v5300_v51 = vadd.f32 %v5299_v13, %v5298_v59 }
 0x2f1   :  { %v5367_v53 = vadd.f32 %v5366_v60, %v5365_v18  ;;  %v5368_v0 = vpop.f32.mrb[94].mxu0 }
 0x2f2   :  { %v5369_v7 = vpop.f32.mrb[95].mxu0  ;;  %v4134_v19 = vadd.f32 %v5300_v51, %v7614_v31  ;;  %v7630_v44 = vadd.f32 %v5361_v63, %v4131_v2 }
 0x2f3   :  { %v5370_v57 = vadd.f32 %v5369_v7, %v5368_v0 }
 0x2f4   :  { %v5301_v15 = vpop.f32.mrb[76].mxu1  ;;  %v7632_v35 = vadd.f32 %v5364_v62, %v4134_v19 }
 0x2f5   :  { %v5302_v21 = vpop.f32.mrb[77].mxu1 }
 0x2f6   :  { %v5303_v49 = vadd.f32 %v5302_v21, %v5301_v15  ;;  %v5304_v24 = vpop.f32.mrb[78].mxu1 }
 0x2f7   :  { %v5371_v3 = vpop.f32.mrb[96].mxu0  ;;  %v5305_v46 = vpop.f32.mrb[79].mxu1 }
 0x2f8   :  { %v5372_v41 = vpop.f32.mrb[97].mxu0  ;;  %v4139_v58 = vadd.f32 %v5303_v49, %v7614_v31  ;;  %v5306_v26 = vadd.f32 %v5305_v46, %v5304_v24 }
 0x2f9   :  { %v5373_v9 = vadd.f32 %v5372_v41, %v5371_v3  ;;  %v5374_v39 = vpop.f32.mrb[98].mxu0 }
 0x2fa   :  { %v5375_v1 = vpop.f32.mrb[99].mxu0  ;;  %v4142_v20 = vadd.f32 %v5306_v26, %v7614_v31  ;;  %v7636_v22 = vadd.f32 %v5367_v53, %v4139_v58 }
 0x2fb   :  { %v5376_v42 = vadd.f32 %v5375_v1, %v5374_v39 }
 0x2fc   :  { %v5307_v30 = vpop.f32.mrb[80].mxu1  ;;  %v7638_v38 = vadd.f32 %v5370_v57, %v4142_v20 }
 0x2fd   :  { %v5308_v33 = vpop.f32.mrb[81].mxu1 }
 0x2fe   :  { %v5309_v8 = vadd.f32 %v5308_v33, %v5307_v30  ;;  %v5310_v14 = vpop.f32.mrb[82].mxu1 }
 0x2ff   :  { %v5377_v23 = vpop.f32.mrb[100].mxu0  ;;  %v5311_v29 = vpop.f32.mrb[83].mxu1 }
 0x300   :  { %v5378_v17 = vpop.f32.mrb[101].mxu0  ;;  %v4147_v16 = vadd.f32 %v5309_v8, %v7614_v31  ;;  %v5312_v25 = vadd.f32 %v5311_v29, %v5310_v14 }
 0x301   :  { %v5379_v40 = vadd.f32 %v5378_v17, %v5377_v23  ;;  %v5380_v32 = vpop.f32.mrb[102].mxu0 }
 0x302   :  { %v5381_v36 = vpop.f32.mrb[103].mxu0  ;;  %v4150_v54 = vadd.f32 %v5312_v25, %v7614_v31  ;;  %v7642_v10 = vadd.f32 %v5373_v9, %v4147_v16 }
 0x303   :  { %v5382_v43 = vadd.f32 %v5381_v36, %v5380_v32 }
 0x304   :  { %v5313_v6 = vpop.f32.mrb[84].mxu1  ;;  %v7644_v50 = vadd.f32 %v5376_v42, %v4150_v54 }
 0x305   :  { %v5314_v52 = vpop.f32.mrb[85].mxu1 }
 0x306   :  { %v5315_v63 = vadd.f32 %v5314_v52, %v5313_v6  ;;  %v5316_v4 = vpop.f32.mrb[86].mxu1 }
 0x307   :  { %v5383_v11 = vpop.f32.mrb[104].mxu0  ;;  %v5317_v48 = vpop.f32.mrb[87].mxu1 }
 0x308   :  { %v5384_v45 = vpop.f32.mrb[105].mxu0  ;;  %v4155_v62 = vadd.f32 %v5315_v63, %v7614_v31  ;;  %v5318_v61 = vadd.f32 %v5317_v48, %v5316_v4 }
 0x309   :  { %v5385_v34 = vadd.f32 %v5384_v45, %v5383_v11  ;;  %v5386_v27 = vpop.f32.mrb[106].mxu0 }
 0x30a   :  { %v5387_v12 = vpop.f32.mrb[107].mxu0  ;;  %v4158_v18 = vadd.f32 %v5318_v61, %v7614_v31  ;;  %v7648_v56 = vadd.f32 %v5379_v40, %v4155_v62 }
 0x30b   :  { %v5388_v28 = vadd.f32 %v5387_v12, %v5386_v27 }
 0x30c   :  { %v5319_v59 = vpop.f32.mrb[88].mxu1  ;;  %v7650_v60 = vadd.f32 %v5382_v43, %v4158_v18 }
 0x30d   :  { %v5320_v53 = vpop.f32.mrb[89].mxu1 }
 0x30e   :  { %v5321_v0 = vadd.f32 %v5320_v53, %v5319_v59  ;;  %v5322_v2 = vpop.f32.mrb[90].mxu1 }
 0x30f   :  { %v5389_v13 = vpop.f32.mrb[108].mxu0  ;;  %v5323_v57 = vpop.f32.mrb[91].mxu1 }
 0x310   :  { %v5390_v51 = vpop.f32.mrb[109].mxu0  ;;  %v4163_v15 = vadd.f32 %v5321_v0, %v7614_v31  ;;  %v5324_v21 = vadd.f32 %v5323_v57, %v5322_v2 }
 0x311   :  { %v5391_v7 = vadd.f32 %v5390_v51, %v5389_v13  ;;  %v5392_v19 = vpop.f32.mrb[110].mxu0 }
 0x312   :  { %v5393_v3 = vpop.f32.mrb[111].mxu0  ;;  %v4166_v24 = vadd.f32 %v5324_v21, %v7614_v31  ;;  %v7654_v41 = vadd.f32 %v5385_v34, %v4163_v15 }
 0x313   :  { %v5394_v49 = vadd.f32 %v5393_v3, %v5392_v19 }
 0x314   :  { %v5325_v9 = vpop.f32.mrb[92].mxu1  ;;  %v7656_v46 = vadd.f32 %v5388_v28, %v4166_v24 }
 0x315   :  { %v5326_v39 = vpop.f32.mrb[93].mxu1 }
 0x316   :  { %v5327_v26 = vadd.f32 %v5326_v39, %v5325_v9  ;;  %v5328_v1 = vpop.f32.mrb[94].mxu1 }
 0x317   :  { %v5475_v58 = vpop.f32.mrb[112].mxu0  ;;  %v5329_v30 = vpop.f32.mrb[95].mxu1 }
 0x318   :  { %v5476_v42 = vpop.f32.mrb[113].mxu0  ;;  %v4171_v23 = vadd.f32 %v5327_v26, %v7614_v31  ;;  %v5330_v8 = vadd.f32 %v5329_v30, %v5328_v1 }
 0x319   :  { %v5477_v20 = vadd.f32 %v5476_v42, %v5475_v58  ;;  %v5478_v33 = vpop.f32.mrb[114].mxu0 }
 0x31a   :  { %v5479_v14 = vpop.f32.mrb[115].mxu0  ;;  %v4174_v40 = vadd.f32 %v5330_v8, %v7614_v31  ;;  %v7660_v29 = vadd.f32 %v5391_v7, %v4171_v23 }
 0x31b   :  { %v5480_v17 = vadd.f32 %v5479_v14, %v5478_v33 }
 0x31c   :  { %v5411_v32 = vpop.f32.mrb[96].mxu1  ;;  %v7662_v16 = vadd.f32 %v5394_v49, %v4174_v40 }
 0x31d   :  { %v5412_v25 = vpop.f32.mrb[97].mxu1 }
 0x31e   :  { %v5413_v36 = vadd.f32 %v5412_v25, %v5411_v32  ;;  %v5414_v54 = vpop.f32.mrb[98].mxu1 }
 0x31f   :  { %v5481_v43 = vpop.f32.mrb[116].mxu0  ;;  %v5415_v52 = vpop.f32.mrb[99].mxu1 }
 0x320   :  { %v5482_v6 = vpop.f32.mrb[117].mxu0  ;;  %v4309_v11 = vadd.f32 %v5413_v36, %v7618_v37  ;;  %v5416_v4 = vadd.f32 %v5415_v52, %v5414_v54 }
 0x321   :  { %v5483_v63 = vadd.f32 %v5482_v6, %v5481_v43  ;;  %v5484_v45 = vpop.f32.mrb[118].mxu0 }
 0x322   :  { %v5485_v34 = vpop.f32.mrb[119].mxu0  ;;  %v4312_v48 = vadd.f32 %v5416_v4, %v7620_v5  ;;  %v7666_v27 = vadd.f32 %v5477_v20, %v4309_v11 }
 0x323   :  { %v5486_v31 = vadd.f32 %v5485_v34, %v5484_v45 }
 0x324   :  { %v5417_v62 = vpop.f32.mrb[100].mxu1  ;;  %v7668_v61 = vadd.f32 %v5480_v17, %v4312_v48 }
 0x325   :  { %v5418_v12 = vpop.f32.mrb[101].mxu1 }
 0x326   :  { %v5419_v28 = vadd.f32 %v5418_v12, %v5417_v62  ;;  %v5420_v59 = vpop.f32.mrb[102].mxu1 }
 0x327   :  { %v5487_v18 = vpop.f32.mrb[120].mxu0  ;;  %v5421_v13 = vpop.f32.mrb[103].mxu1 }
 0x328   :  { %v5488_v53 = vpop.f32.mrb[121].mxu0  ;;  %v4317_v37 = vadd.f32 %v5419_v28, %v7624_v47  ;;  %v5422_v2 = vadd.f32 %v5421_v13, %v5420_v59 }
 0x329   :  { %v5489_v0 = vadd.f32 %v5488_v53, %v5487_v18  ;;  %v5490_v51 = vpop.f32.mrb[122].mxu0 }
 0x32a   :  { %v5491_v7 = vpop.f32.mrb[123].mxu0  ;;  %v4320_v5 = vadd.f32 %v5422_v2, %v7626_v55  ;;  %v7672_v19 = vadd.f32 %v5483_v63, %v4317_v37 }
 0x32b   :  { %v5492_v57 = vadd.f32 %v5491_v7, %v5490_v51 }
 0x32c   :  { %v5423_v15 = vpop.f32.mrb[104].mxu1  ;;  %v7674_v21 = vadd.f32 %v5486_v31, %v4320_v5 }
 0x32d   :  { %v5424_v3 = vpop.f32.mrb[105].mxu1 }
 0x32e   :  { %v5425_v49 = vadd.f32 %v5424_v3, %v5423_v15  ;;  %v5426_v9 = vpop.f32.mrb[106].mxu1 }
 0x32f   :  { %v5493_v24 = vpop.f32.mrb[124].mxu0  ;;  %v5427_v58 = vpop.f32.mrb[107].mxu1 }
 0x330   :  { %v5494_v39 = vpop.f32.mrb[125].mxu0  ;;  %v4325_v47 = vadd.f32 %v5425_v49, %v7630_v44  ;;  %v5428_v1 = vadd.f32 %v5427_v58, %v5426_v9 }
 0x331   :  { %v5495_v26 = vadd.f32 %v5494_v39, %v5493_v24  ;;  %v5496_v42 = vpop.f32.mrb[126].mxu0 }
 0x332   :  { %v5497_v20 = vpop.f32.mrb[127].mxu0  ;;  %v4328_v55 = vadd.f32 %v5428_v1, %v7632_v35  ;;  %v7678_v33 = vadd.f32 %v5489_v0, %v4325_v47 }
 0x333   :  { %v5498_v30 = vadd.f32 %v5497_v20, %v5496_v42 }
 0x334   :  { %v5429_v23 = vpop.f32.mrb[108].mxu1  ;;  %v7680_v8 = vadd.f32 %v5492_v57, %v4328_v55 }
 0x335   :  { %v5430_v14 = vpop.f32.mrb[109].mxu1 }
 0x336   :  { %v5431_v17 = vadd.f32 %v5430_v14, %v5429_v23  ;;  %v5432_v32 = vpop.f32.mrb[110].mxu1 }
 0x337   :  { %v5499_v40 = vpop.f32.mrb[128].mxu0  ;;  %v5433_v36 = vpop.f32.mrb[111].mxu1 }
 0x338   :  { %v5500_v25 = vpop.f32.mrb[129].mxu0  ;;  %v4333_v44 = vadd.f32 %v5431_v17, %v7636_v22  ;;  %v5434_v54 = vadd.f32 %v5433_v36, %v5432_v32 }
 0x339   :  { %v5501_v43 = vadd.f32 %v5500_v25, %v5499_v40  ;;  %v5502_v6 = vpop.f32.mrb[130].mxu0 }
 0x33a   :  { %v5503_v52 = vpop.f32.mrb[131].mxu0  ;;  %v4336_v35 = vadd.f32 %v5434_v54, %v7638_v38  ;;  %v7684_v63 = vadd.f32 %v5495_v26, %v4333_v44 }
 0x33b   :  { %v5504_v11 = vadd.f32 %v5503_v52, %v5502_v6 }
 0x33c   :  { %v5435_v4 = vpop.f32.mrb[112].mxu1  ;;  %v7686_v45 = vadd.f32 %v5498_v30, %v4336_v35 }
 0x33d   :  { %v5436_v34 = vpop.f32.mrb[113].mxu1 }
 0x33e   :  { %v5437_v48 = vadd.f32 %v5436_v34, %v5435_v4  ;;  %v5438_v62 = vpop.f32.mrb[114].mxu1 }
 0x33f   :  { %v5505_v31 = vpop.f32.mrb[132].mxu0  ;;  %v5439_v28 = vpop.f32.mrb[115].mxu1 }
 0x340   :  { %v5506_v12 = vpop.f32.mrb[133].mxu0  ;;  %v4341_v22 = vadd.f32 %v5437_v48, %v7642_v10  ;;  %v5440_v59 = vadd.f32 %v5439_v28, %v5438_v62 }
 0x341   :  { %v5507_v18 = vadd.f32 %v5506_v12, %v5505_v31  ;;  %v5508_v53 = vpop.f32.mrb[134].mxu0 }
 0x342   :  { %v5509_v13 = vpop.f32.mrb[135].mxu0  ;;  %v4344_v38 = vadd.f32 %v5440_v59, %v7644_v50  ;;  %v7690_v0 = vadd.f32 %v5501_v43, %v4341_v22  ;;  %v3627_v22 = vld [vmem:[%s7804_s0] sm:$0xff] }
 0x343   :  { %v5510_v37 = vadd.f32 %v5509_v13, %v5508_v53 }
 0x344   :  { %v5441_v2 = vpop.f32.mrb[116].mxu1  ;;  %v7692_v51 = vadd.f32 %v5504_v11, %v4344_v38  ;;  %v3628_v38 = vld [vmem:[%s7804_s0 + $0x8] sm:$0xff] }
 0x345   :  { %v5442_v7 = vpop.f32.mrb[117].mxu1 }
 0x346   :  { %v5443_v5 = vadd.f32 %v5442_v7, %v5441_v2  ;;  %v5444_v15 = vpop.f32.mrb[118].mxu1 }
 0x347   :  { %v5511_v57 = vpop.f32.mrb[136].mxu0  ;;  %v5445_v49 = vpop.f32.mrb[119].mxu1 }
 0x348   :  { %v5512_v3 = vpop.f32.mrb[137].mxu0  ;;  %v4349_v10 = vadd.f32 %v5443_v5, %v7648_v56  ;;  %v5446_v9 = vadd.f32 %v5445_v49, %v5444_v15 }
 0x349   :  { %v5513_v24 = vadd.f32 %v5512_v3, %v5511_v57  ;;  %v5514_v39 = vpop.f32.mrb[138].mxu0 }
 0x34a   :  { %v5515_v58 = vpop.f32.mrb[139].mxu0  ;;  %v4352_v50 = vadd.f32 %v5446_v9, %v7650_v60  ;;  %v7696_v26 = vadd.f32 %v5507_v18, %v4349_v10 }
 0x34b   :  { %v5516_v47 = vadd.f32 %v5515_v58, %v5514_v39  ;;  %v3634_v39 = vld [vmem:[%s7804_s0 + $0x38] sm:$0xff] }
 0x34c   :  { %v5447_v1 = vpop.f32.mrb[120].mxu1  ;;  %v7698_v42 = vadd.f32 %v5510_v37, %v4352_v50 }
 0x34d   :  { %v5448_v20 = vpop.f32.mrb[121].mxu1 }
 0x34e   :  { %v5449_v55 = vadd.f32 %v5448_v20, %v5447_v1  ;;  %v5450_v23 = vpop.f32.mrb[122].mxu1 }
 0x34f   :  { %v5517_v30 = vpop.f32.mrb[140].mxu0  ;;  %v5451_v17 = vpop.f32.mrb[123].mxu1 }
 0x350   :  { %v5518_v14 = vpop.f32.mrb[141].mxu0  ;;  %v4357_v56 = vadd.f32 %v5449_v55, %v7654_v41  ;;  %v5452_v32 = vadd.f32 %v5451_v17, %v5450_v23 }
 0x351   :  { %v5519_v40 = vadd.f32 %v5518_v14, %v5517_v30  ;;  %v5520_v25 = vpop.f32.mrb[142].mxu0 }
 0x352   :  { %v5521_v36 = vpop.f32.mrb[143].mxu0  ;;  %v4360_v60 = vadd.f32 %v5452_v32, %v7656_v46  ;;  %v7702_v43 = vadd.f32 %v5513_v24, %v4357_v56  ;;  %v3629_v46 = vld [vmem:[%s7804_s0 + $0x10] sm:$0xff] }
 0x353   :  { %v5522_v44 = vadd.f32 %v5521_v36, %v5520_v25 }
 0x354   :  { %v5453_v54 = vpop.f32.mrb[124].mxu1  ;;  %v7704_v6 = vadd.f32 %v5516_v47, %v4360_v60  ;;  %v3638_v60 = vld [vmem:[%s7804_s0 + $0x58] sm:$0xff] }
 0x355   :  { %v5454_v52 = vpop.f32.mrb[125].mxu1 }
 0x356   :  { %v5455_v35 = vadd.f32 %v5454_v52, %v5453_v54  ;;  %v5456_v11 = vpop.f32.mrb[126].mxu1 }
 0x357   :  { %v5457_v4 = vpop.f32.mrb[127].mxu1 }
 0x358   :  { %v4365_v34 = vadd.f32 %v5455_v35, %v7660_v29  ;;  %v5458_v48 = vadd.f32 %v5457_v4, %v5456_v11 }
 0x35a   :  { %v4368_v41 = vadd.f32 %v5458_v48, %v7662_v16  ;;  %v7708_v31 = vadd.f32 %v5519_v40, %v4365_v34  ;;  %v3630_v16 = vld [vmem:[%s7804_s0 + $0x18] sm:$0xff] }
 0x35c   :  { %v5589_v62 = vpop.f32.mrb[128].mxu1  ;;  %v7713_v12 = vadd.f32 %v5522_v44, %v4368_v41 }
 0x35d   :  { %v4511_v28 = vadd.f32 %v5589_v62, %v7672_v19  ;;  %v4502_v18 = vpop.f32.mrb[129].mxu1 }
 0x35e   :  { %v4503_v29 = vadd.f32 %v4502_v18, %v7666_v27  ;;  %v5590_v59 = vpop.f32.mrb[130].mxu1 }
 0x35f   :  { %v4567_v53 = vadd.f32 %v4511_v28, %v3629_v46  ;;  %v4514_v13 = vadd.f32 %v5590_v59, %v7674_v21  ;;  %v4505_v19 = vpop.f32.mrb[131].mxu1  ;;  %v3633_v21 = vld [vmem:[%s7804_s0 + $0x30] sm:$0xff] }
 0x360   :  { %v4565_v37 = vadd.f32 %v4503_v29, %v3627_v22  ;;  %v4506_v2 = vadd.f32 %v4505_v19, %v7668_v61  ;;  %v3631_v61 = vld [vmem:[%s7804_s0 + $0x20] sm:$0xff] }
 0x361   :  { %v4583_v7 = vmax.f32 %v4567_v53, 0.0  ;;  %v4568_v5 = vadd.f32 %v4514_v13, %v3630_v16  ;;  %v3642_v16 = vld [vmem:[%s7804_s0 + $0x78] sm:$0xff] }
 0x362   :  { %v4581_v57 = vmax.f32 %v4565_v37, 0.0  ;;  %v4566_v27 = vadd.f32 %v4506_v2, %v3628_v38 }
 0x363   :  { %4599 = vst.msk [vmem:[#allocation4 + $0x10] sm:$0xff] %vm614_vm12, %v4583_v7  ;;  %v4584_v15 = vmax.f32 %v4568_v5, 0.0 }
 0x364   :  { %4597 = vst.msk [vmem:[#allocation4] sm:$0xff] %vm614_vm12, %v4581_v57  ;;  %v4582_v3 = vmax.f32 %v4566_v27, 0.0  ;;  %v5593_v49 = vpop.f32.mrb[132].mxu1 }
 0x365   :  { %4600 = vst.msk [vmem:[#allocation4 + $0x18] sm:$0xff] %vm614_vm12, %v4584_v15  ;;  %v4527_v10 = vadd.f32 %v5593_v49, %v7684_v63  ;;  %v4518_v24 = vpop.f32.mrb[133].mxu1  ;;  %v3632_v63 = vld [vmem:[%s7804_s0 + $0x28] sm:$0xff] }
 0x366   :  { %4598 = vst.msk [vmem:[#allocation4 + $0x8] sm:$0xff] %vm614_vm12, %v4582_v3  ;;  %v4519_v9 = vadd.f32 %v4518_v24, %v7678_v33  ;;  %v5594_v58 = vpop.f32.mrb[134].mxu1 }
 0x367   :  { %v4571_v50 = vadd.f32 %v4527_v10, %v3633_v21  ;;  %v4530_v47 = vadd.f32 %v5594_v58, %v7686_v45  ;;  %v4521_v1 = vpop.f32.mrb[135].mxu1  ;;  %v3637_v45 = vld [vmem:[%s7804_s0 + $0x50] sm:$0xff] }
 0x368   :  { %v4569_v20 = vadd.f32 %v4519_v9, %v3631_v61  ;;  %v4522_v55 = vadd.f32 %v4521_v1, %v7680_v8  ;;  %v3635_v8 = vld [vmem:[%s7804_s0 + $0x40] sm:$0xff] }
 0x369   :  { %v4587_v30 = vmax.f32 %v4571_v50, 0.0  ;;  %v4572_v23 = vadd.f32 %v4530_v47, %v3634_v39 }
 0x36a   :  { %v4585_v14 = vmax.f32 %v4569_v20, 0.0  ;;  %v4570_v33 = vadd.f32 %v4522_v55, %v3632_v63 }
 0x36b   :  { %4603 = vst.msk [vmem:[#allocation4 + $0x30] sm:$0xff] %vm614_vm12, %v4587_v30  ;;  %v4588_v17 = vmax.f32 %v4572_v23, 0.0 }
 0x36c   :  { %4601 = vst.msk [vmem:[#allocation4 + $0x20] sm:$0xff] %vm614_vm12, %v4585_v14  ;;  %v4586_v56 = vmax.f32 %v4570_v33, 0.0  ;;  %v5597_v40 = vpop.f32.mrb[136].mxu1 }
 0x36d   :  { %4604 = vst.msk [vmem:[#allocation4 + $0x38] sm:$0xff] %vm614_vm12, %v4588_v17  ;;  %v4543_v32 = vadd.f32 %v5597_v40, %v7696_v26  ;;  %v4534_v25 = vpop.f32.mrb[137].mxu1  ;;  %v3636_v26 = vld [vmem:[%s7804_s0 + $0x48] sm:$0xff] }
 0x36e   :  { %4602 = vst.msk [vmem:[#allocation4 + $0x28] sm:$0xff] %vm614_vm12, %v4586_v56  ;;  %v4535_v36 = vadd.f32 %v4534_v25, %v7690_v0  ;;  %v5598_v44 = vpop.f32.mrb[138].mxu1 }
 0x36f   :  { %v4575_v54 = vadd.f32 %v4543_v32, %v3637_v45  ;;  %v4546_v52 = vadd.f32 %v5598_v44, %v7698_v42  ;;  %v4537_v35 = vpop.f32.mrb[139].mxu1  ;;  %v3641_v42 = vld [vmem:[%s7804_s0 + $0x70] sm:$0xff] }
 0x370   :  { %v4573_v11 = vadd.f32 %v4535_v36, %v3635_v8  ;;  %v4538_v4 = vadd.f32 %v4537_v35, %v7692_v51  ;;  %v3639_v51 = vld [vmem:[%s7804_s0 + $0x60] sm:$0xff] }
 0x371   :  { %v4591_v34 = vmax.f32 %v4575_v54, 0.0  ;;  %v4576_v48 = vadd.f32 %v4546_v52, %v3638_v60 }
 0x372   :  { %v4589_v41 = vmax.f32 %v4573_v11, 0.0  ;;  %v4574_v0 = vadd.f32 %v4538_v4, %v3636_v26 }
 0x373   :  { %4607 = vst.msk [vmem:[#allocation4 + $0x50] sm:$0xff] %vm614_vm12, %v4591_v34  ;;  %v4592_v46 = vmax.f32 %v4576_v48, 0.0 }
 0x374   :  { %4605 = vst.msk [vmem:[#allocation4 + $0x40] sm:$0xff] %vm614_vm12, %v4589_v41  ;;  %v4590_v62 = vmax.f32 %v4574_v0, 0.0  ;;  %v5601_v28 = vpop.f32.mrb[140].mxu1 }
 0x375   :  { %4608 = vst.msk [vmem:[#allocation4 + $0x58] sm:$0xff] %vm614_vm12, %v4592_v46  ;;  %v4559_v22 = vadd.f32 %v5601_v28, %v7708_v31  ;;  %v4550_v18 = vpop.f32.mrb[141].mxu1  ;;  %v3640_v31 = vld [vmem:[%s7804_s0 + $0x68] sm:$0xff]  ;;  %s5764_s0 = scalar_lea.vmem %s4619_s23, 2048 }
 0x376   :  { %4606 = vst.msk [vmem:[#allocation4 + $0x48] sm:$0xff] %vm614_vm12, %v4590_v62  ;;  %v4551_v29 = vadd.f32 %v4550_v18, %v7702_v43  ;;  %v5602_v59 = vpop.f32.mrb[142].mxu1  ;;  %p5765_p0 = scmp.ne.s32.totalorder %s4619_s23, %s5764_s0  ;;  %p5770_p2 = scmp.lt.s32.totalorder %s5764_s0, %s5764_s0 }
 0x377   :  { %v4579_v53 = vadd.f32 %v4559_v22, %v3641_v42  ;;  %v4562_v13 = vadd.f32 %v5602_v59, %v7713_v12  ;;  %v4553_v38 = vpop.f32.mrb[143].mxu1 }
 0x378   :  { %v4577_v19 = vadd.f32 %v4551_v29, %v3639_v51  ;;  %v4554_v37 = vadd.f32 %v4553_v38, %v7704_v6  ;;  %p5771_p3 = por %p5770_p2, %p5769_p1 }
 0x379   :  { %v4595_v2 = vmax.f32 %v4579_v53, 0.0  ;;  %v4580_v7 = vadd.f32 %v4562_v13, %v3642_v16 }
 0x37a   :  { %v4593_v43 = vmax.f32 %v4577_v19, 0.0  ;;  %v4578_v5 = vadd.f32 %v4554_v37, %v3640_v31  ;;  %p5772_p4 = pnand %p5771_p3, %p5765_p0 }
 0x37b   :  { %4611 = vst.msk [vmem:[#allocation4 + $0x70] sm:$0xff] %vm614_vm12, %v4595_v2  ;;  %v4596_v57 = vmax.f32 %v4580_v7, 0.0 }
 0x37c   :  { %4609 = vst.msk [vmem:[#allocation4 + $0x60] sm:$0xff] %vm614_vm12, %v4593_v43  ;;  %v4594_v12 = vmax.f32 %v4578_v5, 0.0 }
 0x37d   :  { %4612 = vst.msk [vmem:[#allocation4 + $0x78] sm:$0xff] %vm614_vm12, %v4596_v57 }
 0x37e   :  { %4610 = vst.msk [vmem:[#allocation4 + $0x68] sm:$0xff] %vm614_vm12, %v4594_v12 }
 0x37f   :  { %5775 = shalt.err (!%p5772_p4)
}
 0x380   :  { %s5776_s26 = scalar_lea.hbm %s7808_s4, 2048 }
 0x381   :  { %p5777_p5 = scmp.ne.s32.totalorder %s7808_s4, %s5776_s26  ;;  %p5780_p6 = scmp.lt.u32.totalorder %s5776_s26, %s7808_s4 }
 0x383   :  { %p5782_p7 = pnand %p5780_p6, %p5777_p5 }
 0x385   :  { %5785 = shalt.err (!%p5782_p7)
}
 0x386   :  { %s5790_s5 = smov 128   ;;  %s5791_s6 = smov 8  }
 0x387   :  { %4624 = dma.vmem_to_hbm [thread:$0]  %s4619_s23, 2048, %s7808_s4, [#allocation5], %s5790_s5, %s5790_s5, %s5791_s6  }
 0x388   :  { %5786 = dma.done.wait [#allocation5], 2048  }
 0x389   :  { %5787 = vsyncadd [#allocation5], 4294965248 }
 0x38a   :  { %4628 = vsyncpa [#allocation5], 1 }

</bundles_post_ra>
